<compile_context>
chip_gen: v5e
topology: v5e:2x2
jax: 0.10.0
libtpu: 0.0.40
codegen_flags: <defaults>
</compile_context>

<pallas_src>
import jax
import jax.numpy as jnp
from jax.experimental import pallas as pl
from jax.experimental.pallas import tpu as pltpu


def _layernorm(x, g, eps=1e-5):
    # matches torch LayerNorm in the module (unbiased=False var, gamma only)
    mean = jnp.mean(x, axis=-1, keepdims=True)
    var = jnp.mean((x - mean) ** 2, axis=-1, keepdims=True)
    return (x - mean) * jax.lax.rsqrt(var + eps) * g


def _l2norm(x, eps=1e-12):
    # matches F.normalize(dim=-1): x / max(||x||_2, eps), expressed via rsqrt
    # so the heavy op lands on the EUP instead of precise sqrt+divide on VALU.
    ss = jnp.sum(x * x, axis=-1, keepdims=True)
    return x * jax.lax.rsqrt(jnp.maximum(ss, eps * eps))


def make_cross_attention_kernel(heads, dim_head, m_real):
    H, D = heads, dim_head

    def kernel(x_ref, ctx_ref, gx_ref, wq_ref, wk_ref, wv_ref, nk_ref, nv_ref,
               qs_ref, ks_ref, wo_ref, go_ref, o_ref, kf_s, vf_s, oh_s):
        f32, bf16 = jnp.float32, jnp.bfloat16
        Mk = ctx_ref.shape[0]          # padded key count (multiple of 128)

        # ---- per-batch K/V build: cached across query tiles (axis 1) ----
        @pl.when(pl.program_id(1) == 0)
        def _build_kv():
            ctx = ctx_ref[...]                                               # (Mk, CDIM) bf16
            k2d = jnp.dot(ctx, wk_ref[...], preferred_element_type=f32)     # (Mk, H*D)
            v2d = jnp.dot(ctx, wv_ref[...], preferred_element_type=f32)     # (Mk, H*D)
            # Null key/value slot: row index == m_real (padded context rows
            # project to exact zeros, so folding the null row is a plain add).
            row = jax.lax.broadcasted_iota(jnp.int32, (Mk, 1), 0)
            nsel = (row == m_real).astype(f32)                               # (Mk, 1)
            ksc = ks_ref[...]                                                # (1, D)
            nk = nk_ref[...]                                                 # (1, D) pre-l2norm*k_scale
            nv = nv_ref[...]                                                 # (1, D)
            for h in range(H):
                kh = k2d[:, h * D:(h + 1) * D]                               # (Mk, D)
                vh = v2d[:, h * D:(h + 1) * D]
                knh = _l2norm(kh) * ksc
                kf_s[h] = (knh + nsel * nk).astype(bf16)
                vf_s[h] = (vh + nsel * nv).astype(bf16)

        # ---- query path (per query tile) ----
        xn = _layernorm(x_ref[...].astype(f32), gx_ref[...])                 # (TQ, DIM)
        q2d = jnp.dot(xn.astype(bf16), wq_ref[...],
                      preferred_element_type=f32)                            # (TQ, H*D)

        # Additive mask for padded key columns (> null slot index).
        col = jax.lax.broadcasted_iota(jnp.int32, (1, Mk), 1)
        key_bias = jnp.where(col > m_real, -1e30, 0.0).astype(f32)           # (1, Mk)

        qsc = qs_ref[...]                                                    # (1, D): q_scale * scale
        for h in range(H):
            qn = (_l2norm(q2d[:, h * D:(h + 1) * D]) * qsc).astype(bf16)     # (TQ, D)
            sim = jnp.einsum('nd,md->nm', qn, kf_s[h],
                             preferred_element_type=f32) + key_bias          # (TQ, Mk)
            # f32 softmax statistics; normalize after the PV matmul via EUP recip.
            mmax = jnp.max(sim, axis=-1, keepdims=True)
            p = jnp.exp(sim - mmax)
            denom = jnp.sum(p, axis=-1, keepdims=True)
            acc = jnp.dot(p.astype(bf16), vf_s[h],
                          preferred_element_type=f32)                        # (TQ, D)
            oh_s[:, h * D:(h + 1) * D] = (
                acc * pl.reciprocal(denom, approx=True)).astype(bf16)

        # Fused output projection: contracts the full H*D depth in one matmul
        # (no (H,TQ,DIM) intermediate, no cross-head VPU reduction).
        out = jnp.dot(oh_s[...], wo_ref[...], preferred_element_type=f32)    # (TQ, DIM)
        out = _layernorm(out, go_ref[...])                                   # to_out LayerNorm
        o_ref[...] = out.astype(o_ref.dtype)

    return kernel


def _vmem_budget():
    """Generation-aware scoped-VMEM limit and query-tile cap."""
    try:
        info = pltpu.get_tpu_info()
        cap = getattr(info, "vmem_capacity_bytes", None) or (64 << 20)
    except Exception:                      # fall back to v7x-conservative budget
        cap = 64 << 20
    if cap >= (96 << 20):                  # v5e / v6e: 128 MiB physical VMEM
        return 96 << 20, 512
    return 48 << 20, 256                   # v7x: 64 MiB per TensorCore


def cross_attention(x, context, params, *, heads, dim_head, scale=8, tq=None):
    B, N, DIM = x.shape
    _, M, CDIM = context.shape
    H, D = heads, dim_head
    inner = H * D
    out_dtype = x.dtype
    f32, bf16 = jnp.float32, jnp.bfloat16

    vmem_limit, tq_cap = _vmem_budget()
    tq = min(N, tq_cap) if tq is None else tq
    assert N % tq == 0 and (tq % 8 == 0 or tq == N), \
        "query tile must divide N (multiple of 8)"

    # Key axis padded to a multiple of 128: rows 0..M-1 are real context, row M
    # is the null key/value slot, the rest is masked inside the kernel.
    Mk = ((M + 1 + 127) // 128) * 128

    # ---- wrapper-side one-time prep (bf16 activations/weights, scale folds) ----
    x_bf = x.astype(bf16)
    ctx_pad = jnp.pad(context.astype(bf16), ((0, 0), (0, Mk - M), (0, 0)))

    w_q = params["w_q"].astype(bf16)                          # (DIM, inner)
    w_kv = params["w_kv"]
    w_k = w_kv[:, :inner].astype(bf16)                        # (CDIM, inner)
    w_v = w_kv[:, inner:].astype(bf16)
    w_o = params["w_out"].astype(bf16)                        # (inner, DIM)

    q_scale = params["q_scale"].reshape(1, D).astype(f32)
    k_scale = params["k_scale"].reshape(1, D).astype(f32)
    qs = q_scale * scale                                      # fold attention scale into q
    null_k = params["null_kv"][0].astype(f32)
    null_v = params["null_kv"][1].astype(f32)
    nk_hat = null_k / jnp.maximum(jnp.linalg.norm(null_k), 1e-12)
    nk = (nk_hat * k_scale).reshape(1, D)                     # pre-l2normed + k_scale
    nv = null_v.reshape(1, D)
    g_x = params["g_x"].reshape(1, DIM).astype(f32)
    g_out = params["g_out"].reshape(1, DIM).astype(f32)

    kernel = make_cross_attention_kernel(H, D, M)

    def full(shape):
        # Grid-invariant input (weights / gammas / scales): constant block index,
        # so Pallas never re-DMAs it.  (Single-buffering these via
        # pipeline_mode=pl.Buffered(1) would additionally halve their VMEM
        # footprint on v7x; left default here for toolchain portability.)
        zeros = (0,) * len(shape)
        return pl.BlockSpec(shape, lambda b, i, _z=zeros: _z)

    # Note: on v7x keep B * (N // tq) >= 2 so both TensorCores get work; the
    # batch axis is the "parallel" one (axis 1 must stay "arbitrary" for the
    # per-batch K/V scratch reuse).
    return pl.pallas_call(
        kernel,
        out_shape=jax.ShapeDtypeStruct((B, N, DIM), out_dtype),
        grid=(B, N // tq),
        in_specs=[
            pl.BlockSpec((None, tq, DIM), lambda b, i: (b, i, 0)),   # x tile (bf16)
            pl.BlockSpec((None, Mk, CDIM), lambda b, i: (b, 0, 0)),  # padded context (bf16)
            full((1, DIM)),        # input LayerNorm gamma
            full((DIM, inner)),    # W_q  (head-fused, bf16)
            full((CDIM, inner)),   # W_k
            full((CDIM, inner)),   # W_v
            full((1, D)),          # null key (pre-l2norm, pre-k_scale)
            full((1, D)),          # null value
            full((1, D)),          # q_scale * scale
            full((1, D)),          # k_scale
            full((inner, DIM)),    # W_out (bf16)
            full((1, DIM)),        # output LayerNorm gamma
        ],
        out_specs=pl.BlockSpec((None, tq, DIM), lambda b, i: (b, i, 0)),
        scratch_shapes=[
            pltpu.VMEM((H, Mk, D), bf16),    # cached K (l2normed, scaled, null folded)
            pltpu.VMEM((H, Mk, D), bf16),    # cached V (null folded)
            pltpu.VMEM((tq, inner), bf16),   # head-merged attention output per tile
        ],
        compiler_params=pltpu.CompilerParams(
            dimension_semantics=("parallel", "arbitrary"),
            vmem_limit_bytes=vmem_limit),
    )(x_bf, ctx_pad, g_x, w_q, w_k, w_v, nk, nv, qs, k_scale, w_o, g_out)


def reference(x, context, params, *, heads, dim_head, scale=8):
    """Plain-JAX f32 mirror of the PyTorch forward (mask=None) for validation."""
    def ln(t, g):
        mean = jnp.mean(t, -1, keepdims=True)
        var = jnp.mean((t - mean) ** 2, -1, keepdims=True)
        return (t - mean) * jax.lax.rsqrt(var + 1e-5) * g

    B, N, _ = x.shape
    inner = heads * dim_head
    xn = ln(x, params["g_x"][0])
    q = xn @ params["w_q"]
    kv = context @ params["w_kv"]
    k, v = kv[..., :inner], kv[..., inner:]

    def split_heads(t):
        return t.reshape(B, -1, heads, dim_head).transpose(0, 2, 1, 3)

    q, k, v = map(split_heads, (q, k, v))
    nk = jnp.broadcast_to(params["null_kv"][0], (B, heads, 1, dim_head))
    nv = jnp.broadcast_to(params["null_kv"][1], (B, heads, 1, dim_head))
    k = jnp.concatenate([nk, k], axis=2)
    v = jnp.concatenate([nv, v], axis=2)

    def l2n(t):
        return t / jnp.maximum(jnp.linalg.norm(t, axis=-1, keepdims=True), 1e-12)

    q = l2n(q) * params["q_scale"][0]
    k = l2n(k) * params["k_scale"][0]
    sim = jnp.einsum("bhid,bhjd->bhij", q, k) * scale
    attn = jax.nn.softmax(sim.astype(jnp.float32), axis=-1).astype(sim.dtype)
    out = jnp.einsum("bhij,bhjd->bhid", attn, v)
    out = out.transpose(0, 2, 1, 3).reshape(B, N, inner)
    out = out @ params["w_out"]
    return ln(out, params["g_out"][0])


# TODO(synk): the optional `mask` argument (F.pad + masked_fill in the PyTorch
# module) is not implemented; this kernel covers the mask=None path only.


if __name__ == "__main__":
    key = jax.random.PRNGKey(0)
    # Small but lane-friendly shapes (DIM multiple of 128 -> lane-dense stores;
    # dim_head=64 matches the module default).
    B, N, M = 2, 64, 8                  # batch, query tokens, context tokens
    DIM, CDIM = 128, 128                # feature dims
    HEADS, DHEAD, SCALE = 2, 64, 8
    INNER = HEADS * DHEAD

    keys = jax.random.split(key, 6)
    x = jax.random.normal(keys[0], (B, N, DIM), jnp.float32)
    context = jax.random.normal(keys[1], (B, M, CDIM), jnp.float32)

    # Deterministic synthetic parameters (shapes per CrossAttention.__init__).
    params = {
        "g_x": jnp.ones((1, DIM), jnp.float32),                                    # LayerNorm.g
        "w_q": 0.05 * jax.random.normal(keys[2], (DIM, INNER), jnp.float32),       # to_q (in, out)
        "w_kv": 0.05 * jax.random.normal(keys[3], (CDIM, 2 * INNER), jnp.float32), # to_kv (in, 2*out)
        "null_kv": jax.random.normal(keys[4], (2, DHEAD), jnp.float32),
        "q_scale": jnp.ones((1, DHEAD), jnp.float32),
        "k_scale": jnp.ones((1, DHEAD), jnp.float32),
        "w_out": 0.05 * jax.random.normal(keys[5], (INNER, DIM), jnp.float32),     # to_out[0]
        "g_out": jnp.ones((1, DIM), jnp.float32),                                  # to_out[1].g
    }

    # tq=32 -> 2 query tiles per batch, exercising the per-batch K/V cache reuse.
    out = cross_attention(x, context, params, heads=HEADS, dim_head=DHEAD,
                          scale=SCALE, tq=32)
    jax.block_until_ready(out)

    ref = reference(x, context, params, heads=HEADS, dim_head=DHEAD, scale=SCALE)
    err = jnp.abs(out - ref)
    max_err = float(jnp.max(err))
    rel_fro = float(jnp.linalg.norm(out - ref) / jnp.linalg.norm(ref))
    assert jnp.all(jnp.isfinite(out)), "non-finite output"
    # Kernel feeds bf16 operands to the MXU (f32 accumulation, f32 softmax /
    # LayerNorm stats) and uses EUP rsqrt/approx-reciprocal; tolerance vs the
    # pure-f32 reference is bf16-level.
    assert rel_fro < 3e-2 and max_err < 2e-1, \
        f"mismatch vs reference: max={max_err}, rel_fro={rel_fro}"
    print("KERNEL_OK")
</pallas_src>

<mosaic_0001>
module attributes {stable_mosaic.version = 11 : i64} {
  func.func @kernel(%arg0: i32, %arg1: i32, %arg2: memref<1x32x128xbf16, #tpu.memory_space<vmem>>, %arg3: memref<1x128x128xbf16, #tpu.memory_space<vmem>>, %arg4: memref<1x128xf32, #tpu.memory_space<vmem>>, %arg5: memref<128x128xbf16, #tpu.memory_space<vmem>>, %arg6: memref<128x128xbf16, #tpu.memory_space<vmem>>, %arg7: memref<128x128xbf16, #tpu.memory_space<vmem>>, %arg8: memref<1x64xf32, #tpu.memory_space<vmem>>, %arg9: memref<1x64xf32, #tpu.memory_space<vmem>>, %arg10: memref<1x64xf32, #tpu.memory_space<vmem>>, %arg11: memref<1x64xf32, #tpu.memory_space<vmem>>, %arg12: memref<128x128xbf16, #tpu.memory_space<vmem>>, %arg13: memref<1x128xf32, #tpu.memory_space<vmem>>, %arg14: memref<1x32x128xf32, #tpu.memory_space<vmem>>, %arg15: memref<2x128x64xbf16, #tpu.memory_space<vmem>>, %arg16: memref<2x128x64xbf16, #tpu.memory_space<vmem>>, %arg17: memref<32x128xbf16, #tpu.memory_space<vmem>>) attributes {dimension_semantics = [#tpu.dimension_semantics<parallel>, #tpu.dimension_semantics<arbitrary>], iteration_bounds = array<i64: 2, 2>, scalar_prefetch = 0 : i64, scratch_operands = 3 : i64, tpu.core_type = #tpu.core_type<tc>, window_params = [{transform_indices = @transform_0, window_bounds = array<i64: 1, 32, 128>}, {transform_indices = @transform_1, window_bounds = array<i64: 1, 128, 128>}, {pipeline_mode = #tpu.pipeline_mode<synchronous>, transform_indices = @transform_2, window_bounds = array<i64: 1, 128>}, {pipeline_mode = #tpu.pipeline_mode<synchronous>, transform_indices = @transform_3, window_bounds = array<i64: 128, 128>}, {pipeline_mode = #tpu.pipeline_mode<synchronous>, transform_indices = @transform_4, window_bounds = array<i64: 128, 128>}, {pipeline_mode = #tpu.pipeline_mode<synchronous>, transform_indices = @transform_5, window_bounds = array<i64: 128, 128>}, {pipeline_mode = #tpu.pipeline_mode<synchronous>, transform_indices = @transform_6, window_bounds = array<i64: 1, 64>}, {pipeline_mode = #tpu.pipeline_mode<synchronous>, transform_indices = @transform_7, window_bounds = array<i64: 1, 64>}, {pipeline_mode = #tpu.pipeline_mode<synchronous>, transform_indices = @transform_8, window_bounds = array<i64: 1, 64>}, {pipeline_mode = #tpu.pipeline_mode<synchronous>, transform_indices = @transform_9, window_bounds = array<i64: 1, 64>}, {pipeline_mode = #tpu.pipeline_mode<synchronous>, transform_indices = @transform_10, window_bounds = array<i64: 128, 128>}, {pipeline_mode = #tpu.pipeline_mode<synchronous>, transform_indices = @transform_11, window_bounds = array<i64: 1, 128>}, {transform_indices = @transform_12, window_bounds = array<i64: 1, 32, 128>}]} {
    %c0_i32 = arith.constant 0 : i32
    %0 = arith.cmpi eq, %arg1, %c0_i32 : i32
    %1 = arith.extui %0 : i1 to i32
    %c0_i32_0 = arith.constant 0 : i32
    %2 = arith.cmpi ne, %1, %c0_i32_0 : i32
    scf.if %2 {
      %c0_57 = arith.constant 0 : index
      %c0_58 = arith.constant 0 : index
      %c0_59 = arith.constant 0 : index
      %130 = vector.load %arg3[%c0_57, %c0_58, %c0_59] : memref<1x128x128xbf16, #tpu.memory_space<vmem>>, vector<1x128x128xbf16>
      %131 = vector.shape_cast %130 : vector<1x128x128xbf16> to vector<128x128xbf16>
      %c0_60 = arith.constant 0 : index
      %c0_61 = arith.constant 0 : index
      %132 = vector.load %arg6[%c0_60, %c0_61] : memref<128x128xbf16, #tpu.memory_space<vmem>>, vector<128x128xbf16>
      %cst_62 = arith.constant dense<0.000000e+00> : vector<128x128xf32>
      %133 = tpu.matmul %131, %132, %cst_62 {dimension_numbers = #tpu.dot_dimension_numbers<[1], [0], [0], [1], [0, 0, 1, 1], [], []>} : vector<128x128xbf16>, vector<128x128xbf16>, vector<128x128xf32> -> vector<128x128xf32>
      %c0_63 = arith.constant 0 : index
      %c0_64 = arith.constant 0 : index
      %134 = vector.load %arg7[%c0_63, %c0_64] : memref<128x128xbf16, #tpu.memory_space<vmem>>, vector<128x128xbf16>
      %cst_65 = arith.constant dense<0.000000e+00> : vector<128x128xf32>
      %135 = tpu.matmul %131, %134, %cst_65 {dimension_numbers = #tpu.dot_dimension_numbers<[1], [0], [0], [1], [0, 0, 1, 1], [], []>} : vector<128x128xbf16>, vector<128x128xbf16>, vector<128x128xf32> -> vector<128x128xf32>
      %136 = tpu.iota {dimensions = array<i32: 0>} : vector<128x1xi32>
      %c8_i32_66 = arith.constant 8 : i32
      %137 = vector.broadcast %c8_i32_66 : i32 to vector<128x1xi32>
      %138 = arith.cmpi eq, %136, %137 : vector<128x1xi32>
      %139 = arith.extui %138 : vector<128x1xi1> to vector<128x1xi32>
      %140 = arith.sitofp %139 : vector<128x1xi32> to vector<128x1xf32>
      %c0_67 = arith.constant 0 : index
      %c0_68 = arith.constant 0 : index
      %141 = vector.load %arg11[%c0_67, %c0_68] : memref<1x64xf32, #tpu.memory_space<vmem>>, vector<1x64xf32>
      %c0_69 = arith.constant 0 : index
      %c0_70 = arith.constant 0 : index
      %142 = vector.load %arg8[%c0_69, %c0_70] : memref<1x64xf32, #tpu.memory_space<vmem>>, vector<1x64xf32>
      %c0_71 = arith.constant 0 : index
      %c0_72 = arith.constant 0 : index
      %143 = vector.load %arg9[%c0_71, %c0_72] : memref<1x64xf32, #tpu.memory_space<vmem>>, vector<1x64xf32>
      %144 = vector.extract_strided_slice %133 {offsets = [0, 0], sizes = [128, 64], strides = [1, 1]} : vector<128x128xf32> to vector<128x64xf32>
      %145 = vector.extract_strided_slice %135 {offsets = [0, 0], sizes = [128, 64], strides = [1, 1]} : vector<128x128xf32> to vector<128x64xf32>
      %146 = arith.mulf %144, %144 : vector<128x64xf32>
      %cst_73 = arith.constant dense<0.000000e+00> : vector<128xf32>
      %147 = vector.multi_reduction <add>, %146, %cst_73 [1] : vector<128x64xf32> to vector<128xf32>
      %148 = vector.shape_cast %147 : vector<128xf32> to vector<128x1xf32>
      %cst_74 = arith.constant 1.000000e-24 : f32
      %149 = vector.broadcast %cst_74 : f32 to vector<128x1xf32>
      %150 = arith.maximumf %148, %149 : vector<128x1xf32>
      %151 = math.rsqrt %150 : vector<128x1xf32>
      %152 = vector.broadcast %151 : vector<128x1xf32> to vector<128x64xf32>
      %153 = arith.mulf %144, %152 : vector<128x64xf32>
      %154 = vector.broadcast %141 : vector<1x64xf32> to vector<128x64xf32>
      %155 = arith.mulf %153, %154 : vector<128x64xf32>
      %156 = vector.broadcast %140 : vector<128x1xf32> to vector<128x64xf32>
      %157 = vector.broadcast %142 : vector<1x64xf32> to vector<128x64xf32>
      %158 = arith.mulf %156, %157 : vector<128x64xf32>
      %159 = arith.addf %155, %158 : vector<128x64xf32>
      %160 = arith.truncf %159 : vector<128x64xf32> to vector<128x64xbf16>
      %c0_75 = arith.constant 0 : index
      %c0_76 = arith.constant 0 : index
      %c0_77 = arith.constant 0 : index
      %161 = vector.load %arg15[%c0_75, %c0_76, %c0_77] : memref<2x128x64xbf16, #tpu.memory_space<vmem>>, vector<1x128x64xbf16>
      %162 = vector.shape_cast %161 : vector<1x128x64xbf16> to vector<128x64xbf16>
      %163 = vector.shape_cast %160 : vector<128x64xbf16> to vector<1x128x64xbf16>
      tpu.vector_store %arg15[%c0_75, %c0_76, %c0_77], %163 {strides = array<i32>} : memref<2x128x64xbf16, #tpu.memory_space<vmem>>, vector<1x128x64xbf16>,
      %164 = vector.broadcast %140 : vector<128x1xf32> to vector<128x64xf32>
      %165 = vector.broadcast %143 : vector<1x64xf32> to vector<128x64xf32>
      %166 = arith.mulf %164, %165 : vector<128x64xf32>
      %167 = arith.addf %145, %166 : vector<128x64xf32>
      %168 = arith.truncf %167 : vector<128x64xf32> to vector<128x64xbf16>
      %c0_78 = arith.constant 0 : index
      %c0_79 = arith.constant 0 : index
      %c0_80 = arith.constant 0 : index
      %169 = vector.load %arg16[%c0_78, %c0_79, %c0_80] : memref<2x128x64xbf16, #tpu.memory_space<vmem>>, vector<1x128x64xbf16>
      %170 = vector.shape_cast %169 : vector<1x128x64xbf16> to vector<128x64xbf16>
      %171 = vector.shape_cast %168 : vector<128x64xbf16> to vector<1x128x64xbf16>
      tpu.vector_store %arg16[%c0_78, %c0_79, %c0_80], %171 {strides = array<i32>} : memref<2x128x64xbf16, #tpu.memory_space<vmem>>, vector<1x128x64xbf16>,
      %172 = vector.extract_strided_slice %133 {offsets = [0, 64], sizes = [128, 64], strides = [1, 1]} : vector<128x128xf32> to vector<128x64xf32>
      %173 = vector.extract_strided_slice %135 {offsets = [0, 64], sizes = [128, 64], strides = [1, 1]} : vector<128x128xf32> to vector<128x64xf32>
      %174 = arith.mulf %172, %172 : vector<128x64xf32>
      %cst_81 = arith.constant dense<0.000000e+00> : vector<128xf32>
      %175 = vector.multi_reduction <add>, %174, %cst_81 [1] : vector<128x64xf32> to vector<128xf32>
      %176 = vector.shape_cast %175 : vector<128xf32> to vector<128x1xf32>
      %cst_82 = arith.constant 1.000000e-24 : f32
      %177 = vector.broadcast %cst_82 : f32 to vector<128x1xf32>
      %178 = arith.maximumf %176, %177 : vector<128x1xf32>
      %179 = math.rsqrt %178 : vector<128x1xf32>
      %180 = vector.broadcast %179 : vector<128x1xf32> to vector<128x64xf32>
      %181 = arith.mulf %172, %180 : vector<128x64xf32>
      %182 = vector.broadcast %141 : vector<1x64xf32> to vector<128x64xf32>
      %183 = arith.mulf %181, %182 : vector<128x64xf32>
      %184 = vector.broadcast %140 : vector<128x1xf32> to vector<128x64xf32>
      %185 = vector.broadcast %142 : vector<1x64xf32> to vector<128x64xf32>
      %186 = arith.mulf %184, %185 : vector<128x64xf32>
      %187 = arith.addf %183, %186 : vector<128x64xf32>
      %188 = arith.truncf %187 : vector<128x64xf32> to vector<128x64xbf16>
      %c1_83 = arith.constant 1 : index
      %c0_84 = arith.constant 0 : index
      %c0_85 = arith.constant 0 : index
      %189 = vector.load %arg15[%c1_83, %c0_84, %c0_85] : memref<2x128x64xbf16, #tpu.memory_space<vmem>>, vector<1x128x64xbf16>
      %190 = vector.shape_cast %189 : vector<1x128x64xbf16> to vector<128x64xbf16>
      %191 = vector.shape_cast %188 : vector<128x64xbf16> to vector<1x128x64xbf16>
      tpu.vector_store %arg15[%c1_83, %c0_84, %c0_85], %191 {strides = array<i32>} : memref<2x128x64xbf16, #tpu.memory_space<vmem>>, vector<1x128x64xbf16>,
      %192 = vector.broadcast %140 : vector<128x1xf32> to vector<128x64xf32>
      %193 = vector.broadcast %143 : vector<1x64xf32> to vector<128x64xf32>
      %194 = arith.mulf %192, %193 : vector<128x64xf32>
      %195 = arith.addf %173, %194 : vector<128x64xf32>
      %196 = arith.truncf %195 : vector<128x64xf32> to vector<128x64xbf16>
      %c1_86 = arith.constant 1 : index
      %c0_87 = arith.constant 0 : index
      %c0_88 = arith.constant 0 : index
      %197 = vector.load %arg16[%c1_86, %c0_87, %c0_88] : memref<2x128x64xbf16, #tpu.memory_space<vmem>>, vector<1x128x64xbf16>
      %198 = vector.shape_cast %197 : vector<1x128x64xbf16> to vector<128x64xbf16>
      %199 = vector.shape_cast %196 : vector<128x64xbf16> to vector<1x128x64xbf16>
      tpu.vector_store %arg16[%c1_86, %c0_87, %c0_88], %199 {strides = array<i32>} : memref<2x128x64xbf16, #tpu.memory_space<vmem>>, vector<1x128x64xbf16>,
    } else {
    }
    %c0 = arith.constant 0 : index
    %c0_1 = arith.constant 0 : index
    %c0_2 = arith.constant 0 : index
    %3 = vector.load %arg2[%c0, %c0_1, %c0_2] : memref<1x32x128xbf16, #tpu.memory_space<vmem>>, vector<1x32x128xbf16>
    %4 = vector.shape_cast %3 : vector<1x32x128xbf16> to vector<32x128xbf16>
    %5 = arith.extf %4 : vector<32x128xbf16> to vector<32x128xf32>
    %c0_3 = arith.constant 0 : index
    %c0_4 = arith.constant 0 : index
    %6 = vector.load %arg4[%c0_3, %c0_4] : memref<1x128xf32, #tpu.memory_space<vmem>>, vector<1x128xf32>
    %cst = arith.constant dense<0.000000e+00> : vector<32xf32>
    %7 = vector.multi_reduction <add>, %5, %cst [1] : vector<32x128xf32> to vector<32xf32>
    %8 = vector.shape_cast %7 : vector<32xf32> to vector<32x1xf32>
    %cst_5 = arith.constant 1.280000e+02 : f32
    %9 = vector.broadcast %cst_5 : f32 to vector<32x1xf32>
    %10 = arith.divf %8, %9 : vector<32x1xf32>
    %11 = vector.broadcast %10 : vector<32x1xf32> to vector<32x128xf32>
    %12 = arith.subf %5, %11 : vector<32x128xf32>
    %13 = arith.mulf %12, %12 : vector<32x128xf32>
    %cst_6 = arith.constant dense<0.000000e+00> : vector<32xf32>
    %14 = vector.multi_reduction <add>, %13, %cst_6 [1] : vector<32x128xf32> to vector<32xf32>
    %15 = vector.shape_cast %14 : vector<32xf32> to vector<32x1xf32>
    %cst_7 = arith.constant 1.280000e+02 : f32
    %16 = vector.broadcast %cst_7 : f32 to vector<32x1xf32>
    %17 = arith.divf %15, %16 : vector<32x1xf32>
    %18 = vector.broadcast %10 : vector<32x1xf32> to vector<32x128xf32>
    %19 = arith.subf %5, %18 : vector<32x128xf32>
    %cst_8 = arith.constant 9.99999974E-6 : f32
    %20 = vector.broadcast %cst_8 : f32 to vector<32x1xf32>
    %21 = arith.addf %17, %20 : vector<32x1xf32>
    %22 = math.rsqrt %21 : vector<32x1xf32>
    %23 = vector.broadcast %22 : vector<32x1xf32> to vector<32x128xf32>
    %24 = arith.mulf %19, %23 : vector<32x128xf32>
    %25 = vector.broadcast %6 : vector<1x128xf32> to vector<32x128xf32>
    %26 = arith.mulf %24, %25 : vector<32x128xf32>
    %27 = arith.truncf %26 : vector<32x128xf32> to vector<32x128xbf16>
    %c0_9 = arith.constant 0 : index
    %c0_10 = arith.constant 0 : index
    %28 = vector.load %arg5[%c0_9, %c0_10] : memref<128x128xbf16, #tpu.memory_space<vmem>>, vector<128x128xbf16>
    %cst_11 = arith.constant dense<0.000000e+00> : vector<32x128xf32>
    %29 = tpu.matmul %27, %28, %cst_11 {dimension_numbers = #tpu.dot_dimension_numbers<[1], [0], [0], [1], [0, 0, 1, 1], [], []>} : vector<32x128xbf16>, vector<128x128xbf16>, vector<32x128xf32> -> vector<32x128xf32>
    %30 = tpu.iota {dimensions = array<i32: 1>} : vector<1x128xi32>
    %c8_i32 = arith.constant 8 : i32
    %31 = vector.broadcast %c8_i32 : i32 to vector<1x128xi32>
    %32 = arith.cmpi sgt, %30, %31 : vector<1x128xi32>
    %cst_12 = arith.constant -1.000000e+30 : f32
    %cst_13 = arith.constant 0.000000e+00 : f32
    %33 = vector.broadcast %cst_12 : f32 to vector<1x128xf32>
    %34 = vector.broadcast %cst_13 : f32 to vector<1x128xf32>
    %35 = arith.select %32, %33, %34 : vector<1x128xi1>, vector<1x128xf32>
    %c0_14 = arith.constant 0 : index
    %c0_15 = arith.constant 0 : index
    %36 = vector.load %arg10[%c0_14, %c0_15] : memref<1x64xf32, #tpu.memory_space<vmem>>, vector<1x64xf32>
    %37 = vector.extract_strided_slice %29 {offsets = [0, 0], sizes = [32, 64], strides = [1, 1]} : vector<32x128xf32> to vector<32x64xf32>
    %38 = arith.mulf %37, %37 : vector<32x64xf32>
    %cst_16 = arith.constant dense<0.000000e+00> : vector<32xf32>
    %39 = vector.multi_reduction <add>, %38, %cst_16 [1] : vector<32x64xf32> to vector<32xf32>
    %40 = vector.shape_cast %39 : vector<32xf32> to vector<32x1xf32>
    %cst_17 = arith.constant 1.000000e-24 : f32
    %41 = vector.broadcast %cst_17 : f32 to vector<32x1xf32>
    %42 = arith.maximumf %40, %41 : vector<32x1xf32>
    %43 = math.rsqrt %42 : vector<32x1xf32>
    %44 = vector.broadcast %43 : vector<32x1xf32> to vector<32x64xf32>
    %45 = arith.mulf %37, %44 : vector<32x64xf32>
    %46 = vector.broadcast %36 : vector<1x64xf32> to vector<32x64xf32>
    %47 = arith.mulf %45, %46 : vector<32x64xf32>
    %48 = arith.truncf %47 : vector<32x64xf32> to vector<32x64xbf16>
    %c0_18 = arith.constant 0 : index
    %c0_19 = arith.constant 0 : index
    %c0_20 = arith.constant 0 : index
    %49 = vector.load %arg15[%c0_18, %c0_19, %c0_20] : memref<2x128x64xbf16, #tpu.memory_space<vmem>>, vector<1x128x64xbf16>
    %50 = vector.shape_cast %49 : vector<1x128x64xbf16> to vector<128x64xbf16>
    "tpu.trace_start"() <{level = 10 : i32, message = "nd,md->nm"}> : () -> ()
    %cst_21 = arith.constant dense<0.000000e+00> : vector<32x128xf32>
    %51 = tpu.matmul %48, %50, %cst_21 {dimension_numbers = #tpu.dot_dimension_numbers<[1], [1], [0], [0], [0, 0, 1, 0], [], []>} : vector<32x64xbf16>, vector<128x64xbf16>, vector<32x128xf32> -> vector<32x128xf32>
    "tpu.trace_stop"() : () -> ()
    %52 = vector.broadcast %35 : vector<1x128xf32> to vector<32x128xf32>
    %53 = arith.addf %51, %52 : vector<32x128xf32>
    %cst_22 = arith.constant dense<0xFF800000> : vector<32xf32>
    %54 = vector.multi_reduction <maximumf>, %53, %cst_22 [1] : vector<32x128xf32> to vector<32xf32>
    %55 = vector.shape_cast %54 : vector<32xf32> to vector<32x1xf32>
    %56 = vector.broadcast %55 : vector<32x1xf32> to vector<32x128xf32>
    %57 = arith.subf %53, %56 : vector<32x128xf32>
    %58 = math.exp %57 : vector<32x128xf32>
    %cst_23 = arith.constant dense<0.000000e+00> : vector<32xf32>
    %59 = vector.multi_reduction <add>, %58, %cst_23 [1] : vector<32x128xf32> to vector<32xf32>
    %60 = vector.shape_cast %59 : vector<32xf32> to vector<32x1xf32>
    %61 = arith.truncf %58 : vector<32x128xf32> to vector<32x128xbf16>
    %c0_24 = arith.constant 0 : index
    %c0_25 = arith.constant 0 : index
    %c0_26 = arith.constant 0 : index
    %62 = vector.load %arg16[%c0_24, %c0_25, %c0_26] : memref<2x128x64xbf16, #tpu.memory_space<vmem>>, vector<1x128x64xbf16>
    %63 = vector.shape_cast %62 : vector<1x128x64xbf16> to vector<128x64xbf16>
    %cst_27 = arith.constant dense<0.000000e+00> : vector<32x64xf32>
    %64 = tpu.matmul %61, %63, %cst_27 {dimension_numbers = #tpu.dot_dimension_numbers<[1], [0], [0], [1], [0, 0, 1, 1], [], []>} : vector<32x128xbf16>, vector<128x64xbf16>, vector<32x64xf32> -> vector<32x64xf32>
    %65 = tpu.reciprocal %60 {approx = true} : vector<32x1xf32> -> vector<32x1xf32>
    %66 = vector.broadcast %65 : vector<32x1xf32> to vector<32x64xf32>
    %67 = arith.mulf %64, %66 : vector<32x64xf32>
    %68 = arith.truncf %67 : vector<32x64xf32> to vector<32x64xbf16>
    %c0_28 = arith.constant 0 : index
    %c0_29 = arith.constant 0 : index
    %69 = vector.load %arg17[%c0_28, %c0_29] : memref<32x128xbf16, #tpu.memory_space<vmem>>, vector<32x64xbf16>
    tpu.vector_store %arg17[%c0_28, %c0_29], %68 {strides = array<i32>} : memref<32x128xbf16, #tpu.memory_space<vmem>>, vector<32x64xbf16>,
    %70 = vector.extract_strided_slice %29 {offsets = [0, 64], sizes = [32, 64], strides = [1, 1]} : vector<32x128xf32> to vector<32x64xf32>
    %71 = arith.mulf %70, %70 : vector<32x64xf32>
    %cst_30 = arith.constant dense<0.000000e+00> : vector<32xf32>
    %72 = vector.multi_reduction <add>, %71, %cst_30 [1] : vector<32x64xf32> to vector<32xf32>
    %73 = vector.shape_cast %72 : vector<32xf32> to vector<32x1xf32>
    %cst_31 = arith.constant 1.000000e-24 : f32
    %74 = vector.broadcast %cst_31 : f32 to vector<32x1xf32>
    %75 = arith.maximumf %73, %74 : vector<32x1xf32>
    %76 = math.rsqrt %75 : vector<32x1xf32>
    %77 = vector.broadcast %76 : vector<32x1xf32> to vector<32x64xf32>
    %78 = arith.mulf %70, %77 : vector<32x64xf32>
    %79 = vector.broadcast %36 : vector<1x64xf32> to vector<32x64xf32>
    %80 = arith.mulf %78, %79 : vector<32x64xf32>
    %81 = arith.truncf %80 : vector<32x64xf32> to vector<32x64xbf16>
    %c1 = arith.constant 1 : index
    %c0_32 = arith.constant 0 : index
    %c0_33 = arith.constant 0 : index
    %82 = vector.load %arg15[%c1, %c0_32, %c0_33] : memref<2x128x64xbf16, #tpu.memory_space<vmem>>, vector<1x128x64xbf16>
    %83 = vector.shape_cast %82 : vector<1x128x64xbf16> to vector<128x64xbf16>
    "tpu.trace_start"() <{level = 10 : i32, message = "nd,md->nm"}> : () -> ()
    %cst_34 = arith.constant dense<0.000000e+00> : vector<32x128xf32>
    %84 = tpu.matmul %81, %83, %cst_34 {dimension_numbers = #tpu.dot_dimension_numbers<[1], [1], [0], [0], [0, 0, 1, 0], [], []>} : vector<32x64xbf16>, vector<128x64xbf16>, vector<32x128xf32> -> vector<32x128xf32>
    "tpu.trace_stop"() : () -> ()
    %85 = vector.broadcast %35 : vector<1x128xf32> to vector<32x128xf32>
    %86 = arith.addf %84, %85 : vector<32x128xf32>
    %cst_35 = arith.constant dense<0xFF800000> : vector<32xf32>
    %87 = vector.multi_reduction <maximumf>, %86, %cst_35 [1] : vector<32x128xf32> to vector<32xf32>
    %88 = vector.shape_cast %87 : vector<32xf32> to vector<32x1xf32>
    %89 = vector.broadcast %88 : vector<32x1xf32> to vector<32x128xf32>
    %90 = arith.subf %86, %89 : vector<32x128xf32>
    %91 = math.exp %90 : vector<32x128xf32>
    %cst_36 = arith.constant dense<0.000000e+00> : vector<32xf32>
    %92 = vector.multi_reduction <add>, %91, %cst_36 [1] : vector<32x128xf32> to vector<32xf32>
    %93 = vector.shape_cast %92 : vector<32xf32> to vector<32x1xf32>
    %94 = arith.truncf %91 : vector<32x128xf32> to vector<32x128xbf16>
    %c1_37 = arith.constant 1 : index
    %c0_38 = arith.constant 0 : index
    %c0_39 = arith.constant 0 : index
    %95 = vector.load %arg16[%c1_37, %c0_38, %c0_39] : memref<2x128x64xbf16, #tpu.memory_space<vmem>>, vector<1x128x64xbf16>
    %96 = vector.shape_cast %95 : vector<1x128x64xbf16> to vector<128x64xbf16>
    %cst_40 = arith.constant dense<0.000000e+00> : vector<32x64xf32>
    %97 = tpu.matmul %94, %96, %cst_40 {dimension_numbers = #tpu.dot_dimension_numbers<[1], [0], [0], [1], [0, 0, 1, 1], [], []>} : vector<32x128xbf16>, vector<128x64xbf16>, vector<32x64xf32> -> vector<32x64xf32>
    %98 = tpu.reciprocal %93 {approx = true} : vector<32x1xf32> -> vector<32x1xf32>
    %99 = vector.broadcast %98 : vector<32x1xf32> to vector<32x64xf32>
    %100 = arith.mulf %97, %99 : vector<32x64xf32>
    %101 = arith.truncf %100 : vector<32x64xf32> to vector<32x64xbf16>
    %c0_41 = arith.constant 0 : index
    %c64 = arith.constant 64 : index
    %102 = vector.load %arg17[%c0_41, %c64] : memref<32x128xbf16, #tpu.memory_space<vmem>>, vector<32x64xbf16>
    tpu.vector_store %arg17[%c0_41, %c64], %101 {strides = array<i32>} : memref<32x128xbf16, #tpu.memory_space<vmem>>, vector<32x64xbf16>,
    %c0_42 = arith.constant 0 : index
    %c0_43 = arith.constant 0 : index
    %103 = vector.load %arg17[%c0_42, %c0_43] : memref<32x128xbf16, #tpu.memory_space<vmem>>, vector<32x128xbf16>
    %c0_44 = arith.constant 0 : index
    %c0_45 = arith.constant 0 : index
    %104 = vector.load %arg12[%c0_44, %c0_45] : memref<128x128xbf16, #tpu.memory_space<vmem>>, vector<128x128xbf16>
    %cst_46 = arith.constant dense<0.000000e+00> : vector<32x128xf32>
    %105 = tpu.matmul %103, %104, %cst_46 {dimension_numbers = #tpu.dot_dimension_numbers<[1], [0], [0], [1], [0, 0, 1, 1], [], []>} : vector<32x128xbf16>, vector<128x128xbf16>, vector<32x128xf32> -> vector<32x128xf32>
    %c0_47 = arith.constant 0 : index
    %c0_48 = arith.constant 0 : index
    %106 = vector.load %arg13[%c0_47, %c0_48] : memref<1x128xf32, #tpu.memory_space<vmem>>, vector<1x128xf32>
    %cst_49 = arith.constant dense<0.000000e+00> : vector<32xf32>
    %107 = vector.multi_reduction <add>, %105, %cst_49 [1] : vector<32x128xf32> to vector<32xf32>
    %108 = vector.shape_cast %107 : vector<32xf32> to vector<32x1xf32>
    %cst_50 = arith.constant 1.280000e+02 : f32
    %109 = vector.broadcast %cst_50 : f32 to vector<32x1xf32>
    %110 = arith.divf %108, %109 : vector<32x1xf32>
    %111 = vector.broadcast %110 : vector<32x1xf32> to vector<32x128xf32>
    %112 = arith.subf %105, %111 : vector<32x128xf32>
    %113 = arith.mulf %112, %112 : vector<32x128xf32>
    %cst_51 = arith.constant dense<0.000000e+00> : vector<32xf32>
    %114 = vector.multi_reduction <add>, %113, %cst_51 [1] : vector<32x128xf32> to vector<32xf32>
    %115 = vector.shape_cast %114 : vector<32xf32> to vector<32x1xf32>
    %cst_52 = arith.constant 1.280000e+02 : f32
    %116 = vector.broadcast %cst_52 : f32 to vector<32x1xf32>
    %117 = arith.divf %115, %116 : vector<32x1xf32>
    %118 = vector.broadcast %110 : vector<32x1xf32> to vector<32x128xf32>
    %119 = arith.subf %105, %118 : vector<32x128xf32>
    %cst_53 = arith.constant 9.99999974E-6 : f32
    %120 = vector.broadcast %cst_53 : f32 to vector<32x1xf32>
    %121 = arith.addf %117, %120 : vector<32x1xf32>
    %122 = math.rsqrt %121 : vector<32x1xf32>
    %123 = vector.broadcast %122 : vector<32x1xf32> to vector<32x128xf32>
    %124 = arith.mulf %119, %123 : vector<32x128xf32>
    %125 = vector.broadcast %106 : vector<1x128xf32> to vector<32x128xf32>
    %126 = arith.mulf %124, %125 : vector<32x128xf32>
    %c0_54 = arith.constant 0 : index
    %c0_55 = arith.constant 0 : index
    %c0_56 = arith.constant 0 : index
    %127 = vector.load %arg14[%c0_54, %c0_55, %c0_56] : memref<1x32x128xf32, #tpu.memory_space<vmem>>, vector<1x32x128xf32>
    %128 = vector.shape_cast %127 : vector<1x32x128xf32> to vector<32x128xf32>
    %129 = vector.shape_cast %126 : vector<32x128xf32> to vector<1x32x128xf32>
    tpu.vector_store %arg14[%c0_54, %c0_55, %c0_56], %129 {strides = array<i32>} : memref<1x32x128xf32, #tpu.memory_space<vmem>>, vector<1x32x128xf32>,
    return
  }
  func.func @transform_0(%arg0: i32, %arg1: i32) -> (i32, i32, i32) {
    %c0_i32 = arith.constant 0 : i32
    %c0_i32_0 = arith.constant 0 : i32
    return %arg0, %arg1, %c0_i32 : i32, i32, i32
  }
  func.func @transform_1(%arg0: i32, %arg1: i32) -> (i32, i32, i32) {
    %c0_i32 = arith.constant 0 : i32
    %c0_i32_0 = arith.constant 0 : i32
    %c0_i32_1 = arith.constant 0 : i32
    return %arg0, %c0_i32, %c0_i32_0 : i32, i32, i32
  }
  func.func @transform_2(%arg0: i32, %arg1: i32) -> (i32, i32) {
    %c0_i32 = arith.constant 0 : i32
    %c0_i32_0 = arith.constant 0 : i32
    %c0_i32_1 = arith.constant 0 : i32
    return %c0_i32, %c0_i32_0 : i32, i32
  }
  func.func @transform_3(%arg0: i32, %arg1: i32) -> (i32, i32) {
    %c0_i32 = arith.constant 0 : i32
    %c0_i32_0 = arith.constant 0 : i32
    %c0_i32_1 = arith.constant 0 : i32
    return %c0_i32, %c0_i32_0 : i32, i32
  }
  func.func @transform_4(%arg0: i32, %arg1: i32) -> (i32, i32) {
    %c0_i32 = arith.constant 0 : i32
    %c0_i32_0 = arith.constant 0 : i32
    %c0_i32_1 = arith.constant 0 : i32
    return %c0_i32, %c0_i32_0 : i32, i32
  }
  func.func @transform_5(%arg0: i32, %arg1: i32) -> (i32, i32) {
    %c0_i32 = arith.constant 0 : i32
    %c0_i32_0 = arith.constant 0 : i32
    %c0_i32_1 = arith.constant 0 : i32
    return %c0_i32, %c0_i32_0 : i32, i32
  }
  func.func @transform_6(%arg0: i32, %arg1: i32) -> (i32, i32) {
    %c0_i32 = arith.constant 0 : i32
    %c0_i32_0 = arith.constant 0 : i32
    %c0_i32_1 = arith.constant 0 : i32
    return %c0_i32, %c0_i32_0 : i32, i32
  }
  func.func @transform_7(%arg0: i32, %arg1: i32) -> (i32, i32) {
    %c0_i32 = arith.constant 0 : i32
    %c0_i32_0 = arith.constant 0 : i32
    %c0_i32_1 = arith.constant 0 : i32
    return %c0_i32, %c0_i32_0 : i32, i32
  }
  func.func @transform_8(%arg0: i32, %arg1: i32) -> (i32, i32) {
    %c0_i32 = arith.constant 0 : i32
    %c0_i32_0 = arith.constant 0 : i32
    %c0_i32_1 = arith.constant 0 : i32
    return %c0_i32, %c0_i32_0 : i32, i32
  }
  func.func @transform_9(%arg0: i32, %arg1: i32) -> (i32, i32) {
    %c0_i32 = arith.constant 0 : i32
    %c0_i32_0 = arith.constant 0 : i32
    %c0_i32_1 = arith.constant 0 : i32
    return %c0_i32, %c0_i32_0 : i32, i32
  }
  func.func @transform_10(%arg0: i32, %arg1: i32) -> (i32, i32) {
    %c0_i32 = arith.constant 0 : i32
    %c0_i32_0 = arith.constant 0 : i32
    %c0_i32_1 = arith.constant 0 : i32
    return %c0_i32, %c0_i32_0 : i32, i32
  }
  func.func @transform_11(%arg0: i32, %arg1: i32) -> (i32, i32) {
    %c0_i32 = arith.constant 0 : i32
    %c0_i32_0 = arith.constant 0 : i32
    %c0_i32_1 = arith.constant 0 : i32
    return %c0_i32, %c0_i32_0 : i32, i32
  }
  func.func @transform_12(%arg0: i32, %arg1: i32) -> (i32, i32, i32) {
    %c0_i32 = arith.constant 0 : i32
    %c0_i32_0 = arith.constant 0 : i32
    return %arg0, %arg1, %c0_i32 : i32, i32, i32
  }
}

</mosaic_0001>

<bundles_post_ra>
// kernel: tpu_custom_call.1
= control target key start
LH: loop header
LB: loop body
LE: loop exit
PB: predicated region body
PF: predicated region fallthrough
CT: control target
= control target key end

     0   :  { %s5628_s0 = inlined_call_operand.hbm [shape: bf16[2,64,128], index: 0, kind: input, shape index: {}]   ;;  %s5629_s1 = inlined_call_operand.hbm [shape: bf16[2,128,128], index: 1, kind: input, shape index: {}]   ;;  %s5630_s2 = inlined_call_operand.vmem [shape: f32[1,128], index: 2, kind: input, shape index: {}]   ;;  %s5631_s3 = inlined_call_operand.hbm [shape: bf16[128,128], index: 3, kind: input, shape index: {}]   ;;  %s5632_s4 = inlined_call_operand.hbm [shape: bf16[128,128], index: 4, kind: input, shape index: {}]   ;;  %s5633_s5 = inlined_call_operand.hbm [shape: bf16[128,128], index: 5, kind: input, shape index: {}]   ;;  %s5634_s6 = inlined_call_operand.vmem [shape: f32[1,64], index: 6, kind: input, shape index: {}]   ;;  %s5635_s7 = inlined_call_operand.vmem [shape: f32[1,64], index: 7, kind: input, shape index: {}]   ;;  %s5636_s8 = inlined_call_operand.vmem [shape: f32[1,64], index: 8, kind: input, shape index: {}]   ;;  %s5637_s9 = inlined_call_operand.vmem [shape: f32[1,64], index: 9, kind: input, shape index: {}]   ;;  %s5638_s10 = inlined_call_operand.hbm [shape: bf16[128,128], index: 10, kind: input, shape index: {}]   ;;  %s5639_s11 = inlined_call_operand.vmem [shape: f32[1,128], index: 11, kind: input, shape index: {}]   ;;  %s5640_s12 = inlined_call_operand.hbm [shape: f32[2,64,128], index: 12, kind: output, shape index: {}]  }
   0x1   :  { %5654 = sst [smem:[#allocation41_spill]] %s5628_s0 }
   0x2   :  { %5655 = sst [smem:[#allocation42_spill]] %s5630_s2 }
   0x3   :  { %5656 = sst [smem:[#allocation43_spill]] %s5631_s3 }
   0x4   :  { %5657 = sst [smem:[#allocation44_spill]] %s5632_s4 }
   0x5   :  { %5658 = sst [smem:[#allocation45_spill]] %s5633_s5 }
   0x6   :  { %5659 = sst [smem:[#allocation46_spill]] %s5635_s7 }
   0x7   :  { %5660 = sst [smem:[#allocation47_spill]] %s5636_s8 }
   0x8   :  { %5661 = sst [smem:[#allocation48_spill]] %s5638_s10 }
   0x9   :  { %5662 = sst [smem:[#allocation49_spill]] %s5639_s11 }
   0xa   :  { %5663 = sst [smem:[#allocation50_spill]] %s5640_s12 }
   0xb   :  { %17 = vsyncpa [#allocation6], 0 }
   0xc   :  { %19 = vsyncpa [#allocation6 + $0x1], 0 }
   0xd   :  { %20 = vsyncpa [#allocation9], 0 }
   0xe   :  { %22 = vsyncpa [#allocation9 + $0x1], 0 }
   0xf   :  { %23 = vsyncpa [#allocation12], 0 }
  0x10   :  { %24 = vsyncpa [#allocation15], 0 }
  0x11   :  { %25 = vsyncpa [#allocation7], 0 }
  0x12   :  { %27 = vsyncpa [#allocation7 + $0x1], 0  ;;  %s4341_s21 = smov 0   ;;  %s4343_s22 = smov 0  }
  0x13   :  { %s4345_s23 = smov 0   ;;  %s4347_s24 = smov 0  }
  0x14   :  { %s4349_s25 = smov 0   ;;  %s4351_s26 = smov 0  }
  0x15   :  { %s4353_s27 = smov 0   ;;  %s4355_s28 = smov 0  }
  0x16   :  { %s4357_s29 = smov 0   ;;  %s4359_s30 = smov 0  }
  0x17   :  { %s4361_s13 = smov 0  }
  0x18 LB: > { %5664 = sst [smem:[#allocation23_spill]] %s4233_s24  ;;  %s4395_s14 = sadd.s32 4294967295, %s4261_s13   ;;  %s4261_s13 = sphi %s4361_s13, %s33_s13   ;;  %s4257_s30 = sphi %s4359_s30, %s5753_s30   ;;  %s4253_s29 = sphi %s4357_s29, %s5745_s29   ;;  %s4249_s28 = sphi %s4355_s28, %s5752_s28   ;;  %s4245_s27 = sphi %s4353_s27, %s5744_s27   ;;  %s4241_s26 = sphi %s4351_s26, %s5743_s26   ;;  %s4237_s25 = sphi %s4349_s25, %s5751_s25   ;;  %s4233_s24 = sphi %s4347_s24, %s5750_s24   ;;  %s4229_s23 = sphi %s4345_s23, %s5749_s23   ;;  %s4225_s22 = sphi %s4343_s22, %s5748_s22   ;;  %s4221_s21 = sphi %s4341_s21, %s5747_s21  }
  0x19   : > { %5665 = sst [smem:[#allocation24_spill]] %s4241_s26  ;;  %p93_p0 = scmp.ne.s32.totalorder %s4225_s22, %s4221_s21 }
  0x1a   : > { %5666 = sst [smem:[#allocation25_spill]] %s4249_s28  ;;  %p68_p1 = scmp.eq.s32.totalorder %s4395_s14, 0 }
  0x1b   : > { %5667 = sst [smem:[#allocation26_spill]] %s4253_s29  ;;  %p329_p2 = scmp.eq.s32.totalorder %s4395_s14, 3 }
  0x1c   : > { %p3220_p3 = scmp.ge.s32.totalorder %s4261_s13, 1  ;;  %p342_p4 = scmp.lt.s32.totalorder %s4261_s13, 5 }
  0x1d   : > { %p4404_p5 = por %p93_p0, %p68_p1  ;;  %s5670_s3 = sld [smem:[#allocation43_spill]] }
  0x1e   : > { %p4408_p6 = pnand %p3220_p3, %p342_p4  ;;  %s4263_s20 = smov [#allocation10]  }
  0x1f   : > { %s358_s21 = sshll.u32 %s4263_s20, 4  ;;  %s5672_s4 = sld [smem:[#allocation44_spill]]  ;;  %s359_s21 = int_to_ptr.vmem [resolvable:$true] %s358_s21 }
  0x20   : > { %p3671_p7 = pneg %p4408_p6  ;;  %s5642_s17 = smov 64  }
  0x21   : > { %s5644_s18 = smov 4   ;;  %s5673_s5 = sld [smem:[#allocation45_spill]] }
  0x22   : > { %p4419_p8 = pnand %p3671_p7, %p68_p1  ;;  %s4266_s7 = smov [#allocation11]  }
  0x23   : > { %s356_s19 = sshll.u32 %s5670_s3, 4  ;;  %s372_s11 = sshll.u32 %s4266_s7, 4  ;;  %s357_s19 = int_to_ptr.hbm [resolvable:$true] %s356_s19  ;;  %s373_s11 = int_to_ptr.vmem [resolvable:$true] %s372_s11 }
  0x24   : > { %3674 = dma.hbm_to_vmem [thread:$0]  (!%p4419_p8), %s357_s19, 1024, %s359_s21, [#allocation9], %s5642_s17, %s5642_s17, %s5644_s18  }
  0x25   : > { %s370_s8 = sshll.u32 %s5672_s4, 4  ;;  %s4267_s28 = smov [#allocation13]   ;;  %s371_s8 = int_to_ptr.hbm [resolvable:$true] %s370_s8 }
  0x26   : > { %3677 = dma.hbm_to_vmem [thread:$0]  (!%p4419_p8), %s371_s8, 1024, %s373_s11, [#allocation12], %s5642_s17, %s5642_s17, %s5644_s18  }
  0x27   : > { %s384_s2 = sshll.u32 %s5673_s5, 4  ;;  %s386_s3 = sshll.u32 %s4267_s28, 4  ;;  %s385_s2 = int_to_ptr.hbm [resolvable:$true] %s384_s2  ;;  %s387_s3 = int_to_ptr.vmem [resolvable:$true] %s386_s3 }
  0x28   : > { %s5674_s10 = sld [smem:[#allocation48_spill]]  ;;  %s4268_s7 = smov [#allocation14]  }
  0x29   : > { %3680 = dma.hbm_to_vmem [thread:$0]  (!%p4419_p8), %s385_s2, 1024, %s387_s3, [#allocation12], %s5642_s17, %s5642_s17, %s5644_s18  }
  0x2a   : > { %s412_s8 = sshll.u32 %s4268_s7, 4  ;;  %s3219_s11 = sadd.s32 4294967294, %s4261_s13   ;;  %s413_s8 = int_to_ptr.vmem [resolvable:$true] %s412_s8 }
  0x2b   : > { %s42_s28 = sadd.s32 1, %s4253_s29  ;;  %s45_s19 = sadd.s32 1, %s4257_s30 }
  0x2c   : > { %p43_p9 = scmp.ge.s32.totalorder %s42_s28, 2  ;;  %s54_s21 = sadd.s32 1, %s4241_s26 }
  0x2d   : > { %p61_p10 = scmp.ne.s32.totalorder %s4241_s26, %s4237_s25  ;;  %p62_p11 = scmp.eq.s32.totalorder %s4261_s13, 0 }
  0x2e   : > { %s410_s20 = sshll.u32 %s5674_s10, 4  ;;  %s5755_s28 = smov (%p43_p9, %s42_s28), 0  ;;  %s411_s20 = int_to_ptr.hbm [resolvable:$true] %s410_s20 }
  0x2f   : > { %3683 = dma.hbm_to_vmem [thread:$0]  (!%p4419_p8), %s411_s20, 1024, %s413_s8, [#allocation15], %s5642_s17, %s5642_s17, %s5644_s18  }
  0x30   : > { %5675 = sst [smem:[#allocation27_spill]] %s5755_s28  ;;  %s5757_s19 = smov (!%p43_p9, %s45_s19), %s4257_s30 }
  0x31   : > { %s50_s2 = ssub.s32 %s4253_s29, %s5755_s28  ;;  %p4466_p12 = por %p62_p11, %p61_p10 }
  0x32   : > { %p47_p13 = scmp.ge.s32.totalorder %s5757_s19, 2  ;;  %p67_p0 = scmp.ne.s32.totalorder %s4237_s25, %s4233_s24 }
  0x33   : > { %p4474_p3 = por %p329_p2, %p61_p10  ;;  %p335_p4 = scmp.eq.s32.totalorder %s3219_s11, 3 }
  0x34   : > { %s5759_s19 = smov (%p47_p13, %s5757_s19), 0  ;;  %p4482_p7 = por %p68_p1, %p67_p0 }
  0x35   : > { %s5677_s3 = scalar_select %p4474_p3, 1, 0 }
  0x36   : > { %5679 = sst [smem:[#allocation29_spill]] %s5759_s19  ;;  %p4486_p8 = por %p335_p4, %p67_p0 }
  0x37   : > { %5678 = sst [smem:[#allocation28_spill]] %s5677_s3  ;;  %s49_s8 = ssub.s32 %s4257_s30, %s5759_s19 }
  0x38   : > { %s5681_s7 = scalar_select %p4486_p8, 1, 0 }
  0x39   : > { %p3699_p2 = scmp.lt.s32.totalorder %s4261_s13, 4  ;;  %s51_s17 = sor.u32 %s50_s2, %s49_s8 }
  0x3a   : > { %5682 = sst [smem:[#allocation30_spill]] %s5681_s7  ;;  %p78_p9 = scmp.eq.s32.totalorder %s49_s8, 0 }
  0x3b   : > { %p52_p10 = scmp.eq.s32.totalorder %s51_s17, 0  ;;  %s429_s11 = sand.u32 1, %s4241_s26  }
  0x3c   : > { %s3226_s18 = sshll.u32 %s429_s11, 4  ;;  %s3227_s5 = sshll.u32 %s4253_s29, 2 }
  0x3d   : > { %s4495_s4 = scalar_select %p52_p10, %s4241_s26, %s54_s21  }
  0x3e   : > { %s3228_s10 = sshll.u32 %s4257_s30, 3  ;;  %s433_s28 = scalar_lea.vmem [#allocation5], %s3226_s18 }
  0x3f   : > { %5683 = sst [smem:[#allocation31_spill]] %s4495_s4  ;;  %s443_s7 = sshll.u32 %s433_s28, 4  ;;  %s444_s7 = int_to_ptr.vmem [resolvable:$true] %s443_s7 }
  0x40   : > { %s438_s19 = sadd.s32 %s3228_s10, %s3227_s5  ;;  %p3685_p13 = pnand %p3699_p2, %p4466_p12 }
  0x41   : > { %s3229_s2 = sshll.u32 %s438_s19, 2  ;;  %s5684_s0 = sld [smem:[#allocation41_spill]] }
  0x42   : > { %s430_s29 = scalar_lea.sflag [#allocation6], %s429_s11  ;;  %s5685_s26 = smov 4  }
  0x43   : > { %s5686_s3 = smov 64   ;;  %s80_s18 = sadd.s32 1, %s4229_s23 }
  0x44   : > { %p87_p0 = scmp.ne.s32.totalorder %s4229_s23, %s4225_s22  ;;  %s453_s10 = sand.u32 1, %s4261_s13  }
  0x45   : > { %s4514_s5 = scalar_select %p78_p9, %s4229_s23, %s80_s18  }
  0x46   : > { %p89_p4 = por %p87_p0, %p62_p11  ;;  %s455_s28 = sand.u32 1, %s4229_s23  }
  0x47   : > { %s440_s21 = scalar_lea.hbm %s5684_s0, %s3229_s2  ;;  %s3230_s19 = sshll.u32 %s455_s28, 6 }
  0x48   : > { %s441_s4 = sshll.u32 %s440_s21, 4  ;;  %s3549_s24 = sshll.u32 %s4257_s30, 6  ;;  %s442_s4 = int_to_ptr.hbm [resolvable:$true] %s441_s4 }
  0x49   : > { %3687 = dma.hbm_to_vmem [thread:$0]  (!%p3685_p13), %s442_s4, 256, %s444_s7, %s430_s29, %s5686_s3, %s5686_s3, %s5685_s26  }
  0x4a   : > { %s462_s11 = scalar_lea.hbm %s5629_s1, %s3549_s24  ;;  %s457_s21 = scalar_lea.vmem [#allocation8], %s3230_s19 }
  0x4b   : > { %s463_s17 = sshll.u32 %s462_s11, 4  ;;  %s465_s0 = sshll.u32 %s457_s21, 4  ;;  %s464_s17 = int_to_ptr.hbm [resolvable:$true] %s463_s17  ;;  %s466_s0 = int_to_ptr.vmem [resolvable:$true] %s465_s0 }
  0x4c   : > { %p3688_p12 = pnand %p3699_p2, %p89_p4  ;;  %s454_s4 = scalar_lea.sflag [#allocation9], %s453_s10 }
  0x4d   : > { %477 = sbr.rel (%p4408_p6) target bundleno = 2690 (0xa82), region = 68  ;;  %s4532_s29 = sand.u32 (!%p4408_p6), 1, %s4237_s25  }
  0x4e   : > { %3690 = dma.hbm_to_vmem [thread:$0]  (!%p3688_p12), %s464_s17, 1024, %s466_s0, %s454_s4, %s5686_s3, %s5686_s3, %s5685_s26  }
  0x4f   : > { %s3234_s7 = sshll.u32 (!%p4408_p6), %s4532_s29, 4  ;;  %s480_s8 = scalar_lea.sflag (!%p4408_p6), [#allocation6], %s4532_s29 }
  0x50   : > { %s4536_s18 = scalar_lea.vmem (!%p4408_p6), [#allocation5], %s3234_s7 }
  0x52   : > { %4196 = dma.done.wait (%p4482_p7), %s480_s8, 256  }
  0x53   : > { %4198 = vsyncadd (%p4482_p7), %s480_s8, 4294967040  ;;  %s489_s0 = sand.u32 1, %s4395_s14   ;;  %s491_s26 = sand.u32 1, %s4225_s22  }
  0x54   : > { %s3235_s16 = sshll.u32 %s491_s26, 6  ;;  %s490_s3 = scalar_lea.sflag [#allocation9], %s489_s0 }
  0x55   : > { %s4544_s10 = scalar_lea.vmem [#allocation8], %s3235_s16 }
  0x56   : > { %4200 = dma.done.wait (%p4404_p5), %s490_s3, 1024  }
  0x57   : > { %4202 = vsyncadd (%p4404_p5), %s490_s3, 4294966272 }
  0x58   : > { %4204 = dma.done.wait (%p68_p1), [#allocation9], 1024  }
  0x59   : > { %4206 = vsyncadd (%p68_p1), [#allocation9], 4294966272 }
  0x5a   : > { %4208 = dma.done.wait (%p68_p1), [#allocation12], 2048  }
  0x5b   : > { %4210 = vsyncadd (%p68_p1), [#allocation12], 4294965248 }
  0x5c   : > { %4212 = dma.done.wait (%p68_p1), [#allocation15], 1024  }
  0x5d   : > { %4214 = vsyncadd (%p68_p1), [#allocation15], 4294966272  ;;  %s3240_s15 = sshll.u32 %s4532_s29, 5  ;;  %p3241_p5 = scmp.ne.s32.totalorder %s4245_s27, 0 }
  0x5e   : > { %s4563_s20 = scalar_lea.vmem [#allocation16], %s3240_s15 }
  0x5f   : > { %565 = sbr.rel (%p3241_p5) target bundleno = 944 (0x3b0), region = 96 }
  0x64   : > { %v4569_v0 = vld [vmem:[%s5637_s9] ss:$0 sm:$0xff]  ;;  %v3565_v1 = vld [vmem:[#allocation11 + $0x38] sm:$0xff]  ;;  %v856_v2 = vlaneseq  ;;  %s4269_s24 = smov 64   ;;  %v4270_v10 = vmov 0.0   ;;  %v3563_v12 = vld [vmem:[#allocation11 + $0x28] sm:$0xff] }
  0x65   : > { %v3573_v3 = vld [vmem:[#allocation13 + $0x38] sm:$0xff]  ;;  %1639 = vrot.lane.b32.xlu0 %v4569_v0, %s4269_s24  ;;  %694 = vmatpush.bf16.msra.mxu0 %v3565_v1  ;;  %v3564_v4 = vld [vmem:[#allocation11 + $0x30] sm:$0xff]  ;;  %v3571_v13 = vld [vmem:[#allocation13 + $0x28] sm:$0xff]  ;;  %s5687_s17 = sld [smem:[#allocation46_spill]]  ;;  %vm940_vm1 = vcmask 523264   ;;  %vm1251_vm2 = vcmask 519168  }
  0x66   : > { %v857_v5 = vshrl.u32 %v856_v2, 7  ;;  %807 = vmatpush.bf16.msra.mxu1 %v3573_v3  ;;  %v3572_v6 = vld [vmem:[#allocation13 + $0x30] sm:$0xff]  ;;  %3641 = vmatpush.bf16.msra.mxu3 %v3573_v3  ;;  %v3562_v15 = vld [vmem:[#allocation11 + $0x20] sm:$0xff]  ;;  %v3561_v17 = vld [vmem:[#allocation11 + $0x18] sm:$0xff] }
  0x67   : > { %v3807_v7 = vld [vmem:[%s5634_s6] ss:$0 sm:$0xff]  ;;  %3633 = vmatpush.bf16.msra.mxu2 %v3565_v1  ;;  %v3570_v16 = vld [vmem:[#allocation13 + $0x20] sm:$0xff]  ;;  %v3569_v18 = vld [vmem:[#allocation13 + $0x18] sm:$0xff] }
  0x68   : > { %v858_v8 = vadd.s32 8, %v857_v5  ;;  %v4576_v9 = vmul.f32 0.0, %v3807_v7  ;;  %v3560_v19 = vld [vmem:[#allocation11 + $0x10] sm:$0xff]  ;;  %v3559_v21 = vld [vmem:[#allocation11 + $0x8] sm:$0xff]  ;;  %v3558_v23 = vld [vmem:[#allocation11] sm:$0xff] }
  0x69   : > { %695 = vmatpush.bf16.msra.mxu0 %v3564_v4  ;;  %v3568_v20 = vld [vmem:[#allocation13 + $0x10] sm:$0xff]  ;;  %v3567_v22 = vld [vmem:[#allocation13 + $0x8] sm:$0xff]  ;;  %v3566_v24 = vld [vmem:[#allocation13] sm:$0xff] }
  0x6a   : > { %vm874_vm0 = vcmp.eq.s32.totalorder %v858_v8, 8  ;;  %808 = vmatpush.bf16.msra.mxu1 %v3572_v6  ;;  %3642 = vmatpush.bf16.msra.mxu3 %v3572_v6  ;;  %v3550_v25 = vld [vmem:[%s4544_s10] sm:$0xff]  ;;  %v3551_v29 = vld [vmem:[%s4544_s10 + $0x8] sm:$0xff]  ;;  %v3552_v32 = vld [vmem:[%s4544_s10 + $0x10] sm:$0xff] }
  0x6b   : > { %v4578_v11 = vsel %vm874_vm0, 1.0, %v4270_v10  ;;  %3634 = vmatpush.bf16.msra.mxu2 %v3564_v4  ;;  %1674 = vrot.lane.b32.xlu2 %v4576_v9, %s4269_s24  ;;  %v3554_v26 = vld [vmem:[%s4544_s10 + $0x20] sm:$0xff]  ;;  %v3808_v27 = vld [vmem:[%s5687_s17] ss:$0 sm:$0xff]  ;;  %v3555_v30 = vld [vmem:[%s4544_s10 + $0x28] sm:$0xff] }
  0x6c   : > { %v4581_v14 = vmul.f32 %v3807_v7, %v4578_v11  ;;  %v4618_v28 = vmul.f32 0.0, %v3808_v27  ;;  %v1272_v31 = vmul.f32 %v3808_v27, %v4578_v11  ;;  %v3556_v33 = vld [vmem:[%s4544_s10 + $0x30] sm:$0xff]  ;;  %v3553_v34 = vld [vmem:[%s4544_s10 + $0x18] sm:$0xff] }
  0x6d   : > { %1678 = vrot.lane.b32.xlu0 %v4576_v9, %s4269_s24  ;;  %696 = vmatpush.bf16.msra.mxu0 %v3563_v12  ;;  %v3557_v35 = vld [vmem:[%s4544_s10 + $0x38] sm:$0xff] }
  0x6e   : > { %1676 = vrot.lane.b32.xlu1 %v4581_v14, %s4269_s24  ;;  %809 = vmatpush.bf16.msra.mxu1 %v3571_v13 }
  0x6f   : > { %3643 = vmatpush.bf16.msra.mxu3 %v3571_v13  ;;  %3635 = vmatpush.bf16.msra.mxu2 %v3563_v12 }
  0x71   : > { %697 = vmatpush.bf16.msra.mxu0 %v3562_v15 }
  0x72   : > { %810 = vmatpush.bf16.msra.mxu1 %v3570_v16 }
  0x73   : > { %3644 = vmatpush.bf16.msra.mxu3 %v3570_v16  ;;  %3636 = vmatpush.bf16.msra.mxu2 %v3562_v15 }
  0x74   : > { %1680 = vrot.lane.b32.xlu2 %v4576_v9, %s4269_s24 }
  0x75   : > { %1682 = vrot.lane.b32.xlu0 %v4576_v9, %s4269_s24  ;;  %698 = vmatpush.bf16.msra.mxu0 %v3561_v17 }
  0x76   : > { %1684 = vrot.lane.b32.xlu1 %v4576_v9, %s4269_s24  ;;  %811 = vmatpush.bf16.msra.mxu1 %v3569_v18 }
  0x77   : > { %3645 = vmatpush.bf16.msra.mxu3 %v3569_v18  ;;  %3637 = vmatpush.bf16.msra.mxu2 %v3561_v17 }
  0x79   : > { %699 = vmatpush.bf16.msra.mxu0 %v3560_v19 }
  0x7a   : > { %812 = vmatpush.bf16.msra.mxu1 %v3568_v20 }
  0x7b   : > { %3646 = vmatpush.bf16.msra.mxu3 %v3568_v20  ;;  %3638 = vmatpush.bf16.msra.mxu2 %v3560_v19 }
  0x7c   : > { %1686 = vrot.lane.b32.xlu2 %v4576_v9, %s4269_s24 }
  0x7d   : > { %1688 = vrot.lane.b32.xlu0 %v4576_v9, %s4269_s24  ;;  %700 = vmatpush.bf16.msra.mxu0 %v3559_v21 }
  0x7e   : > { %1690 = vrot.lane.b32.xlu1 %v4576_v9, %s4269_s24  ;;  %813 = vmatpush.bf16.msra.mxu1 %v3567_v22 }
  0x7f   : > { %3647 = vmatpush.bf16.msra.mxu3 %v3567_v22  ;;  %3639 = vmatpush.bf16.msra.mxu2 %v3559_v21 }
  0x81   : > { %701 = vmatpush.bf16.msra.mxu0 %v3558_v23 }
  0x82   : > { %814 = vmatpush.bf16.msra.mxu1 %v3566_v24 }
  0x83   : > { %3648 = vmatpush.bf16.msra.mxu3 %v3566_v24  ;;  %3640 = vmatpush.bf16.msra.mxu2 %v3558_v23 }
  0x84   : > { %1692 = vrot.lane.b32.xlu2 %v4576_v9, %s4269_s24  ;;  %702 = vmatmul.bf16.vlgmr.msra.gmra.mxu0 %v3550_v25 }
  0x85   : > { %815 = vmatmul.bf16.vlgmr.msra.gmra.mxu1 %v3550_v25  ;;  %1694 = vrot.lane.b32.xlu0 %v4576_v9, %s4269_s24 }
  0x86   : > { %1696 = vrot.lane.b32.xlu1 %v4576_v9, %s4269_s24  ;;  %835 = vmatmul.bf16.vlgmr.msra.gmra.mxu3 %v3554_v26 }
  0x87   : > { %722 = vmatmul.bf16.vlgmr.msra.gmra.mxu2 %v3554_v26 }
  0x8c   : > { %1698 = vrot.lane.b32.xlu2 %v4576_v9, %s4269_s24 }
  0x8d   : > { %1700 = vrot.lane.b32.xlu0 %v4576_v9, %s4269_s24 }
  0x8e   : > { %1702 = vrot.lane.b32.xlu1 %v4576_v9, %s4269_s24 }
  0x94   : > { %1704 = vrot.lane.b32.xlu2 %v4576_v9, %s4269_s24  ;;  %707 = vmatmul.bf16.gmra.mxu0 %v3551_v29 }
  0x95   : > { %820 = vmatmul.bf16.gmra.mxu1 %v3551_v29  ;;  %1855 = vrot.lane.b32.xlu0 %v4618_v28, %s4269_s24 }
  0x96   : > { %1851 = vrot.lane.b32.xlu1 %v4618_v28, %s4269_s24  ;;  %840 = vmatmul.bf16.gmra.mxu3 %v3555_v30 }
  0x97   : > { %727 = vmatmul.bf16.gmra.mxu2 %v3555_v30 }
  0x9c   : > { %1853 = vrot.lane.b32.xlu2 %v1272_v31, %s4269_s24 }
  0x9d   : > { %1861 = vrot.lane.b32.xlu0 %v4618_v28, %s4269_s24 }
  0x9e   : > { %1857 = vrot.lane.b32.xlu1 %v4618_v28, %s4269_s24 }
  0xa4   : > { %1859 = vrot.lane.b32.xlu2 %v4618_v28, %s4269_s24  ;;  %712 = vmatmul.bf16.gmra.mxu0 %v3552_v32 }
  0xa5   : > { %825 = vmatmul.bf16.gmra.mxu1 %v3552_v32  ;;  %1867 = vrot.lane.b32.xlu0 %v4618_v28, %s4269_s24 }
  0xa6   : > { %1863 = vrot.lane.b32.xlu1 %v4618_v28, %s4269_s24  ;;  %845 = vmatmul.bf16.gmra.mxu3 %v3556_v33 }
  0xa7   : > { %732 = vmatmul.bf16.gmra.mxu2 %v3556_v33 }
  0xac   : > { %1865 = vrot.lane.b32.xlu2 %v4618_v28, %s4269_s24 }
  0xad   : > { %1873 = vrot.lane.b32.xlu0 %v4618_v28, %s4269_s24 }
  0xae   : > { %1869 = vrot.lane.b32.xlu1 %v4618_v28, %s4269_s24 }
  0xb4   : > { %1871 = vrot.lane.b32.xlu2 %v4618_v28, %s4269_s24  ;;  %717 = vmatmul.bf16.gmra.mxu0 %v3553_v34 }
  0xb5   : > { %830 = vmatmul.bf16.gmra.mxu1 %v3553_v34  ;;  %1879 = vrot.lane.b32.xlu0 %v4618_v28, %s4269_s24 }
  0xb6   : > { %1875 = vrot.lane.b32.xlu1 %v4618_v28, %s4269_s24  ;;  %850 = vmatmul.bf16.gmra.mxu3 %v3557_v35 }
  0xb7   : > { %737 = vmatmul.bf16.gmra.mxu2 %v3557_v35 }
  0xbc   : > { %1877 = vrot.lane.b32.xlu2 %v4618_v28, %s4269_s24 }
  0xbe   : > { %1881 = vrot.lane.b32.xlu1 %v4618_v28, %s4269_s24 }
  0xc5   : > { %v4666_v39 = vpop.permute.xlu2 %1674 }
  0xce   : > { %v4672_v42 = vpop.permute.xlu2 %1680 }
  0xd6   : > { %v4678_v45 = vpop.permute.xlu2 %1686 }
  0xd7   : > { %v4660_v36 = vpop.permute.xlu0 %1639  ;;  %5690 = vst [vmem:[#allocation34_spill] sm:$0xff] %v4678_v45 }
  0xde   : > { %v4684_v48 = vpop.permute.xlu2 %1692 }
  0xdf   : > { %v4664_v38 = vpop.permute.xlu0 %1678 }
  0xe0   : > { %v4662_v37 = vpop.permute.xlu1 %1676 }
  0xe6   : > { %v4697_v58 = vpop.permute.xlu2 %1698 }
  0xe7   : > { %v4670_v41 = vpop.permute.xlu0 %1682  ;;  %5692 = vst [vmem:[#allocation36_spill] sm:$0xff] %v4697_v58 }
  0xe8   : > { %v4668_v40 = vpop.permute.xlu1 %1684 }
  0xe9   : > { %5688 = vst [vmem:[#allocation32_spill] sm:$0xff] %v4668_v40 }
  0xee   : > { %v4709_v7 = vpop.permute.xlu2 %1704 }
  0xef   : > { %v4676_v44 = vpop.permute.xlu0 %1688  ;;  %5693 = vst [vmem:[#allocation37_spill] sm:$0xff] %v4709_v7 }
  0xf0   : > { %v4674_v43 = vpop.permute.xlu1 %1690  ;;  %5689 = vst [vmem:[#allocation33_spill] sm:$0xff] %v4676_v44 }
  0xf6   : > { %v4724_v24 = vpop.permute.xlu2 %1853 }
  0xf7   : > { %v4682_v47 = vpop.permute.xlu0 %1694 }
  0xf8   : > { %v4680_v46 = vpop.permute.xlu1 %1696 }
  0xfe   : > { %v1860_v32 = vpop.permute.xlu2 %1859 }
  0xff   : > { %v4688_v50 = vpop.permute.xlu0 %1700 }
 0x100   : > { %v4686_v49 = vpop.permute.xlu1 %1702 }
 0x101   : > { %5691 = vst [vmem:[#allocation35_spill] sm:$0xff] %v4686_v49  ;;  %v4690_v51 = vpop.f32.mrf.mxu0 }
 0x102   : > { %v816_v52 = vpop.f32.mrf.mxu1  ;;  %v924_v53 = vmul.f32 %v4690_v51, %v4690_v51 }
 0x103   : > { %v1287_v54 = vadd.f32 %v4618_v28, %v816_v52 }
 0x104   : > { %v941_v55 = vsel %vm940_vm1, %v924_v53, 0.0  ;;  %1351 = vrot.lane.b32.xlu1 %v924_v53, %s4269_s24 }
 0x105   : > { %v1303_v56 = vpack.c.bf16 %v1287_v54, %v1287_v54  ;;  %942 = vadd.xlane.f32.xlu0 %v941_v55 }
 0x107   : > { %1319 = vst.msk [vmem:[#allocation3] sm:$0xf] %vm1251_vm2, %v1303_v56  ;;  %v1856_v60 = vpop.permute.xlu0 %1855 }
 0x108   : > { %v1852_v57 = vpop.permute.xlu1 %1851 }
 0x109   : > { %v1899_v59 = vadd.f32 %v1852_v57, %v816_v52  ;;  %v836_v62 = vpop.f32.mrf.mxu3  ;;  %v1866_v57 = vpop.permute.xlu2 %1865 }
 0x10a   : > { %v4700_v63 = vpop.f32.mrf.mxu1  ;;  %v1295_v1 = vadd.f32 %v4618_v28, %v836_v62  ;;  %v4711_v11 = vpop.f32.mrf.mxu2 }
 0x10b   : > { %v1915_v61 = vpack.c.bf16 %v1899_v59, %v1899_v59  ;;  %v1288_v2 = vadd.f32 %v1272_v31, %v4700_v63  ;;  %v932_v18 = vmul.f32 %v4711_v11, %v4711_v11 }
 0x10c   : > { %v1311_v3 = vpack.c.bf16 %v1295_v1, %v1295_v1 }
 0x10d   : > { %1947 = vrot.lane.b32.xlu2 %v1915_v61, %s4269_s24  ;;  %v1304_v4 = vpack.c.bf16 %v1288_v2, %v1288_v2  ;;  %v965_v1 = vsel %vm940_vm1, %v932_v18, 0.0 }
 0x10e   : > { %1327 = vst.msk [vmem:[#allocation3 + $0x20] sm:$0xf] %vm1251_vm2, %v1311_v3 }
 0x10f   : > { %1320 = vst.msk [vmem:[#allocation3 + $0x4] sm:$0xf] %vm1251_vm2, %v1304_v4  ;;  %v1862_v6 = vpop.permute.xlu0 %1861 }
 0x110   : > { %v4705_v5 = vpop.permute.xlu1 %1857 }
 0x111   : > { %v838_v8 = vpop.f32.mrf.mxu3 }
 0x112   : > { %v821_v10 = vpop.f32.mrf.mxu1  ;;  %v1296_v12 = vadd.f32 %v4618_v28, %v838_v8 }
 0x113   : > { %v1289_v13 = vadd.f32 %v4618_v28, %v821_v10  ;;  %v4715_v15 = vadd.f32 %v1856_v60, %v821_v10 }
 0x114   : > { %v1312_v16 = vpack.c.bf16 %v1296_v12, %v1296_v12 }
 0x115   : > { %v1305_v17 = vpack.c.bf16 %v1289_v13, %v1289_v13 }
 0x116   : > { %1328 = vst.msk [vmem:[#allocation3 + $0x24] sm:$0xf] %vm1251_vm2, %v1312_v16  ;;  %v4751_v16 = vpop.f32.mrf.mxu0 }
 0x117   : > { %1321 = vst.msk [vmem:[#allocation3 + $0x8] sm:$0xf] %vm1251_vm2, %v1305_v17  ;;  %v1868_v20 = vpop.permute.xlu0 %1867 }
 0x118   : > { %v1864_v19 = vpop.permute.xlu1 %1863  ;;  %v1907_v21 = vadd.f32 %v1868_v20, %v836_v62 }
 0x119   : > { %1367 = vrot.lane.b32.xlu0 %v932_v18, %s4269_s24  ;;  %v841_v34 = vpop.f32.mrf.mxu3 }
 0x11a   : > { %v1923_v22 = vpack.c.bf16 %v1907_v21, %v1907_v21  ;;  %v4722_v23 = vpop.f32.mrf.mxu1  ;;  %v1297_v52 = vadd.f32 %v4618_v28, %v841_v34 }
 0x11b   : > { %v1290_v25 = vadd.f32 %v4618_v28, %v4722_v23 }
 0x11c   : > { %1963 = vrot.lane.b32.xlu1 %v1923_v22, %s4269_s24  ;;  %v1313_v53 = vpack.c.bf16 %v1297_v52, %v1297_v52 }
 0x11d   : > { %v1306_v26 = vpack.c.bf16 %v1290_v25, %v1290_v25 }
 0x11e   : > { %1329 = vst.msk [vmem:[#allocation3 + $0x28] sm:$0xf] %vm1251_vm2, %v1313_v53 }
 0x11f   : > { %1322 = vst.msk [vmem:[#allocation3 + $0xc] sm:$0xf] %vm1251_vm2, %v1306_v26 }
 0x120   : > { %v1870_v27 = vpop.permute.xlu1 %1869 }
 0x121   : > { %v4730_v29 = vadd.f32 %v1870_v27, %v838_v8  ;;  %v843_v59 = vpop.f32.mrf.mxu3 }
 0x122   : > { %v826_v30 = vpop.f32.mrf.mxu1  ;;  %v1298_v61 = vadd.f32 %v4618_v28, %v843_v59 }
 0x123   : > { %v1291_v31 = vadd.f32 %v4618_v28, %v826_v30  ;;  %v4733_v33 = vadd.f32 %v1860_v32, %v826_v30  ;;  %v1874_v30 = vpop.permute.xlu0 %1873  ;;  %v925_v32 = vmul.f32 %v4751_v16, %v4751_v16 }
 0x124   : > { %v1314_v62 = vpack.c.bf16 %v1298_v61, %v1298_v61 }
 0x125   : > { %v1307_v35 = vpack.c.bf16 %v1291_v31, %v1291_v31  ;;  %v4761_v31 = vpop.f32.mrf.mxu0  ;;  %v944_v53 = vsel %vm940_vm1, %v925_v32, 0.0 }
 0x126   : > { %1330 = vst.msk [vmem:[#allocation3 + $0x2c] sm:$0xf] %vm1251_vm2, %v1314_v62 }
 0x127   : > { %1323 = vst.msk [vmem:[#allocation3 + $0x10] sm:$0xf] %vm1251_vm2, %v1307_v35  ;;  %v4769_v35 = vmul.f32 %v4761_v31, %v4761_v31 }
 0x129   : > { %v846_v8 = vpop.f32.mrf.mxu3 }
 0x12a   : > { %v828_v54 = vpop.f32.mrf.mxu1  ;;  %v1299_v13 = vadd.f32 %v4618_v28, %v846_v8 }
 0x12b   : > { %v1292_v55 = vadd.f32 %v4618_v28, %v828_v54  ;;  %v4739_v56 = vadd.f32 %v1862_v6, %v828_v54  ;;  %v1872_v6 = vpop.permute.xlu2 %1871  ;;  %v947_v54 = vsel %vm940_vm1, %v4769_v35, 0.0 }
 0x12c   : > { %v4748_v12 = vadd.f32 %v1872_v6, %v841_v34  ;;  %v1315_v17 = vpack.c.bf16 %v1299_v13, %v1299_v13  ;;  %v4765_v34 = vadd.f32 %v1874_v30, %v843_v59  ;;  %v1876_v59 = vpop.permute.xlu1 %1875 }
 0x12d   : > { %v1308_v60 = vpack.c.bf16 %v1292_v55, %v1292_v55  ;;  %v1880_v55 = vpop.permute.xlu0 %1879  ;;  %v4779_v62 = vadd.f32 %v1876_v59, %v846_v8  ;;  %v4790_v13 = vpop.f32.mrf.mxu0 }
 0x12e   : > { %1331 = vst.msk [vmem:[#allocation3 + $0x30] sm:$0xf] %vm1251_vm2, %v1315_v17  ;;  %v927_v8 = vmul.f32 %v4790_v13, %v4790_v13  ;;  %v1917_v17 = vpack.c.bf16 %v4715_v15, %v4715_v15 }
 0x12f   : > { %1324 = vst.msk [vmem:[#allocation3 + $0x14] sm:$0xf] %vm1251_vm2, %v1308_v60 }
 0x131   : > { %v848_v22 = vpop.f32.mrf.mxu3 }
 0x132   : > { %v831_v2 = vpop.f32.mrf.mxu1  ;;  %v1300_v26 = vadd.f32 %v4618_v28, %v848_v22 }
 0x133   : > { %v1293_v3 = vadd.f32 %v4618_v28, %v831_v2  ;;  %v4746_v4 = vadd.f32 %v1864_v19, %v831_v2  ;;  %v1878_v21 = vpop.permute.xlu2 %1877  ;;  %v4783_v2 = vpop.f32.mrf.mxu2 }
 0x134   : > { %v4759_v27 = vadd.f32 %v1878_v21, %v848_v22  ;;  %v1316_v52 = vpack.c.bf16 %v1300_v26, %v1300_v26  ;;  %v933_v6 = vmul.f32 %v4783_v2, %v4783_v2 }
 0x135   : > { %v1309_v10 = vpack.c.bf16 %v1293_v3, %v1293_v3  ;;  %v1900_v3 = vadd.f32 %v4724_v24, %v4700_v63  ;;  %v1902_v63 = vadd.f32 %v4705_v5, %v4722_v23 }
 0x136   : > { %966 = vadd.xlane.f32.xlu2 %v965_v1  ;;  %5694 = vst [vmem:[#allocation38_spill] sm:$0xff] %v4759_v27 }
 0x137   : > { %1325 = vst.msk [vmem:[#allocation3 + $0x18] sm:$0xf] %vm1251_vm2, %v1309_v10  ;;  %v1916_v10 = vpack.c.bf16 %v1900_v3, %v1900_v3 }
 0x138   : > { %1332 = vst.msk [vmem:[#allocation3 + $0x34] sm:$0xf] %vm1251_vm2, %v1316_v52 }
 0x13a   : > { %v833_v18 = vpop.f32.mrf.mxu1 }
 0x13b   : > { %v1294_v20 = vadd.f32 %v4618_v28, %v833_v18  ;;  %v4756_v19 = vadd.f32 %v1866_v57, %v833_v18  ;;  %v851_v57 = vpop.f32.mrf.mxu3  ;;  %v4801_v24 = vpop.f32.mrf.mxu2  ;;  %v1918_v18 = vpack.c.bf16 %v1902_v63, %v1902_v63 }
 0x13c   : > { %v1301_v60 = vadd.f32 %v4618_v28, %v851_v57  ;;  %v4777_v61 = vadd.f32 %v1880_v55, %v851_v57  ;;  %v934_v22 = vmul.f32 %v4801_v24, %v4801_v24 }
 0x13d   : > { %v1310_v25 = vpack.c.bf16 %v1294_v20, %v1294_v20  ;;  %v1882_v20 = vpop.permute.xlu1 %1881 }
 0x13e   : > { %5695 = vst [vmem:[#allocation39_spill] sm:$0xff] %v4777_v61  ;;  %v1317_v1 = vpack.c.bf16 %v1301_v60, %v1301_v60 }
 0x13f   : > { %1326 = vst.msk [vmem:[#allocation3 + $0x1c] sm:$0xf] %vm1251_vm2, %v1310_v25 }
 0x140   : > { %1333 = vst.msk [vmem:[#allocation3 + $0x38] sm:$0xf] %vm1251_vm2, %v1317_v1 }
 0x143   : > { %945 = vadd.xlane.f32.xlu0 %v944_v53  ;;  %v853_v21 = vpop.f32.mrf.mxu3  ;;  %v4815_v57 = vpop.f32.mrf.mxu2 }
 0x144   : > { %v4805_v25 = vadd.f32 %v1882_v20, %v853_v21  ;;  %v1302_v5 = vadd.f32 %v4618_v28, %v853_v21  ;;  %v935_v60 = vmul.f32 %v4815_v57, %v4815_v57  ;;  %v971_v21 = vsel %vm940_vm1, %v934_v22, 0.0 }
 0x146   : > { %948 = vadd.xlane.f32.xlu1 %v947_v54  ;;  %5696 = vst [vmem:[#allocation40_spill] sm:$0xff] %v4805_v25  ;;  %v1318_v15 = vpack.c.bf16 %v1302_v5, %v1302_v5 }
 0x148   : > { %1334 = vst.msk [vmem:[#allocation3 + $0x3c] sm:$0xf] %vm1251_vm2, %v1318_v15 }
 0x14e   : > { %1353 = vrot.lane.b32.xlu2 %v925_v32, %s4269_s24  ;;  %v968_v32 = vsel %vm940_vm1, %v933_v6, 0.0 }
 0x156   : > { %1369 = vrot.lane.b32.xlu2 %v933_v6, %s4269_s24  ;;  %v974_v6 = vsel %vm940_vm1, %v935_v60, 0.0 }
 0x157   : > { %1949 = vrot.lane.b32.xlu0 %v1916_v10, %s4269_s24 }
 0x15e   : > { %1357 = vrot.lane.b32.xlu2 %v927_v8, %s4269_s24 }
 0x15f   : > { %1951 = vrot.lane.b32.xlu1 %v1917_v17, %s4269_s24  ;;  %v4821_v17 = vpop.f32.mrf.mxu0 }
 0x166   : > { %1953 = vrot.lane.b32.xlu2 %v1918_v18, %s4269_s24  ;;  %v928_v18 = vmul.f32 %v4821_v17, %v4821_v17 }
 0x167   : > { %v1948_v26 = vpop.permute.xlu2 %1947  ;;  %1371 = vrot.lane.b32.xlu1 %v934_v22, %s4269_s24  ;;  %v1919_v22 = vpack.c.bf16 %v4733_v33, %v4733_v33 }
 0x168   : > { %1996 = vst.msk [vmem:[#allocation3 + $0x40] sm:$0xf] %vm1251_vm2, %v1948_v26  ;;  %v953_v5 = vsel %vm940_vm1, %v928_v18, 0.0 }
 0x176   : > { %v4813_v55 = vpop.permute.xlu1 %1351 }
 0x178   : > { %v943_v23 = vpop.xlane.xlu0 %942 }
 0x179   : > { %v989_v30 = vmax.f32 %v943_v23, 1e-24  ;;  %v950_v23 = vsel %vm940_vm1, %v927_v8, 0.0 }
 0x17b   : > { %3809 = vrsqrt.f32 %v989_v30  ;;  %vm1011_vm3 = vweird.f32 %v989_v30 }
 0x181   : > { %v3810_v52 = vpop.eup %3809  ;;  %969 = vadd.xlane.f32.xlu0 %v968_v32  ;;  %v4838_v32 = vpop.f32.mrf.mxu2 }
 0x182   : > { %v1006_v53 = vmul.f32 %v3810_v52, %v989_v30  ;;  %vm1012_vm4 = vweird.f32 %v3810_v52 }
 0x183   : > { %vm1013_vm5 = vmor %vm1011_vm3, %vm1012_vm4 }
 0x184   : > { %v1007_v54 = vmul.f32 %v3810_v52, %v1006_v53  ;;  %v936_v53 = vmul.f32 %v4838_v32, %v4838_v32 }
 0x186   : > { %v1008_v59 = vmul.f32 0.5, %v1007_v54 }
 0x188   : > { %v1009_v28 = vsub.f32 1.5, %v1008_v59 }
 0x18a   : > { %v1010_v1 = vmul.f32 %v3810_v52, %v1009_v28 }
 0x18c   : > { %v1014_v3 = vsel %vm1013_vm5, %v3810_v52, %v1010_v1 }
 0x18d   : > { %v1165_v10 = vmul.f32 %v1014_v3, %v4690_v51 }
 0x18e   : > { %v1964_v63 = vpop.permute.xlu1 %1963 }
 0x18f   : > { %975 = vadd.xlane.f32.xlu2 %v974_v6  ;;  %v1184_v20 = vmul.f32 %v4569_v0, %v1165_v10  ;;  %2004 = vst.msk [vmem:[#allocation3 + $0x60] sm:$0xf] %vm1251_vm2, %v1964_v63  ;;  %v1920_v10 = vpack.c.bf16 %v4739_v56, %v4739_v56 }
 0x191   : > { %v1219_v26 = vadd.f32 %v4576_v9, %v1184_v20  ;;  %972 = vadd.xlane.f32.xlu1 %v971_v21 }
 0x193   : > { %v1235_v15 = vpack.c.bf16 %v1219_v26, %v1219_v26 }
 0x195   : > { %1252 = vst.msk [vmem:[#allocation2] sm:$0xf] %vm1251_vm2, %v1235_v15  ;;  %1355 = vrot.lane.b32.xlu0 %v4769_v35, %s4269_s24  ;;  %v4843_v35 = vpop.permute.xlu0 %1367 }
 0x197   : > { %954 = vadd.xlane.f32.xlu2 %v953_v5  ;;  %v4854_v5 = vpop.f32.mrf.mxu2 }
 0x199   : > { %951 = vadd.xlane.f32.xlu1 %v950_v23 }
 0x19d   : > { %1373 = vrot.lane.b32.xlu0 %v935_v60, %s4269_s24 }
 0x1a5   : > { %1955 = vrot.lane.b32.xlu0 %v1919_v22, %s4269_s24 }
 0x1a9   : > { %v967_v30 = vpop.xlane.xlu2 %966 }
 0x1aa   : > { %v997_v52 = vmax.f32 %v967_v30, 1e-24  ;;  %v937_v30 = vmul.f32 %v4854_v5, %v4854_v5 }
 0x1ac   : > { %3811 = vrsqrt.f32 %v997_v52  ;;  %vm1091_vm7 = vweird.f32 %v997_v52 }
 0x1af   : > { %1375 = vrot.lane.b32.xlu2 %v936_v53, %s4269_s24 }
 0x1b1   : > { %v4845_v8 = vpop.permute.xlu2 %1353 }
 0x1b2   : > { %v3812_v54 = vpop.eup %3811  ;;  %1359 = vrot.lane.b32.xlu1 %v928_v18, %s4269_s24 }
 0x1b3   : > { %v1086_v59 = vmul.f32 %v3812_v54, %v997_v52  ;;  %vm1092_vm6 = vweird.f32 %v3812_v54 }
 0x1b4   : > { %vm1093_vm8 = vmor %vm1091_vm7, %vm1092_vm6 }
 0x1b5   : > { %v1087_v33 = vmul.f32 %v3812_v54, %v1086_v59 }
 0x1b6   : > { %v946_v60 = vpop.xlane.xlu0 %945 }
 0x1b7   : > { %v1088_v28 = vmul.f32 0.5, %v1087_v33  ;;  %v990_v3 = vmax.f32 %v946_v60, 1e-24 }
 0x1b9   : > { %v1089_v1 = vsub.f32 1.5, %v1088_v28  ;;  %v4848_v6 = vpop.permute.xlu2 %1369  ;;  %3813 = vrsqrt.f32 %v990_v3  ;;  %v949_v20 = vpop.xlane.xlu1 %948  ;;  %vm1021_vm10 = vweird.f32 %v990_v3 }
 0x1ba   : > { %v991_v21 = vmax.f32 %v949_v20, 1e-24  ;;  %1957 = vrot.lane.b32.xlu1 %v1920_v10, %s4269_s24 }
 0x1bb   : > { %v1090_v63 = vmul.f32 %v3812_v54, %v1089_v1 }
 0x1bc   : > { %3815 = vrsqrt.f32 %v991_v21  ;;  %vm1031_vm13 = vweird.f32 %v991_v21 }
 0x1bd   : > { %v1094_v18 = vsel %vm1093_vm8, %v3812_v54, %v1090_v63 }
 0x1be   : > { %v1173_v26 = vmul.f32 %v1094_v18, %v4711_v11 }
 0x1bf   : > { %v3814_v23 = vpop.eup %3813 }
 0x1c0   : > { %v1192_v15 = vmul.f32 %v4569_v0, %v1173_v26  ;;  %v1016_v52 = vmul.f32 %v3814_v23, %v990_v3  ;;  %vm1022_vm9 = vweird.f32 %v3814_v23 }
 0x1c1   : > { %v4857_v22 = vpop.permute.xlu2 %1357  ;;  %vm1023_vm11 = vmor %vm1021_vm10, %vm1022_vm9 }
 0x1c2   : > { %v1227_v56 = vadd.f32 %v4576_v9, %v1192_v15  ;;  %v3816_v59 = vpop.eup %3815  ;;  %v1017_v28 = vmul.f32 %v3814_v23, %v1016_v52  ;;  %1377 = vrot.lane.b32.xlu1 %v937_v30, %s4269_s24 }
 0x1c3   : > { %v1026_v54 = vmul.f32 %v3816_v59, %v991_v21  ;;  %vm1032_vm12 = vweird.f32 %v3816_v59 }
 0x1c4   : > { %v1243_v33 = vpack.c.bf16 %v1227_v56, %v1227_v56  ;;  %v1018_v60 = vmul.f32 0.5, %v1017_v28  ;;  %vm1033_vm14 = vmor %vm1031_vm13, %vm1032_vm12 }
 0x1c5   : > { %v1027_v1 = vmul.f32 %v3816_v59, %v1026_v54 }
 0x1c6   : > { %1260 = vst.msk [vmem:[#allocation2 + $0x20] sm:$0xf] %vm1251_vm2, %v1243_v33  ;;  %v1019_v10 = vsub.f32 1.5, %v1018_v60  ;;  %v4868_v60 = vpop.f32.mrf.mxu0 }
 0x1c7   : > { %v1028_v63 = vmul.f32 0.5, %v1027_v1  ;;  %v977_v1 = vsel %vm940_vm1, %v936_v53, 0.0  ;;  %v929_v21 = vmul.f32 %v4868_v60, %v4868_v60 }
 0x1c8   : > { %v1020_v18 = vmul.f32 %v3814_v23, %v1019_v10 }
 0x1c9   : > { %v1954_v20 = vpop.permute.xlu2 %1953  ;;  %v1029_v26 = vsub.f32 1.5, %v1028_v63  ;;  %v1950_v15 = vpop.permute.xlu0 %1949 }
 0x1ca   : > { %1999 = vst.msk [vmem:[#allocation3 + $0x4c] sm:$0xf] %vm1251_vm2, %v1954_v20  ;;  %v1024_v56 = vsel %vm1023_vm11, %v3814_v23, %v1020_v18 }
 0x1cb   : > { %1997 = vst.msk [vmem:[#allocation3 + $0x44] sm:$0xf] %vm1251_vm2, %v1950_v15  ;;  %v1166_v52 = vmul.f32 %v1024_v56, %v4751_v16  ;;  %v1030_v33 = vmul.f32 %v3816_v59, %v1029_v26  ;;  %v956_v26 = vsel %vm940_vm1, %v929_v21, 0.0  ;;  %v980_v15 = vsel %vm940_vm1, %v937_v30, 0.0 }
 0x1cc   : > { %v1921_v56 = vpack.c.bf16 %v4746_v4, %v4746_v4 }
 0x1cd   : > { %v1185_v28 = vmul.f32 %v4569_v0, %v1166_v52  ;;  %v1034_v54 = vsel %vm1033_vm14, %v3816_v59, %v1030_v33 }
 0x1ce   : > { %v1167_v3 = vmul.f32 %v1034_v54, %v4761_v31 }
 0x1cf   : > { %v1220_v10 = vadd.f32 %v4581_v14, %v1185_v28  ;;  %978 = vadd.xlane.f32.xlu0 %v977_v1  ;;  %v4882_v14 = vpop.f32.mrf.mxu0 }
 0x1d0   : > { %v1186_v23 = vmul.f32 %v4569_v0, %v1167_v3  ;;  %v930_v53 = vmul.f32 %v4882_v14, %v4882_v14 }
 0x1d1   : > { %v1236_v63 = vpack.c.bf16 %v1220_v10, %v1220_v10  ;;  %v1952_v20 = vpop.permute.xlu1 %1951 }
 0x1d2   : > { %v1221_v18 = vadd.f32 %v4576_v9, %v1186_v23  ;;  %1998 = vst.msk [vmem:[#allocation3 + $0x48] sm:$0xf] %vm1251_vm2, %v1952_v20  ;;  %v959_v25 = vsel %vm940_vm1, %v930_v53, 0.0 }
 0x1d3   : > { %1253 = vst.msk [vmem:[#allocation2 + $0x4] sm:$0xf] %vm1251_vm2, %v1236_v63 }
 0x1d4   : > { %v1237_v59 = vpack.c.bf16 %v1221_v18, %v1221_v18 }
 0x1d6   : > { %1254 = vst.msk [vmem:[#allocation2 + $0x8] sm:$0xf] %vm1251_vm2, %v1237_v59 }
 0x1d7   : > { %v4893_v1 = vpop.f32.mrf.mxu0 }
 0x1d8   : > { %957 = vadd.xlane.f32.xlu2 %v956_v26  ;;  %v4897_v20 = vmul.f32 %v4893_v1, %v4893_v1 }
 0x1d9   : > { %v4891_v28 = vpop.permute.xlu1 %1371 }
 0x1e3   : > { %1361 = vrot.lane.b32.xlu0 %v929_v21, %s4269_s24 }
 0x1ec   : > { %981 = vadd.xlane.f32.xlu1 %v980_v15 }
 0x1f0   : > { %1363 = vrot.lane.b32.xlu2 %v930_v53, %s4269_s24 }
 0x1f4   : > { %v970_v52 = vpop.xlane.xlu0 %969 }
 0x1f5   : > { %v998_v33 = vmax.f32 %v970_v52, 1e-24 }
 0x1f7   : > { %3817 = vrsqrt.f32 %v998_v33  ;;  %vm1101_vm0 = vweird.f32 %v998_v33 }
 0x1f8   : > { %1959 = vrot.lane.b32.xlu2 %v1921_v56, %s4269_s24 }
 0x1fd   : > { %v3818_v54 = vpop.eup %3817 }
 0x1fe   : > { %v1096_v3 = vmul.f32 %v3818_v54, %v998_v33  ;;  %vm1102_vm15 = vweird.f32 %v3818_v54 }
 0x1ff   : > { %vm1103_vm3 = vmor %vm1101_vm0, %vm1102_vm15 }
 0x200   : > { %v1097_v10 = vmul.f32 %v3818_v54, %v1096_v3 }
 0x202   : > { %v976_v23 = vpop.xlane.xlu2 %975  ;;  %v1098_v63 = vmul.f32 0.5, %v1097_v10 }
 0x203   : > { %v1000_v30 = vmax.f32 %v976_v23, 1e-24 }
 0x204   : > { %v1099_v4 = vsub.f32 1.5, %v1098_v63  ;;  %v973_v21 = vpop.xlane.xlu1 %972 }
 0x205   : > { %3819 = vrsqrt.f32 %v1000_v30  ;;  %v999_v18 = vmax.f32 %v973_v21, 1e-24  ;;  %1365 = vrot.lane.b32.xlu1 %v4897_v20, %s4269_s24  ;;  %vm1121_vm5 = vweird.f32 %v1000_v30 }
 0x206   : > { %v1100_v59 = vmul.f32 %v3818_v54, %v1099_v4 }
 0x207   : > { %3821 = vrsqrt.f32 %v999_v18  ;;  %v4901_v26 = vpop.permute.xlu0 %1355  ;;  %vm1111_vm8 = vweird.f32 %v999_v18 }
 0x208   : > { %v1104_v15 = vsel %vm1103_vm3, %v3818_v54, %v1100_v59 }
 0x209   : > { %v1174_v3 = vmul.f32 %v1104_v15, %v4783_v2 }
 0x20a   : > { %v955_v56 = vpop.xlane.xlu2 %954 }
 0x20b   : > { %v3820_v52 = vpop.eup %3819  ;;  %v993_v10 = vmax.f32 %v955_v56, 1e-24  ;;  %v1193_v63 = vmul.f32 %v4569_v0, %v1174_v3 }
 0x20c   : > { %v1116_v23 = vmul.f32 %v3820_v52, %v1000_v30  ;;  %v952_v27 = vpop.xlane.xlu1 %951  ;;  %vm1122_vm4 = vweird.f32 %v3820_v52 }
 0x20d   : > { %3823 = vrsqrt.f32 %v993_v10  ;;  %v3822_v4 = vpop.eup %3821  ;;  %v1228_v33 = vadd.f32 %v4576_v9, %v1193_v63  ;;  %v992_v7 = vmax.f32 %v952_v27, 1e-24  ;;  %960 = vadd.xlane.f32.xlu0 %v959_v25  ;;  %vm1123_vm6 = vmor %vm1121_vm5, %vm1122_vm4  ;;  %vm1051_vm11 = vweird.f32 %v993_v10 }
 0x20e   : > { %v1117_v21 = vmul.f32 %v3820_v52, %v1116_v23  ;;  %v1106_v54 = vmul.f32 %v3822_v4, %v999_v18  ;;  %vm1112_vm7 = vweird.f32 %v3822_v4 }
 0x20f   : > { %v1244_v59 = vpack.c.bf16 %v1228_v33, %v1228_v33  ;;  %3825 = vrsqrt.f32 %v992_v7  ;;  %v4907_v49 = vpop.permute.xlu0 %1373  ;;  %vm1113_vm9 = vmor %vm1111_vm8, %vm1112_vm7  ;;  %vm1041_vm14 = vweird.f32 %v992_v7 }
 0x210   : > { %v1118_v45 = vmul.f32 0.5, %v1117_v21  ;;  %v1107_v56 = vmul.f32 %v3822_v4, %v1106_v54  ;;  %v4911_v54 = vpop.f32.mrf.mxu2 }
 0x211   : > { %1261 = vst.msk [vmem:[#allocation2 + $0x24] sm:$0xf] %vm1251_vm2, %v1244_v59 }
 0x212   : > { %v1119_v15 = vsub.f32 1.5, %v1118_v45  ;;  %v1108_v53 = vmul.f32 0.5, %v1107_v56 }
 0x213   : > { %v3824_v3 = vpop.eup %3823 }
 0x214   : > { %v1120_v23 = vmul.f32 %v3820_v52, %v1119_v15  ;;  %v1046_v61 = vmul.f32 %v3824_v3, %v993_v10  ;;  %v1109_v27 = vsub.f32 1.5, %v1108_v53  ;;  %v938_v15 = vmul.f32 %v4911_v54, %v4911_v54 }
 0x215   : > { %v3826_v21 = vpop.eup %3825  ;;  %vm1052_vm10 = vweird.f32 %v3824_v3 }
 0x216   : > { %v1124_v63 = vsel %vm1123_vm6, %v3820_v52, %v1120_v23  ;;  %v1047_v25 = vmul.f32 %v3824_v3, %v1046_v61  ;;  %v1110_v58 = vmul.f32 %v3822_v4, %v1109_v27  ;;  %v1036_v40 = vmul.f32 %v3826_v21, %v992_v7  ;;  %vm1053_vm12 = vmor %vm1051_vm11, %vm1052_vm10 }
 0x217   : > { %v1176_v33 = vmul.f32 %v1124_v63, %v4815_v57  ;;  %v1956_v30 = vpop.permute.xlu0 %1955  ;;  %vm1042_vm13 = vweird.f32 %v3826_v21  ;;  %v1922_v7 = vpack.c.bf16 %v4756_v19, %v4756_v19 }
 0x218   : > { %v1048_v45 = vmul.f32 0.5, %v1047_v25  ;;  %v1114_v52 = vsel %vm1113_vm9, %v3822_v4, %v1110_v58  ;;  %v1037_v61 = vmul.f32 %v3826_v21, %v1036_v40  ;;  %2000 = vst.msk [vmem:[#allocation3 + $0x50] sm:$0xf] %vm1251_vm2, %v1956_v30  ;;  %v983_v58 = vsel %vm940_vm1, %v938_v15, 0.0  ;;  %vm1043_vm15 = vmor %vm1041_vm14, %vm1042_vm13 }
 0x219   : > { %v1195_v59 = vmul.f32 %v4569_v0, %v1176_v33  ;;  %v1175_v18 = vmul.f32 %v1114_v52, %v4801_v24 }
 0x21a   : > { %v1049_v56 = vsub.f32 1.5, %v1048_v45  ;;  %v1038_v63 = vmul.f32 0.5, %v1037_v61 }
 0x21b   : > { %v1230_v23 = vadd.f32 %v4576_v9, %v1195_v59  ;;  %v1194_v25 = vmul.f32 %v4569_v0, %v1175_v18 }
 0x21c   : > { %v1050_v53 = vmul.f32 %v3824_v3, %v1049_v56  ;;  %v1039_v44 = vsub.f32 1.5, %v1038_v63  ;;  %v1924_v63 = vpack.c.bf16 %v4730_v29, %v4730_v29 }
 0x21d   : > { %v1246_v27 = vpack.c.bf16 %v1230_v23, %v1230_v23  ;;  %v1229_v40 = vadd.f32 %v4576_v9, %v1194_v25 }
 0x21e   : > { %v1054_v33 = vsel %vm1053_vm12, %v3824_v3, %v1050_v53  ;;  %v1040_v45 = vmul.f32 %v3826_v21, %v1039_v44  ;;  %v4944_v53 = vpop.f32.mrf.mxu2 }
 0x21f   : > { %1263 = vst.msk [vmem:[#allocation2 + $0x2c] sm:$0xf] %vm1251_vm2, %v1246_v27  ;;  %v1169_v4 = vmul.f32 %v1054_v33, %v4821_v17  ;;  %v1245_v59 = vpack.c.bf16 %v1229_v40, %v1229_v40  ;;  %v939_v19 = vmul.f32 %v4944_v53, %v4944_v53  ;;  %v4952_v27 = vpop.permute.xlu2 %1375  ;;  %v1926_v33 = vpack.c.bf16 %v4765_v34, %v4765_v34 }
 0x220   : > { %v1044_v30 = vsel %vm1043_vm15, %v3826_v21, %v1040_v45 }
 0x221   : > { %v1188_v10 = vmul.f32 %v4569_v0, %v1169_v4  ;;  %984 = vadd.xlane.f32.xlu2 %v983_v58  ;;  %1262 = vst.msk [vmem:[#allocation2 + $0x28] sm:$0xf] %vm1251_vm2, %v1245_v59  ;;  %v1168_v52 = vmul.f32 %v1044_v30, %v4790_v13  ;;  %1379 = vrot.lane.b32.xlu0 %v938_v15, %s4269_s24 }
 0x222   : > { %v1925_v15 = vpack.c.bf16 %v4748_v12, %v4748_v12  ;;  %v1927_v12 = vpack.c.bf16 %v4779_v62, %v4779_v62 }
 0x223   : > { %v1223_v3 = vadd.f32 %v4576_v9, %v1188_v10  ;;  %v1187_v61 = vmul.f32 %v4569_v0, %v1168_v52  ;;  %v962_v0 = vsel %vm940_vm1, %v4897_v20, 0.0 }
 0x224   : > { %v4930_v23 = vpop.permute.xlu1 %1359 }
 0x225   : > { %v1239_v56 = vpack.c.bf16 %v1223_v3, %v1223_v3  ;;  %v1222_v44 = vadd.f32 %v4576_v9, %v1187_v61 }
 0x227   : > { %1256 = vst.msk [vmem:[#allocation2 + $0x10] sm:$0xf] %vm1251_vm2, %v1239_v56  ;;  %v1238_v21 = vpack.c.bf16 %v1222_v44, %v1222_v44 }
 0x229   : > { %1255 = vst.msk [vmem:[#allocation2 + $0xc] sm:$0xf] %vm1251_vm2, %v1238_v21  ;;  %1961 = vrot.lane.b32.xlu0 %v1922_v7, %s4269_s24  ;;  %v4966_v21 = vld [vmem:[%s5637_s9] ss:$0 sm:$0xff] }
 0x22c   : > { %v1958_v18 = vpop.permute.xlu1 %1957 }
 0x22d   : > { %2001 = vst.msk [vmem:[#allocation3 + $0x54] sm:$0xf] %vm1251_vm2, %v1958_v18 }
 0x22f   : > { %963 = vadd.xlane.f32.xlu1 %v962_v0 }
 0x231   : > { %1967 = vrot.lane.b32.xlu0 %v1925_v15, %s4269_s24 }
 0x234   : > { %v1378_v61 = vpop.permute.xlu1 %1377 }
 0x239   : > { %1381 = vrot.lane.b32.xlu2 %v939_v19, %s4269_s24 }
 0x241   : > { %1965 = vrot.lane.b32.xlu2 %v1924_v63, %s4269_s24  ;;  %v986_v63 = vsel %vm940_vm1, %v939_v19, 0.0  ;;  %v1402_v19 = vsel %vm940_vm1, %v4845_v8, 0.0  ;;  %v1399_v8 = vsel %vm940_vm1, %v4813_v55, 0.0  ;;  %v1426_v55 = vsel %vm940_vm1, %v4848_v6, 0.0 }
 0x242   : > { %v979_v20 = vpop.xlane.xlu0 %978 }
 0x243   : > { %v1001_v25 = vmax.f32 %v979_v20, 1e-24 }
 0x245   : > { %3827 = vrsqrt.f32 %v1001_v25  ;;  %vm1131_vm3 = vweird.f32 %v1001_v25 }
 0x248   : > { %1969 = vrot.lane.b32.xlu1 %v1926_v33, %s4269_s24 }
 0x249   : > { %1971 = vrot.lane.b32.xlu2 %v1927_v12, %s4269_s24 }
 0x24b   : > { %v958_v58 = vpop.xlane.xlu2 %957  ;;  %v3828_v29 = vpop.eup %3827 }
 0x24c   : > { %v994_v40 = vmax.f32 %v958_v58, 1e-24  ;;  %v1126_v4 = vmul.f32 %v3828_v29, %v1001_v25  ;;  %vm1132_vm0 = vweird.f32 %v3828_v29 }
 0x24d   : > { %vm1133_vm4 = vmor %vm1131_vm3, %vm1132_vm0 }
 0x24e   : > { %3829 = vrsqrt.f32 %v994_v40  ;;  %v1127_v45 = vmul.f32 %v3828_v29, %v1126_v4  ;;  %vm1061_vm6 = vweird.f32 %v994_v40 }
 0x250   : > { %v1128_v59 = vmul.f32 0.5, %v1127_v45 }
 0x252   : > { %v1129_v3 = vsub.f32 1.5, %v1128_v59 }
 0x253   : > { %v4960_v10 = vpop.permute.xlu2 %1363 }
 0x254   : > { %v3830_v30 = vpop.eup %3829  ;;  %v1130_v52 = vmul.f32 %v3828_v29, %v1129_v3 }
 0x255   : > { %v1056_v62 = vmul.f32 %v3830_v30, %v994_v40  ;;  %vm1062_vm5 = vweird.f32 %v3830_v30 }
 0x256   : > { %v1134_v56 = vsel %vm1133_vm4, %v3828_v29, %v1130_v52  ;;  %vm1063_vm7 = vmor %vm1061_vm6, %vm1062_vm5 }
 0x257   : > { %v1057_v34 = vmul.f32 %v3830_v30, %v1056_v62  ;;  %v1177_v44 = vmul.f32 %v1134_v56, %v4838_v32  ;;  %v1429_v62 = vsel %vm940_vm1, %v4891_v28, 0.0 }
 0x259   : > { %v1058_v7 = vmul.f32 0.5, %v1057_v34  ;;  %v1196_v18 = vmul.f32 %v4966_v21, %v1177_v44  ;;  %v1423_v44 = vsel %vm940_vm1, %v4843_v35, 0.0  ;;  %v1405_v35 = vsel %vm940_vm1, %v4901_v26, 0.0 }
 0x25b   : > { %v1059_v0 = vsub.f32 1.5, %v1058_v7  ;;  %v1960_v15 = vpop.permute.xlu2 %1959  ;;  %v1231_v20 = vadd.f32 %v4576_v9, %v1196_v18  ;;  %987 = vadd.xlane.f32.xlu0 %v986_v63  ;;  %v1411_v18 = vsel %vm940_vm1, %v4930_v23, 0.0  ;;  %v1362_v63 = vpop.permute.xlu0 %1361  ;;  %v1438_v23 = vsel %vm940_vm1, %v1378_v61, 0.0 }
 0x25c   : > { %2002 = vst.msk [vmem:[#allocation3 + $0x58] sm:$0xf] %vm1251_vm2, %v1960_v15  ;;  %v1414_v61 = vsel %vm940_vm1, %v1362_v63, 0.0 }
 0x25d   : > { %v1060_v25 = vmul.f32 %v3830_v30, %v1059_v0  ;;  %v1247_v12 = vpack.c.bf16 %v1231_v20, %v1231_v20 }
 0x25f   : > { %v1064_v33 = vsel %vm1063_vm7, %v3830_v30, %v1060_v25  ;;  %1264 = vst.msk [vmem:[#allocation2 + $0x30] sm:$0xf] %vm1251_vm2, %v1247_v12  ;;  %v982_v29 = vpop.xlane.xlu1 %981 }
 0x260   : > { %v1170_v58 = vmul.f32 %v1064_v33, %v4868_v60  ;;  %v1002_v45 = vmax.f32 %v982_v29, 1e-24  ;;  %v1432_v33 = vsel %vm940_vm1, %v4907_v49, 0.0  ;;  %v1408_v29 = vsel %vm940_vm1, %v4857_v22, 0.0 }
 0x261   : > { %v1417_v22 = vsel %vm940_vm1, %v4960_v10, 0.0 }
 0x262   : > { %v1189_v4 = vmul.f32 %v4966_v21, %v1170_v58  ;;  %3831 = vrsqrt.f32 %v1002_v45  ;;  %vm1141_vm9 = vweird.f32 %v1002_v45 }
 0x263   : > { %1403 = vadd.xlane.f32.xlu0 %v1402_v19 }
 0x264   : > { %v1224_v59 = vadd.f32 %v4576_v9, %v1189_v4 }
 0x266   : > { %v1240_v40 = vpack.c.bf16 %v1224_v59, %v1224_v59 }
 0x268   : > { %1257 = vst.msk [vmem:[#allocation2 + $0x14] sm:$0xf] %vm1251_vm2, %v1240_v40  ;;  %v3832_v3 = vpop.eup %3831 }
 0x269   : > { %v1136_v30 = vmul.f32 %v3832_v3, %v1002_v45  ;;  %vm1142_vm8 = vweird.f32 %v3832_v3  ;;  %v1435_v45 = vsel %vm940_vm1, %v4952_v27, 0.0 }
 0x26a   : > { %vm1143_vm10 = vmor %vm1141_vm9, %vm1142_vm8 }
 0x26b   : > { %v1137_v52 = vmul.f32 %v3832_v3, %v1136_v30  ;;  %1430 = vadd.xlane.f32.xlu0 %v1429_v62 }
 0x26d   : > { %v1138_v34 = vmul.f32 0.5, %v1137_v52 }
 0x26f   : > { %v1139_v56 = vsub.f32 1.5, %v1138_v34 }
 0x271   : > { %v1140_v7 = vmul.f32 %v3832_v3, %v1139_v56 }
 0x272   : > { %1424 = vadd.xlane.f32.xlu2 %v1423_v44  ;;  %1400 = vadd.xlane.f32.xlu1 %v1399_v8 }
 0x273   : > { %v1144_v28 = vsel %vm1143_vm10, %v3832_v3, %v1140_v7  ;;  %1412 = vadd.xlane.f32.xlu0 %v1411_v18 }
 0x274   : > { %v1178_v0 = vmul.f32 %v1144_v28, %v4854_v5 }
 0x276   : > { %v1197_v15 = vmul.f32 %v4966_v21, %v1178_v0 }
 0x277   : > { %v1366_v12 = vpop.permute.xlu1 %1365 }
 0x278   : > { %v1232_v20 = vadd.f32 %v4576_v9, %v1197_v15  ;;  %v1420_v6 = vsel %vm940_vm1, %v1366_v12, 0.0 }
 0x27a   : > { %1406 = vadd.xlane.f32.xlu2 %v1405_v35  ;;  %v1248_v25 = vpack.c.bf16 %v1232_v20, %v1232_v20  ;;  %1427 = vadd.xlane.f32.xlu1 %v1426_v55 }
 0x27b   : > { %1439 = vadd.xlane.f32.xlu0 %v1438_v23 }
 0x27c   : > { %1265 = vst.msk [vmem:[#allocation2 + $0x34] sm:$0xf] %vm1251_vm2, %v1248_v25 }
 0x280   : > { %v961_v26 = vpop.xlane.xlu0 %960 }
 0x281   : > { %v995_v58 = vmax.f32 %v961_v26, 1e-24 }
 0x282   : > { %1433 = vadd.xlane.f32.xlu2 %v1432_v33  ;;  %1409 = vadd.xlane.f32.xlu1 %v1408_v29 }
 0x283   : > { %3833 = vrsqrt.f32 %v995_v58  ;;  %1421 = vadd.xlane.f32.xlu0 %v1420_v6  ;;  %vm1071_vm12 = vweird.f32 %v995_v58 }
 0x289   : > { %v3834_v4 = vpop.eup %3833 }
 0x28a   : > { %1415 = vadd.xlane.f32.xlu2 %v1414_v61  ;;  %v1066_v59 = vmul.f32 %v3834_v4, %v995_v58  ;;  %1436 = vadd.xlane.f32.xlu1 %v1435_v45  ;;  %vm1072_vm11 = vweird.f32 %v3834_v4 }
 0x28b   : > { %vm1073_vm13 = vmor %vm1071_vm12, %vm1072_vm11 }
 0x28c   : > { %v1067_v49 = vmul.f32 %v3834_v4, %v1066_v59 }
 0x28e   : > { %v1068_v19 = vmul.f32 0.5, %v1067_v49 }
 0x290   : > { %v1069_v40 = vsub.f32 1.5, %v1068_v19 }
 0x292   : > { %v1070_v3 = vmul.f32 %v3834_v4, %v1069_v40  ;;  %1418 = vadd.xlane.f32.xlu1 %v1417_v22 }
 0x293   : > { %v1380_v52 = vpop.permute.xlu0 %1379 }
 0x294   : > { %v985_v30 = vpop.xlane.xlu2 %984  ;;  %v1074_v34 = vsel %vm1073_vm13, %v3834_v4, %v1070_v3  ;;  %v1441_v56 = vsel %vm940_vm1, %v1380_v52, 0.0 }
 0x295   : > { %v1003_v62 = vmax.f32 %v985_v30, 1e-24  ;;  %v1171_v27 = vmul.f32 %v1074_v34, %v4882_v14  ;;  %1442 = vadd.xlane.f32.xlu2 %v1441_v56 }
 0x297   : > { %3835 = vrsqrt.f32 %v1003_v62  ;;  %v1190_v44 = vmul.f32 %v4966_v21, %v1171_v27  ;;  %vm1151_vm15 = vweird.f32 %v1003_v62 }
 0x299   : > { %v1225_v7 = vadd.f32 %v4576_v9, %v1190_v44 }
 0x29b   : > { %v1241_v18 = vpack.c.bf16 %v1225_v7, %v1225_v7  ;;  %v1962_v28 = vpop.permute.xlu0 %1961 }
 0x29c   : > { %v1382_v8 = vpop.permute.xlu2 %1381  ;;  %2003 = vst.msk [vmem:[#allocation3 + $0x5c] sm:$0xf] %vm1251_vm2, %v1962_v28 }
 0x29d   : > { %v3836_v10 = vpop.eup %3835  ;;  %v1444_v0 = vsel %vm940_vm1, %v1382_v8, 0.0  ;;  %1258 = vst.msk [vmem:[#allocation2 + $0x18] sm:$0xf] %vm1251_vm2, %v1241_v18 }
 0x29e   : > { %v1146_v15 = vmul.f32 %v3836_v10, %v1003_v62  ;;  %1445 = vadd.xlane.f32.xlu1 %v1444_v0  ;;  %vm1152_vm14 = vweird.f32 %v3836_v10 }
 0x29f   : > { %vm1153_vm1 = vmor %vm1151_vm15, %vm1152_vm14 }
 0x2a0   : > { %v1147_v35 = vmul.f32 %v3836_v10, %v1146_v15 }
 0x2a2   : > { %v1148_v63 = vmul.f32 0.5, %v1147_v35  ;;  %v964_v25 = vpop.xlane.xlu1 %963 }
 0x2a3   : > { %v996_v23 = vmax.f32 %v964_v25, 1e-24  ;;  %v1968_v12 = vpop.permute.xlu0 %1967 }
 0x2a4   : > { %v1149_v20 = vsub.f32 1.5, %v1148_v63  ;;  %v1966_v55 = vpop.permute.xlu2 %1965  ;;  %2006 = vst.msk [vmem:[#allocation3 + $0x68] sm:$0xf] %vm1251_vm2, %v1968_v12 }
 0x2a5   : > { %2005 = vst.msk [vmem:[#allocation3 + $0x64] sm:$0xf] %vm1251_vm2, %v1966_v55  ;;  %3837 = vrsqrt.f32 %v996_v23  ;;  %vm1081_vm3 = vweird.f32 %v996_v23 }
 0x2a6   : > { %v1150_v33 = vmul.f32 %v3836_v10, %v1149_v20 }
 0x2a8   : > { %v1154_v26 = vsel %vm1153_vm1, %v3836_v10, %v1150_v33 }
 0x2a9   : > { %v1179_v58 = vmul.f32 %v1154_v26, %v4911_v54 }
 0x2ab   : > { %v1198_v29 = vmul.f32 %v4966_v21, %v1179_v58  ;;  %v3838_v61 = vpop.eup %3837 }
 0x2ac   : > { %v1972_v6 = vpop.permute.xlu2 %1971  ;;  %v1076_v45 = vmul.f32 %v3838_v61, %v996_v23  ;;  %vm1082_vm0 = vweird.f32 %v3838_v61 }
 0x2ad   : > { %v1233_v4 = vadd.f32 %v4576_v9, %v1198_v29  ;;  %2008 = vst.msk [vmem:[#allocation3 + $0x70] sm:$0xf] %vm1251_vm2, %v1972_v6  ;;  %vm1083_vm4 = vmor %vm1081_vm3, %vm1082_vm0 }
 0x2ae   : > { %v1077_v49 = vmul.f32 %v3838_v61, %v1076_v45 }
 0x2af   : > { %v1249_v59 = vpack.c.bf16 %v1233_v4, %v1233_v4 }
 0x2b0   : > { %v1078_v19 = vmul.f32 0.5, %v1077_v49 }
 0x2b1   : > { %1266 = vst.msk [vmem:[#allocation2 + $0x38] sm:$0xf] %vm1251_vm2, %v1249_v59 }
 0x2b2   : > { %v1079_v40 = vsub.f32 1.5, %v1078_v19 }
 0x2b4   : > { %v1080_v22 = vmul.f32 %v3838_v61, %v1079_v40 }
 0x2b6   : > { %v1084_v3 = vsel %vm1083_vm4, %v3838_v61, %v1080_v22 }
 0x2b7   : > { %v1172_v30 = vmul.f32 %v1084_v3, %v4893_v1 }
 0x2b9   : > { %v1191_v62 = vmul.f32 %v4966_v21, %v1172_v30 }
 0x2ba   : > { %v1970_v52 = vpop.permute.xlu1 %1969 }
 0x2bb   : > { %v1226_v34 = vadd.f32 %v4576_v9, %v1191_v62  ;;  %2007 = vst.msk [vmem:[#allocation3 + $0x6c] sm:$0xf] %vm1251_vm2, %v1970_v52 }
 0x2bd   : > { %v1242_v56 = vpack.c.bf16 %v1226_v34, %v1226_v34 }
 0x2bf   : > { %1259 = vst.msk [vmem:[#allocation2 + $0x1c] sm:$0xf] %vm1251_vm2, %v1242_v56 }
 0x2ce   : > { %v988_v27 = vpop.xlane.xlu0 %987 }
 0x2cf   : > { %v1004_v44 = vmax.f32 %v988_v27, 1e-24 }
 0x2d1   : > { %3839 = vrsqrt.f32 %v1004_v44  ;;  %vm1161_vm6 = vweird.f32 %v1004_v44 }
 0x2d6   : > { %v1404_v7 = vpop.xlane.xlu0 %1403 }
 0x2d7   : > { %v3840_v8 = vpop.eup %3839  ;;  %v1448_v10 = vmax.f32 %v1404_v7, 1e-24 }
 0x2d8   : > { %v1156_v18 = vmul.f32 %v3840_v8, %v1004_v44  ;;  %vm1162_vm5 = vweird.f32 %v3840_v8 }
 0x2d9   : > { %3841 = vrsqrt.f32 %v1448_v10  ;;  %vm1163_vm7 = vmor %vm1161_vm6, %vm1162_vm5  ;;  %vm1479_vm9 = vweird.f32 %v1448_v10 }
 0x2da   : > { %v1157_v28 = vmul.f32 %v3840_v8, %v1156_v18 }
 0x2dc   : > { %v1158_v0 = vmul.f32 0.5, %v1157_v28 }
 0x2de   : > { %v1159_v15 = vsub.f32 1.5, %v1158_v0  ;;  %v1431_v35 = vpop.xlane.xlu0 %1430 }
 0x2df   : > { %v3842_v63 = vpop.eup %3841  ;;  %v1457_v20 = vmax.f32 %v1431_v35, 1e-24 }
 0x2e0   : > { %v1160_v55 = vmul.f32 %v3840_v8, %v1159_v15  ;;  %v1474_v25 = vmul.f32 %v3842_v63, %v1448_v10  ;;  %vm1480_vm8 = vweird.f32 %v3842_v63 }
 0x2e1   : > { %3843 = vrsqrt.f32 %v1457_v20  ;;  %vm1481_vm10 = vmor %vm1479_vm9, %vm1480_vm8  ;;  %vm1569_vm12 = vweird.f32 %v1457_v20 }
 0x2e2   : > { %v1164_v23 = vsel %vm1163_vm7, %v3840_v8, %v1160_v55  ;;  %v1475_v12 = vmul.f32 %v3842_v63, %v1474_v25 }
 0x2e3   : > { %v1180_v33 = vmul.f32 %v1164_v23, %v4944_v53 }
 0x2e4   : > { %v1476_v58 = vmul.f32 0.5, %v1475_v12 }
 0x2e5   : > { %v1425_v26 = vpop.xlane.xlu2 %1424  ;;  %v1199_v6 = vmul.f32 %v4966_v21, %v1180_v33  ;;  %v1401_v61 = vpop.xlane.xlu1 %1400 }
 0x2e6   : > { %v5026_v29 = vmax.f32 %v1425_v26, 1e-24  ;;  %v1477_v4 = vsub.f32 1.5, %v1476_v58  ;;  %v5030_v45 = vmax.f32 %v1401_v61, 1e-24  ;;  %v1413_v59 = vpop.xlane.xlu0 %1412 }
 0x2e7   : > { %v5032_v49 = vpop.eup %3843  ;;  %v1234_v19 = vadd.f32 %v4576_v9, %v1199_v6  ;;  %v5035_v40 = vmax.f32 %v1413_v59, 1e-24 }
 0x2e8   : > { %3845 = vrsqrt.f32 %v5026_v29  ;;  %v1478_v22 = vmul.f32 %v3842_v63, %v1477_v4  ;;  %v1564_v3 = vmul.f32 %v5032_v49, %v1457_v20  ;;  %vm1570_vm11 = vweird.f32 %v5032_v49 }
 0x2e9   : > { %3847 = vrsqrt.f32 %v5030_v45  ;;  %v1250_v21 = vpack.c.bf16 %v1234_v19, %v1234_v19  ;;  %vm5071_vm13 = vmor %vm1569_vm12, %vm1570_vm11  ;;  %vm1549_vm14 = vweird.f32 %v5026_v29  ;;  %vm1469_vm15 = vweird.f32 %v5030_v45 }
 0x2ea   : > { %3849 = vrsqrt.f32 %v5035_v40  ;;  %v1482_v30 = vsel %vm1481_vm10, %v3842_v63, %v1478_v22  ;;  %v1565_v62 = vmul.f32 %v5032_v49, %v1564_v3  ;;  %vm1509_vm0 = vweird.f32 %v5035_v40 }
 0x2eb   : > { %1267 = vst.msk [vmem:[#allocation2 + $0x3c] sm:$0xf] %vm1251_vm2, %v1250_v21  ;;  %v1624_v9 = vmul.f32 %v1482_v30, %v4751_v16 }
 0x2ec   : > { %v1566_v56 = vmul.f32 0.5, %v1565_v62 }
 0x2ed   : > { %v1407_v52 = vpop.xlane.xlu2 %1406  ;;  %v1428_v7 = vpop.xlane.xlu1 %1427  ;;  %v1643_v0 = vmul.f32 %v4660_v36, %v1624_v9 }
 0x2ee   : > { %v5043_v34 = vpop.eup %3845  ;;  %v5045_v27 = vmax.f32 %v1407_v52, 1e-24  ;;  %v1567_v10 = vsub.f32 1.5, %v1566_v56  ;;  %v5052_v18 = vmax.f32 %v1428_v7, 1e-24  ;;  %v1440_v28 = vpop.xlane.xlu0 %1439 }
 0x2ef   : > { %v1544_v44 = vmul.f32 %v5043_v34, %v5026_v29  ;;  %v5049_v8 = vpop.eup %3847  ;;  %v5060_v63 = vmax.f32 %v1440_v28, 1e-24  ;;  %v1723_v26 = vadd.f32 %v4662_v37, %v1643_v0  ;;  %vm1550_vm1 = vweird.f32 %v5043_v34 }
 0x2f0   : > { %3851 = vrsqrt.f32 %v5045_v27  ;;  %v5055_v16 = vpop.eup %3849  ;;  %v1464_v35 = vmul.f32 %v5049_v8, %v5030_v45  ;;  %v1568_v55 = vmul.f32 %v5032_v49, %v1567_v10  ;;  %vm1489_vm3 = vweird.f32 %v5045_v27  ;;  %vm5111_vm7 = vmor %vm1549_vm14, %vm1550_vm1 }
 0x2f1   : > { %v1545_v15 = vmul.f32 %v5043_v34, %v1544_v44  ;;  %v1504_v25 = vmul.f32 %v5055_v16, %v5035_v40  ;;  %3853 = vrsqrt.f32 %v5052_v18  ;;  %v1739_v37 = vpack.c.bf16 %v1723_v26, %v1723_v26 }
 0x2f2   : > { %v1465_v12 = vmul.f32 %v5049_v8, %v1464_v35  ;;  %3855 = vrsqrt.f32 %v5060_v63  ;;  %v1572_v20 = vsel %vm5071_vm13, %v5032_v49, %v1568_v55  ;;  %vm1470_vm4 = vweird.f32 %v5049_v8 }
 0x2f3   : > { %v1546_v23 = vmul.f32 0.5, %v1545_v15  ;;  %v1505_v33 = vmul.f32 %v5055_v16, %v1504_v25  ;;  %1772 = vrot.lane.b32.xlu1 %v1739_v37, %s4269_s24  ;;  %v1633_v28 = vmul.f32 %v1572_v20, %v4801_v24  ;;  %vm1510_vm5 = vweird.f32 %v5055_v16  ;;  %vm5135_vm11 = vmor %vm1469_vm15, %vm1470_vm4 }
 0x2f4   : > { %v1466_v61 = vmul.f32 0.5, %v1465_v12  ;;  %vm1559_vm8 = vweird.f32 %v5052_v18  ;;  %vm1599_vm9 = vweird.f32 %v5060_v63  ;;  %vm5153_vm13 = vmor %vm1509_vm0, %vm1510_vm5 }
 0x2f5   : > { %v1547_v6 = vsub.f32 1.5, %v1546_v23  ;;  %v1434_v4 = vpop.xlane.xlu2 %1433  ;;  %v1506_v19 = vmul.f32 0.5, %v1505_v33  ;;  %v1410_v30 = vpop.xlane.xlu1 %1409 }
 0x2f6   : > { %v5077_v59 = vpop.eup %3851  ;;  %v5082_v22 = vmax.f32 %v1434_v4, 1e-24  ;;  %v1467_v3 = vsub.f32 1.5, %v1466_v61  ;;  %v5093_v49 = vmax.f32 %v1410_v30, 1e-24  ;;  %v1422_v10 = vpop.xlane.xlu0 %1421 }
 0x2f7   : > { %v1484_v21 = vmul.f32 %v5077_v59, %v5045_v27  ;;  %v5088_v62 = vpop.eup %3853  ;;  %v1548_v52 = vmul.f32 %v5043_v34, %v1547_v6  ;;  %v1507_v9 = vsub.f32 1.5, %v1506_v19  ;;  %vm1490_vm6 = vweird.f32 %v5077_v59 }
 0x2f8   : > { %3857 = vrsqrt.f32 %v5082_v22  ;;  %v5095_v56 = vpop.eup %3855  ;;  %v1554_v7 = vmul.f32 %v5088_v62, %v5052_v18  ;;  %v1468_v35 = vmul.f32 %v5049_v8, %v1467_v3  ;;  %v5125_v12 = vmax.f32 %v1422_v10, 1e-24  ;;  %vm5176_vm15 = vmor %vm1489_vm3, %vm1490_vm6 }
 0x2f9   : > { %v1485_v44 = vmul.f32 %v5077_v59, %v1484_v21  ;;  %v1594_v0 = vmul.f32 %v5095_v56, %v5060_v63  ;;  %3859 = vrsqrt.f32 %v5093_v49  ;;  %v1552_v25 = vsel %vm5111_vm7, %v5043_v34, %v1548_v52 }
 0x2fa   : > { %v1555_v55 = vmul.f32 %v5088_v62, %v1554_v7  ;;  %v1508_v23 = vmul.f32 %v5055_v16, %v1507_v9  ;;  %vm1560_vm10 = vweird.f32 %v5088_v62  ;;  %v1652_v6 = vmul.f32 %v4660_v36, %v1633_v28 }
 0x2fb   : > { %v1486_v24 = vmul.f32 0.5, %v1485_v44  ;;  %v1595_v29 = vmul.f32 %v5095_v56, %v1594_v0  ;;  %vm1600_vm12 = vweird.f32 %v5095_v56  ;;  %3861 = vrsqrt.f32 %v5125_v12  ;;  %vm5197_vm3 = vmor %vm1559_vm8, %vm1560_vm10 }
 0x2fc   : > { %v1556_v26 = vmul.f32 0.5, %v1555_v55  ;;  %v1472_v19 = vsel %vm5135_vm11, %v5049_v8, %v1468_v35  ;;  %v1732_v8 = vadd.f32 %v4682_v47, %v1652_v6  ;;  %v1631_v9 = vmul.f32 %v1552_v25, %v4711_v11  ;;  %vm5214_vm5 = vmor %vm1599_vm9, %vm1600_vm12 }
 0x2fd   : > { %v1487_v33 = vsub.f32 1.5, %v1486_v24  ;;  %v1416_v58 = vpop.xlane.xlu2 %1415  ;;  %v1596_v4 = vmul.f32 0.5, %v1595_v29  ;;  %v1437_v21 = vpop.xlane.xlu1 %1436  ;;  %v1512_v7 = vsel %vm5153_vm13, %v5055_v16, %v1508_v23  ;;  %vm1579_vm14 = vweird.f32 %v5082_v22 }
 0x2fe   : > { %v5129_v61 = vpop.eup %3857  ;;  %v5141_v20 = vmax.f32 %v1416_v58, 1e-24  ;;  %v1557_v3 = vsub.f32 1.5, %v1556_v26  ;;  %v5170_v28 = vmax.f32 %v1437_v21, 1e-24  ;;  %vm1499_vm1 = vweird.f32 %v5093_v49 }
 0x2ff   : > { %v1488_v37 = vmul.f32 %v5077_v59, %v1487_v33  ;;  %v1574_v45 = vmul.f32 %v5129_v61, %v5082_v22  ;;  %v1597_v52 = vsub.f32 1.5, %v1596_v4  ;;  %v5160_v44 = vpop.eup %3859  ;;  %v1748_v0 = vpack.c.bf16 %v1732_v8, %v1732_v8 }
 0x300   : > { %3863 = vrsqrt.f32 %v5141_v20  ;;  %v5166_v10 = vmul.f32 %v5088_v62, %v1557_v3  ;;  %v1494_v16 = vmul.f32 %v5160_v44, %v5093_v49  ;;  %vm1580_vm0 = vweird.f32 %v5129_v61 }
 0x301   : > { %v1575_v40 = vmul.f32 %v5129_v61, %v1574_v45  ;;  %v5181_v11 = vmul.f32 %v5095_v56, %v1597_v52  ;;  %v1492_v15 = vsel %vm5176_vm15, %v5077_v59, %v1488_v37  ;;  %3865 = vrsqrt.f32 %v5170_v28  ;;  %v5191_v27 = vpop.eup %3861  ;;  %1790 = vrot.lane.b32.xlu1 %v1748_v0, %s4269_s24  ;;  %vm5248_vm9 = vmor %vm1579_vm14, %vm1580_vm0 }
 0x302   : > { %v1495_v55 = vmul.f32 %v5160_v44, %v1494_v16  ;;  %vm1500_vm4 = vweird.f32 %v5160_v44  ;;  %v1650_v59 = vmul.f32 %v4660_v36, %v1631_v9  ;;  %v1623_v25 = vmul.f32 %v1472_v19, %v4690_v51 }
 0x303   : > { %v1576_v35 = vmul.f32 0.5, %v1575_v40  ;;  %v1562_v23 = vsel %vm5197_vm3, %v5088_v62, %v5166_v10  ;;  %v1534_v33 = vmul.f32 %v5191_v27, %v5125_v12  ;;  %vm1539_vm6 = vweird.f32 %v5125_v12  ;;  %vm5261_vm11 = vmor %vm1499_vm1, %vm1500_vm4 }
 0x304   : > { %v1627_v51 = vmul.f32 %v1512_v7, %v4821_v17  ;;  %v1602_v62 = vsel %vm5214_vm5, %v5095_v56, %v5181_v11  ;;  %v1496_v63 = vmul.f32 0.5, %v1495_v55  ;;  %v1730_v58 = vadd.f32 %v4674_v43, %v1650_v59 }
 0x305   : > { %v1577_v29 = vsub.f32 1.5, %v1576_v35  ;;  %v1642_v6 = vmul.f32 %v4660_v36, %v1623_v25  ;;  %v1535_v4 = vmul.f32 %v5191_v27, %v1534_v33  ;;  %v1419_v17 = vpop.xlane.xlu1 %1418  ;;  %v1625_v37 = vmul.f32 %v1492_v15, %v4761_v31 }
 0x306   : > { %v5222_v26 = vpop.eup %3863  ;;  %v1497_v3 = vsub.f32 1.5, %v1496_v63  ;;  %vm1519_vm7 = vweird.f32 %v5141_v20  ;;  %v1746_v45 = vpack.c.bf16 %v1730_v58, %v1730_v58  ;;  %v1646_v43 = vmul.f32 %v4660_v36, %v1627_v51 }
 0x307   : > { %v1578_v34 = vmul.f32 %v5129_v61, %v1577_v29  ;;  %v1514_v19 = vmul.f32 %v5222_v26, %v5141_v20  ;;  %v1722_v56 = vadd.f32 %v4666_v39, %v1642_v6  ;;  %v5238_v21 = vpop.eup %3865  ;;  %v1536_v30 = vmul.f32 0.5, %v1535_v4 }
 0x308   : > { %vm1540_vm8 = vweird.f32 %v5191_v27  ;;  %v5242_v8 = vmax.f32 %v1419_v17, 1e-24  ;;  %v1498_v39 = vmul.f32 %v5160_v44, %v1497_v3  ;;  %vm1520_vm10 = vweird.f32 %v5222_v26  ;;  %1786 = vrot.lane.b32.xlu2 %v1746_v45, %s4269_s24  ;;  %v1443_v10 = vpop.xlane.xlu2 %1442 }
 0x309   : > { %v1515_v52 = vmul.f32 %v5222_v26, %v1514_v19  ;;  %v1584_v9 = vmul.f32 %v5238_v21, %v5170_v28  ;;  %v1738_v7 = vpack.c.bf16 %v1722_v56, %v1722_v56  ;;  %v1537_v40 = vsub.f32 1.5, %v1536_v30  ;;  %vm5283_vm12 = vmor %vm1539_vm6, %vm1540_vm8 }
 0x30a   : > { %v1726_v11 = vadd.f32 %v4670_v41, %v1646_v43  ;;  %3867 = vrsqrt.f32 %v5242_v8  ;;  %v1582_v16 = vsel %vm5248_vm9, %v5129_v61, %v1578_v34  ;;  %v1502_v0 = vsel %vm5261_vm11, %v5160_v44, %v1498_v39  ;;  %vm5303_vm14 = vmor %vm1519_vm7, %vm1520_vm10 }
 0x30b   : > { %v1516_v47 = vmul.f32 0.5, %v1515_v52  ;;  %v1585_v49 = vmul.f32 %v5238_v21, %v1584_v9  ;;  %1770 = vrot.lane.b32.xlu0 %v1738_v7, %s4269_s24  ;;  %v1644_v15 = vmul.f32 %v4660_v36, %v1625_v37  ;;  %v1538_v35 = vmul.f32 %v5191_v27, %v1537_v40 }
 0x30c   : > { %v1742_v41 = vpack.c.bf16 %v1726_v11, %v1726_v11  ;;  %v5277_v55 = vmax.f32 %v1443_v10, 1e-24  ;;  %v1632_v25 = vmul.f32 %v1562_v23, %v4783_v2  ;;  %v1636_v18 = vmul.f32 %v1602_v62, %v4854_v5 }
 0x30d   : > { %v1517_v24 = vsub.f32 1.5, %v1516_v47  ;;  %v1586_v44 = vmul.f32 0.5, %v1585_v49  ;;  %v1724_v59 = vadd.f32 %v4664_v38, %v1644_v15  ;;  %v1542_v29 = vsel %vm5283_vm12, %v5191_v27, %v1538_v35  ;;  %v5723_v35 = vld [vmem:[#allocation36_spill] sm:$0xff] }
 0x30e   : > { %vm1590_vm13 = vweird.f32 %v5238_v21  ;;  %1778 = vrot.lane.b32.xlu1 %v1742_v41, %s4269_s24  ;;  %3869 = vrsqrt.f32 %v5277_v55  ;;  %v1651_v38 = vmul.f32 %v4660_v36, %v1632_v25  ;;  %v1655_v2 = vmul.f32 %v4660_v36, %v1636_v18 }
 0x30f   : > { %v1518_v33 = vmul.f32 %v5222_v26, %v1517_v24  ;;  %v1587_v12 = vsub.f32 1.5, %v1586_v44  ;;  %v1740_v51 = vpack.c.bf16 %v1724_v59, %v1724_v59  ;;  %vm1589_vm15 = vweird.f32 %v5170_v28 }
 0x310   : > { %v3868_v23 = vpop.eup %3867  ;;  %v1634_v62 = vmul.f32 %v1582_v16, %v4815_v57  ;;  %v1626_v63 = vmul.f32 %v1502_v0, %v4790_v13  ;;  %v1630_v58 = vmul.f32 %v1542_v29, %v4893_v1  ;;  %v1731_v4 = vadd.f32 %v4684_v48, %v1651_v38  ;;  %vm5320_vm1 = vmor %vm1589_vm15, %vm1590_vm13  ;;  %v5724_v38 = vld [vmem:[#allocation39_spill] sm:$0xff] }
 0x311   : > { %v1446_v27 = vpop.xlane.xlu1 %1445  ;;  %v1522_v6 = vsel %vm5303_vm14, %v5222_v26, %v1518_v33  ;;  %v1588_v34 = vmul.f32 %v5238_v21, %v1587_v12  ;;  %v1524_v20 = vmul.f32 %v3868_v23, %v5242_v8  ;;  %1774 = vrot.lane.b32.xlu2 %v1740_v51, %s4269_s24  ;;  %v1735_v13 = vadd.f32 %v4688_v50, %v1655_v2  ;;  %v5725_v2 = vld [vmem:[#allocation35_spill] sm:$0xff] }
 0x312   : > { %v1462_v1 = vmax.f32 %v1446_v27, 1e-24  ;;  %v1653_v28 = vmul.f32 %v4660_v36, %v1634_v62  ;;  %v1645_v26 = vmul.f32 %v4660_v36, %v1626_v63  ;;  %v1747_v37 = vpack.c.bf16 %v1731_v4, %v1731_v4  ;;  %v5728_v4 = vld [vmem:[#allocation40_spill] sm:$0xff] }
 0x313   : > { %v1592_v19 = vsel %vm5320_vm1, %v5238_v21, %v1588_v34  ;;  %v1525_v17 = vmul.f32 %v3868_v23, %v1524_v20  ;;  %v1649_v48 = vmul.f32 %v4660_v36, %v1630_v58  ;;  %v1751_v45 = vpack.c.bf16 %v1735_v13, %v1735_v13  ;;  %v5721_v21 = vld [vmem:[#allocation33_spill] sm:$0xff] }
 0x314   : > { %v3870_v3 = vpop.eup %3869  ;;  %3871 = vrsqrt.f32 %v1462_v1  ;;  %v1733_v56 = vadd.f32 %v4680_v46, %v1653_v28  ;;  %1788 = vrot.lane.b32.xlu0 %v1747_v37, %s4269_s24  ;;  %v1725_v30 = vadd.f32 %v4672_v42, %v1645_v26  ;;  %v1628_v39 = vmul.f32 %v1522_v6, %v4868_v60  ;;  %v5722_v60 = vld [vmem:[#allocation32_spill] sm:$0xff]  ;;  %v5727_v34 = vld [vmem:[#allocation37_spill] sm:$0xff] }
 0x315   : > { %v1526_v43 = vmul.f32 0.5, %v1525_v17  ;;  %v1604_v50 = vmul.f32 %v3870_v3, %v5277_v55  ;;  %v1729_v31 = vadd.f32 %v5721_v21, %v1649_v48  ;;  %v1635_v9 = vmul.f32 %v1592_v19, %v4838_v32 }
 0x316   : > { %1796 = vrot.lane.b32.xlu1 %v1751_v45, %s4269_s24  ;;  %v1749_v52 = vpack.c.bf16 %v1733_v56, %v1733_v56  ;;  %vm1530_vm0 = vweird.f32 %v3868_v23  ;;  %v1647_v46 = vmul.f32 %v4660_v36, %v1628_v39  ;;  %vm1529_vm3 = vweird.f32 %v5242_v8 }
 0x317   : > { %v1527_v7 = vsub.f32 1.5, %v1526_v43  ;;  %v1605_v10 = vmul.f32 %v3870_v3, %v1604_v50  ;;  %v1654_v22 = vmul.f32 %v4660_v36, %v1635_v9  ;;  %v1741_v47 = vpack.c.bf16 %v1725_v30, %v1725_v30  ;;  %vm1531_vm4 = vmor %vm1529_vm3, %vm1530_vm0 }
 0x318   : > { %v1745_v16 = vpack.c.bf16 %v1729_v31, %v1729_v31  ;;  %v1727_v0 = vadd.f32 %v5722_v60, %v1647_v46  ;;  %vm1610_vm5 = vweird.f32 %v3870_v3  ;;  %vm1609_vm6 = vweird.f32 %v5277_v55 }
 0x319   : > { %v1528_v40 = vmul.f32 %v3868_v23, %v1527_v7  ;;  %v1606_v42 = vmul.f32 0.5, %v1605_v10  ;;  %1792 = vrot.lane.b32.xlu2 %v1749_v52, %s4269_s24  ;;  %v1734_v24 = vadd.f32 %v5723_v35, %v1654_v22  ;;  %vm1611_vm7 = vmor %vm1609_vm6, %vm1610_vm5  ;;  %vm1619_vm9 = vweird.f32 %v1462_v1 }
 0x31a   : > { %v3872_v11 = vpop.eup %3871  ;;  %v1743_v8 = vpack.c.bf16 %v1727_v0, %v1727_v0  ;;  %v1930_v57 = vpack.c.bf16 %v5728_v4, %v5728_v4 }
 0x31b   : > { %v1532_v32 = vsel %vm1531_vm4, %v3868_v23, %v1528_v40  ;;  %v1607_v49 = vsub.f32 1.5, %v1606_v42  ;;  %v1614_v15 = vmul.f32 %v3872_v11, %v1462_v1  ;;  %vm1620_vm8 = vweird.f32 %v3872_v11  ;;  %v5729_v1 = vld [vmem:[#allocation38_spill] sm:$0xff] }
 0x31c   : > { %1776 = vrot.lane.b32.xlu0 %v1741_v47, %s4269_s24  ;;  %v1629_v44 = vmul.f32 %v1532_v32, %v4882_v14  ;;  %v1750_v55 = vpack.c.bf16 %v1734_v24, %v1734_v24  ;;  %v1929_v14 = vpack.c.bf16 %v5724_v38, %v5724_v38  ;;  %vm1621_vm10 = vmor %vm1619_vm9, %vm1620_vm8 }
 0x31d   : > { %v1608_v41 = vmul.f32 %v3870_v3, %v1607_v49  ;;  %v1615_v61 = vmul.f32 %v3872_v11, %v1614_v15 }
 0x31e   : > { %1784 = vrot.lane.b32.xlu1 %v1745_v16, %s4269_s24  ;;  %v1648_v33 = vmul.f32 %v4660_v36, %v1629_v44 }
 0x31f   : > { %v1612_v59 = vsel %vm1611_vm7, %v3870_v3, %v1608_v41  ;;  %v1616_v25 = vmul.f32 0.5, %v1615_v61 }
 0x320   : > { %v1637_v18 = vmul.f32 %v1612_v59, %v4911_v54  ;;  %v5726_v54 = vld [vmem:[#allocation34_spill] sm:$0xff] }
 0x321   : > { %v1617_v29 = vsub.f32 1.5, %v1616_v25  ;;  %1780 = vrot.lane.b32.xlu2 %v1743_v8, %s4269_s24  ;;  %v1728_v27 = vadd.f32 %v5726_v54, %v1648_v33 }
 0x322   : > { %v1656_v12 = vmul.f32 %v4660_v36, %v1637_v18 }
 0x323   : > { %v1618_v51 = vmul.f32 %v3872_v11, %v1617_v29  ;;  %v1744_v58 = vpack.c.bf16 %v1728_v27, %v1728_v27 }
 0x324   : > { %v1736_v23 = vadd.f32 %v5725_v2, %v1656_v12  ;;  %1794 = vrot.lane.b32.xlu0 %v1750_v55, %s4269_s24 }
 0x325   : > { %v1622_v5 = vsel %vm1621_vm10, %v3872_v11, %v1618_v51 }
 0x326   : > { %1975 = vrot.lane.b32.xlu1 %v1929_v14, %s4269_s24  ;;  %v1752_v62 = vpack.c.bf16 %v1736_v23, %v1736_v23  ;;  %v1638_v63 = vmul.f32 %v1622_v5, %v4944_v53  ;;  %v1928_v53 = vpack.c.bf16 %v5729_v1, %v5729_v1 }
 0x328   : > { %v1657_v6 = vmul.f32 %v4660_v36, %v1638_v63 }
 0x329   : > { %1798 = vrot.lane.b32.xlu2 %v1752_v62, %s4269_s24 }
 0x32a   : > { %v1737_v20 = vadd.f32 %v5727_v34, %v1657_v6 }
 0x32c   : > { %1782 = vrot.lane.b32.xlu0 %v1744_v58, %s4269_s24  ;;  %v1753_v13 = vpack.c.bf16 %v1737_v20, %v1737_v20 }
 0x331   : > { %1977 = vrot.lane.b32.xlu2 %v1930_v57, %s4269_s24 }
 0x334   : > { %1800 = vrot.lane.b32.xlu0 %v1753_v13, %s4269_s24 }
 0x33c   : > { %1973 = vrot.lane.b32.xlu0 %v1928_v53, %s4269_s24 }
 0x362   : > { %v1787_v28 = vpop.permute.xlu2 %1786 }
 0x363   : > { %1827 = vst.msk [vmem:[#allocation2 + $0x60] sm:$0xf] %vm1251_vm2, %v1787_v28 }
 0x365   : > { %v1773_v36 = vpop.permute.xlu1 %1772 }
 0x366   : > { %1820 = vst.msk [vmem:[#allocation2 + $0x44] sm:$0xf] %vm1251_vm2, %v1773_v36 }
 0x36b   : > { %v1775_v26 = vpop.permute.xlu2 %1774 }
 0x36c   : > { %1821 = vst.msk [vmem:[#allocation2 + $0x48] sm:$0xf] %vm1251_vm2, %v1775_v26 }
 0x373   : > { %v1793_v19 = vpop.permute.xlu2 %1792  ;;  %v1791_v17 = vpop.permute.xlu1 %1790 }
 0x374   : > { %1830 = vst.msk [vmem:[#allocation2 + $0x6c] sm:$0xf] %vm1251_vm2, %v1793_v19 }
 0x375   : > { %1829 = vst.msk [vmem:[#allocation2 + $0x68] sm:$0xf] %vm1251_vm2, %v1791_v17 }
 0x37b   : > { %v1781_v37 = vpop.permute.xlu2 %1780 }
 0x37c   : > { %1824 = vst.msk [vmem:[#allocation2 + $0x54] sm:$0xf] %vm1251_vm2, %v1781_v37 }
 0x37d   : > { %v1771_v48 = vpop.permute.xlu0 %1770 }
 0x37e   : > { %1819 = vst.msk [vmem:[#allocation2 + $0x40] sm:$0xf] %vm1251_vm2, %v1771_v48 }
 0x380   : > { %v1779_v3 = vpop.permute.xlu1 %1778 }
 0x381   : > { %1823 = vst.msk [vmem:[#allocation2 + $0x50] sm:$0xf] %vm1251_vm2, %v1779_v3 }
 0x383   : > { %v1799_v45 = vpop.permute.xlu2 %1798 }
 0x384   : > { %1833 = vst.msk [vmem:[#allocation2 + $0x78] sm:$0xf] %vm1251_vm2, %v1799_v45 }
 0x386   : > { %v1789_v56 = vpop.permute.xlu0 %1788 }
 0x387   : > { %1828 = vst.msk [vmem:[#allocation2 + $0x64] sm:$0xf] %vm1251_vm2, %v1789_v56 }
 0x388   : > { %v1797_v43 = vpop.permute.xlu1 %1796 }
 0x389   : > { %1832 = vst.msk [vmem:[#allocation2 + $0x74] sm:$0xf] %vm1251_vm2, %v1797_v43 }
 0x38b   : > { %v1978_v50 = vpop.permute.xlu2 %1977 }
 0x38c   : > { %2011 = vst.msk [vmem:[#allocation3 + $0x7c] sm:$0xf] %vm1251_vm2, %v1978_v50 }
 0x38e   : > { %v1777_v30 = vpop.permute.xlu0 %1776 }
 0x38f   : > { %1822 = vst.msk [vmem:[#allocation2 + $0x4c] sm:$0xf] %vm1251_vm2, %v1777_v30 }
 0x390   : > { %v1785_v52 = vpop.permute.xlu1 %1784 }
 0x391   : > { %1826 = vst.msk [vmem:[#allocation2 + $0x5c] sm:$0xf] %vm1251_vm2, %v1785_v52 }
 0x396   : > { %v1795_v21 = vpop.permute.xlu0 %1794 }
 0x397   : > { %1831 = vst.msk [vmem:[#allocation2 + $0x70] sm:$0xf] %vm1251_vm2, %v1795_v21 }
 0x398   : > { %v1976_v31 = vpop.permute.xlu1 %1975 }
 0x399   : > { %2010 = vst.msk [vmem:[#allocation3 + $0x78] sm:$0xf] %vm1251_vm2, %v1976_v31 }
 0x39e   : > { %v1783_v39 = vpop.permute.xlu0 %1782 }
 0x39f   : > { %1825 = vst.msk [vmem:[#allocation2 + $0x58] sm:$0xf] %vm1251_vm2, %v1783_v39 }
 0x3a6   : > { %v1801_v9 = vpop.permute.xlu0 %1800 }
 0x3a7   : > { %1834 = vst.msk [vmem:[#allocation2 + $0x7c] sm:$0xf] %vm1251_vm2, %v1801_v9 }
 0x3ae   : > { %v1974_v7 = vpop.permute.xlu0 %1973 }
 0x3af   : > { %2009 = vst.msk [vmem:[#allocation3 + $0x74] sm:$0xf] %vm1251_vm2, %v1974_v7 }
 0x3b0 PF: > { %v3632_v10 = vld [vmem:[%s4536_s18 + $0x8] sm:$0xff]   ;;  %v3625_v46 = vld [vmem:[%s4536_s18] sm:$0xff]   ;;  %v4271_v11 = vmov 128.0   ;;  %s5730_s18 = sld [smem:[#allocation42_spill]]  ;;  %s4272_s0 = smov 64   ;;  %vm2209_vm8 = vcmask 523264  }
 0x3b1   : > { %v3630_v22 = vunpack.c.l.bf16 %v3632_v10  ;;  %v3626_v40 = vunpack.c.l.bf16 %v3625_v46  ;;  %v3631_v42 = vunpack.c.h.bf16 %v3632_v10  ;;  %v3627_v47 = vunpack.c.h.bf16 %v3625_v46  ;;  %v3581_v2 = vld [vmem:[#allocation10 + $0x38] sm:$0xff]  ;;  %v3580_v23 = vld [vmem:[#allocation10 + $0x30] sm:$0xff]  ;;  %v3579_v5 = vld [vmem:[#allocation10 + $0x28] sm:$0xff]  ;;  %s5731_s3 = sld [smem:[#allocation47_spill]]  ;;  %s3544_s24 = sshll.u32 %s4245_s27, 2 }
 0x3b2   : > { %3877 = vrcp.f32 %v4271_v11  ;;  %2181 = vmatpush.bf16.msra.mxu0 %v3581_v2  ;;  %v3578_v54 = vld [vmem:[#allocation10 + $0x20] sm:$0xff]  ;;  %v3577_v27 = vld [vmem:[#allocation10 + $0x18] sm:$0xff]  ;;  %v3576_v62 = vld [vmem:[#allocation10 + $0x10] sm:$0xff]  ;;  %s5736_s28 = sld [smem:[#allocation49_spill]]  ;;  %s3064_s7 = sshll.u32 %s4563_s20, 4  ;;  %s3065_s7 = int_to_ptr.vmem [resolvable:$true] %s3064_s7 }
 0x3b3   : > { %2025 = vadd.xlane.f32.xlu1 %v3630_v22  ;;  %2021 = vadd.xlane.f32.xlu0 %v3626_v40  ;;  %v3575_v63 = vld [vmem:[#allocation10 + $0x8] sm:$0xff]  ;;  %v3574_v58 = vld [vmem:[#allocation10] sm:$0xff]  ;;  %s5737_s19 = sld [smem:[#allocation25_spill]] }
 0x3b4   : > { %s5738_s17 = sld [smem:[#allocation50_spill]] }
 0x3b6   : > { %2182 = vmatpush.bf16.msra.mxu0 %v3580_v23  ;;  %v3874_v11 = vld [vmem:[%s5730_s18] ss:$0 sm:$0xff]  ;;  %s3050_s18 = scalar_lea.sflag [#allocation7], %s4532_s29 }
 0x3b8   : > { %v3878_v16 = vpop.eup %3877 }
 0x3b9   : > { %v2030_v60 = vmul.f32 128.0, %v3878_v16  ;;  %vm2034_vm2 = vweird.f32 %v3878_v16  ;;  %s3545_s14 = sshll.u32 %s5737_s19, 3 }
 0x3ba   : > { %2183 = vmatpush.bf16.msra.mxu0 %v3579_v5  ;;  %s3061_s12 = sadd.s32 %s3545_s14, %s3544_s24  ;;  %s4143_s10 = scalar_lea.hbm %s5738_s17, 128 }
 0x3bb   : > { %2027 = vadd.xlane.f32.xlu1 %v3631_v42  ;;  %2023 = vadd.xlane.f32.xlu0 %v3627_v47  ;;  %v2031_v0 = vsub.f32 1.0, %v2030_v60  ;;  %s3546_s2 = sshll.u32 %s3061_s12, 3 }
 0x3bc   : > { %s3063_s21 = scalar_lea.hbm %s5738_s17, %s3546_s2 }
 0x3bd   : > { %v2032_v32 = vmul.f32 %v3878_v16, %v2031_v0  ;;  %s3066_s8 = sshll.u32 %s3063_s21, 4  ;;  %s3067_s8 = int_to_ptr.hbm [resolvable:$true] %s3066_s8 }
 0x3be   : > { %2184 = vmatpush.bf16.msra.mxu0 %v3578_v54 }
 0x3bf   : > { %v2033_v49 = vadd.f32 %v3878_v16, %v2032_v32 }
 0x3c1   : > { %v5392_v15 = vsel %vm2034_vm2, %v3878_v16, %v2033_v49 }
 0x3c2   : > { %2185 = vmatpush.bf16.msra.mxu0 %v3577_v27 }
 0x3c6   : > { %2186 = vmatpush.bf16.msra.mxu0 %v3576_v62 }
 0x3ca   : > { %2187 = vmatpush.bf16.msra.mxu0 %v3575_v63 }
 0x3ce   : > { %2188 = vmatpush.bf16.msra.mxu0 %v3574_v58 }
 0x426   : > { %v2026_v35 = vpop.xlane.xlu1 %2025  ;;  %v2022_v24 = vpop.xlane.xlu0 %2021 }
 0x427   : > { %v2038_v41 = vmul.f32 %v5392_v15, %v2026_v35  ;;  %v2036_v61 = vmul.f32 %v5392_v15, %v2022_v24 }
 0x429   : > { %v5396_v8 = vsub.f32 %v3630_v22, %v2038_v41  ;;  %v5398_v44 = vsub.f32 %v3626_v40, %v2036_v61 }
 0x42b   : > { %v2046_v59 = vmul.f32 %v5396_v8, %v5396_v8  ;;  %v2044_v25 = vmul.f32 %v5398_v44, %v5398_v44 }
 0x42d   : > { %2052 = vadd.xlane.f32.xlu0 %v2046_v59  ;;  %2048 = vadd.xlane.f32.xlu2 %v2044_v25 }
 0x42e   : > { %v2028_v18 = vpop.xlane.xlu1 %2027  ;;  %v2024_v29 = vpop.xlane.xlu0 %2023 }
 0x42f   : > { %v2039_v55 = vmul.f32 %v5392_v15, %v2028_v18  ;;  %v2037_v33 = vmul.f32 %v5392_v15, %v2024_v29 }
 0x431   : > { %v5406_v12 = vsub.f32 %v3631_v42, %v2039_v55  ;;  %v5408_v51 = vsub.f32 %v3627_v47, %v2037_v33 }
 0x433   : > { %v2047_v38 = vmul.f32 %v5406_v12, %v5406_v12  ;;  %v2045_v14 = vmul.f32 %v5408_v51, %v5408_v51 }
 0x435   : > { %2054 = vadd.xlane.f32.xlu1 %v2047_v38  ;;  %2050 = vadd.xlane.f32.xlu2 %v2045_v14 }
 0x4a0   : > { %v2049_v6 = vpop.xlane.xlu2 %2048  ;;  %v2053_v20 = vpop.xlane.xlu0 %2052 }
 0x4a1   : > { %v2056_v34 = vmul.f32 %v2049_v6, %v5392_v15  ;;  %v2058_v57 = vmul.f32 %v2053_v20, %v5392_v15 }
 0x4a3   : > { %v2060_v4 = vadd.f32 1e-05, %v2056_v34  ;;  %v2062_v13 = vadd.f32 1e-05, %v2058_v57 }
 0x4a5   : > { %3879 = vrsqrt.f32 %v2060_v4  ;;  %vm2070_vm12 = vweird.f32 %v2060_v4  ;;  %vm2090_vm4 = vweird.f32 %v2062_v13 }
 0x4a6   : > { %3881 = vrsqrt.f32 %v2062_v13 }
 0x4a8   : > { %v2055_v1 = vpop.xlane.xlu1 %2054  ;;  %v2051_v53 = vpop.xlane.xlu2 %2050 }
 0x4a9   : > { %v2059_v28 = vmul.f32 %v2055_v1, %v5392_v15  ;;  %v2057_v36 = vmul.f32 %v2051_v53, %v5392_v15  ;;  %v5457_v1 = vld [vmem:[%s5731_s3] ss:$0 sm:$0xff]  ;;  %v3589_v53 = vld [vmem:[#allocation2 + $0x38] sm:$0xff] }
 0x4ab   : > { %v3880_v26 = vpop.eup %3879  ;;  %v2063_v19 = vadd.f32 1e-05, %v2059_v28  ;;  %v2061_v17 = vadd.f32 1e-05, %v2057_v36  ;;  %v2363_v28 = vsel %vm2209_vm8, %v3589_v53, 0  ;;  %v3588_v36 = vld [vmem:[#allocation2 + $0x30] sm:$0xff] }
 0x4ac   : > { %v2065_v37 = vmul.f32 %v3880_v26, %v2060_v4  ;;  %v3882_v45 = vpop.eup %3881  ;;  %vm2071_vm11 = vweird.f32 %v3880_v26  ;;  %2365 = vmatpush.bf16.xpose.msra.mxu1 %v2363_v28 }
 0x4ad   : > { %3883 = vrsqrt.f32 %v2063_v19  ;;  %v2085_v31 = vmul.f32 %v3882_v45, %v2062_v13  ;;  %vm2072_vm13 = vmor %vm2070_vm12, %vm2071_vm11  ;;  %vm2080_vm15 = vweird.f32 %v2061_v17  ;;  %vm2100_vm0 = vweird.f32 %v2063_v19 }
 0x4ae   : > { %v2066_v48 = vmul.f32 %v3880_v26, %v2065_v37  ;;  %3885 = vrsqrt.f32 %v2061_v17  ;;  %vm2091_vm5 = vweird.f32 %v3882_v45 }
 0x4af   : > { %v2086_v10 = vmul.f32 %v3882_v45, %v2085_v31  ;;  %vm2092_vm7 = vmor %vm2090_vm4, %vm2091_vm5 }
 0x4b0   : > { %v2067_v3 = vmul.f32 0.5, %v2066_v48  ;;  %v3586_v48 = vld [vmem:[#allocation2 + $0x20] sm:$0xff] }
 0x4b1   : > { %v2087_v16 = vmul.f32 0.5, %v2086_v10  ;;  %v3582_v10 = vld [vmem:[#allocation2] sm:$0xff] }
 0x4b2   : > { %v2068_v43 = vsub.f32 1.5, %v2067_v3  ;;  %v2354_v3 = vsel %vm2209_vm8, %v3586_v48, 0 }
 0x4b3   : > { %v3884_v56 = vpop.eup %3883  ;;  %v2088_v24 = vsub.f32 1.5, %v2087_v16 }
 0x4b4   : > { %v3886_v50 = vpop.eup %3885  ;;  %v2095_v30 = vmul.f32 %v3884_v56, %v2063_v19  ;;  %v2069_v21 = vmul.f32 %v3880_v26, %v2068_v43  ;;  %vm2101_vm3 = vweird.f32 %v3884_v56  ;;  %v3584_v43 = vld [vmem:[#allocation2 + $0x10] sm:$0xff] }
 0x4b5   : > { %v2075_v52 = vmul.f32 %v3886_v50, %v2061_v17  ;;  %vm2081_vm14 = vweird.f32 %v3886_v50  ;;  %vm2102_vm6 = vmor %vm2100_vm0, %vm2101_vm3  ;;  %v3587_v17 = vld [vmem:[#allocation2 + $0x28] sm:$0xff] }
 0x4b6   : > { %v2096_v9 = vmul.f32 %v3884_v56, %v2095_v30  ;;  %v2073_v22 = vsel %vm2072_vm13, %v3880_v26, %v2069_v21  ;;  %vm2082_vm1 = vmor %vm2080_vm15, %vm2081_vm14  ;;  %v2360_v26 = vsel %vm2209_vm8, %v3588_v36, 0  ;;  %v2357_v37 = vsel %vm2209_vm8, %v3587_v17, 0  ;;  %v3583_v21 = vld [vmem:[#allocation2 + $0x8] sm:$0xff] }
 0x4b7   : > { %v2076_v39 = vmul.f32 %v3886_v50, %v2075_v52  ;;  %v2104_v47 = vmul.f32 %v2073_v22, %v5398_v44  ;;  %v2089_v44 = vmul.f32 %v3882_v45, %v2088_v24  ;;  %2366 = vmatpush.bf16.xpose.msra.mxu1 %v2360_v26  ;;  %v2348_v30 = vsel %vm2209_vm8, %v3584_v43, 0 }
 0x4b8   : > { %v2097_v40 = vmul.f32 0.5, %v2096_v9  ;;  %v2345_v31 = vsel %vm2209_vm8, %v3583_v21, 0  ;;  %v2342_v22 = vsel %vm2209_vm8, %v3582_v10, 0 }
 0x4b9   : > { %v2077_v7 = vmul.f32 0.5, %v2076_v39  ;;  %v2111_v49 = vmul.f32 %v3874_v11, %v2104_v47  ;;  %v2093_v25 = vsel %vm2092_vm7, %v3882_v45, %v2089_v44  ;;  %v3585_v45 = vld [vmem:[#allocation2 + $0x18] sm:$0xff] }
 0x4ba   : > { %v2098_v32 = vsub.f32 1.5, %v2097_v40  ;;  %v2106_v29 = vmul.f32 %v2093_v25, %v5396_v8 }
 0x4bb   : > { %v2078_v46 = vsub.f32 1.5, %v2077_v7 }
 0x4bc   : > { %v2099_v61 = vmul.f32 %v3884_v56, %v2098_v32  ;;  %v2113_v33 = vmul.f32 %v3874_v11, %v2106_v29 }
 0x4bd   : > { %v2079_v42 = vmul.f32 %v3886_v50, %v2078_v46 }
 0x4be   : > { %v2103_v59 = vsel %vm2102_vm6, %v3884_v56, %v2099_v61  ;;  %v2351_v56 = vsel %vm2209_vm8, %v3585_v45, 0 }
 0x4bf   : > { %v2083_v60 = vsel %vm2082_vm1, %v3886_v50, %v2079_v42  ;;  %v2107_v18 = vmul.f32 %v2103_v59, %v5406_v12  ;;  %2367 = vmatpush.bf16.xpose.msra.mxu1 %v2357_v37 }
 0x4c0   : > { %v2105_v0 = vmul.f32 %v2083_v60, %v5408_v51 }
 0x4c1   : > { %v2114_v55 = vmul.f32 %v3874_v11, %v2107_v18 }
 0x4c2   : > { %v2112_v35 = vmul.f32 %v3874_v11, %v2105_v0 }
 0x4c3   : > { %v2116_v51 = vpack.c.bf16 %v2114_v55, %v2113_v33 }
 0x4c4   : > { %v2115_v41 = vpack.c.bf16 %v2112_v35, %v2111_v49 }
 0x4c6   : > { %2189 = vmatmul.bf16.vlgmr.msra.gmra.mxu0 %v2115_v41 }
 0x4c7   : > { %2368 = vmatpush.bf16.xpose.msra.mxu1 %v2354_v3 }
 0x4cf   : > { %2369 = vmatpush.bf16.xpose.msra.mxu1 %v2351_v56 }
 0x4d6   : > { %2194 = vmatmul.bf16.gmra.mxu0 %v2116_v51 }
 0x4d7   : > { %2370 = vmatpush.bf16.xpose.msra.mxu1 %v2348_v30 }
 0x4df   : > { %2371 = vmatpush.bf16.xpose.msra.mxu1 %v2345_v31 }
 0x4e7   : > { %2372 = vmatpush.bf16.xpose.msra.mxu1 %v2342_v22 }
 0x543   : > { %v5425_v38 = vpop.f32.mrf.mxu0 }
 0x544   : > { %v2205_v14 = vmul.f32 %v5425_v38, %v5425_v38 }
 0x546   : > { %2518 = vrot.lane.b32.xlu2 %v2205_v14, %s4272_s0  ;;  %v2210_v34 = vsel %vm2209_vm8, %v2205_v14, 0.0 }
 0x54b   : > { %v5430_v2 = vpop.f32.mrf.mxu0 }
 0x54c   : > { %v2206_v23 = vmul.f32 %v5430_v2, %v5430_v2 }
 0x54e   : > { %2520 = vrot.lane.b32.xlu0 %v2206_v23, %s4272_s0  ;;  %v2213_v13 = vsel %vm2209_vm8, %v2206_v23, 0.0 }
 0x553   : > { %v5435_v8 = vpop.f32.mrf.mxu0 }
 0x554   : > { %v2207_v12 = vmul.f32 %v5435_v8, %v5435_v8 }
 0x556   : > { %2522 = vrot.lane.b32.xlu1 %v2207_v12, %s4272_s0  ;;  %v2216_v19 = vsel %vm2209_vm8, %v2207_v12, 0.0 }
 0x55b   : > { %v5440_v5 = vpop.f32.mrf.mxu0 }
 0x55c   : > { %v5444_v54 = vmul.f32 %v5440_v5, %v5440_v5 }
 0x55e   : > { %2524 = vrot.lane.b32.xlu2 %v5444_v54, %s4272_s0 }
 0x5a0   : > { %v2519_v27 = vpop.permute.xlu2 %2518 }
 0x5a1   : > { %v2530_v62 = vsel %vm2209_vm8, %v2519_v27, 0.0 }
 0x5a2   : > { %2531 = vadd.xlane.f32.xlu0 %v2530_v62 }
 0x5b8   : > { %v2525_v63 = vpop.permute.xlu2 %2524 }
 0x5b9   : > { %v2539_v58 = vsel %vm2209_vm8, %v2525_v63, 0.0 }
 0x5ba   : > { %2540 = vadd.xlane.f32.xlu0 %v2539_v58 }
 0x5c0   : > { %v2521_v6 = vpop.permute.xlu0 %2520 }
 0x5c1   : > { %v2533_v20 = vsel %vm2209_vm8, %v2521_v6, 0.0 }
 0x5c2   : > { %2211 = vadd.xlane.f32.xlu0 %v2210_v34  ;;  %2534 = vadd.xlane.f32.xlu2 %v2533_v20 }
 0x5c8   : > { %v2523_v4 = vpop.permute.xlu1 %2522 }
 0x5c9   : > { %v2536_v57 = vsel %vm2209_vm8, %v2523_v4, 0.0 }
 0x5ca   : > { %2537 = vadd.xlane.f32.xlu1 %v2536_v57  ;;  %2214 = vadd.xlane.f32.xlu0 %v2213_v13 }
 0x5da   : > { %2590 = vrot.lane.b32.xlu2 %v5457_v1, %s4272_s0 }
 0x603   : > { %2217 = vadd.xlane.f32.xlu2 %v2216_v19 }
 0x615   : > { %v2532_v50 = vpop.xlane.xlu0 %2531 }
 0x616   : > { %v2542_v52 = vmax.f32 %v2532_v50, 1e-24 }
 0x618   : > { %3887 = vrsqrt.f32 %v2542_v52  ;;  %vm2552_vm10 = vweird.f32 %v2542_v52 }
 0x61e   : > { %v3888_v9 = vpop.eup %3887 }
 0x61f   : > { %v2547_v46 = vmul.f32 %v3888_v9, %v2542_v52  ;;  %vm2553_vm9 = vweird.f32 %v3888_v9 }
 0x620   : > { %vm2554_vm2 = vmor %vm2552_vm10, %vm2553_vm9 }
 0x621   : > { %v2548_v40 = vmul.f32 %v3888_v9, %v2547_v46 }
 0x623   : > { %v2549_v0 = vmul.f32 0.5, %v2548_v40 }
 0x625   : > { %v2550_v49 = vsub.f32 1.5, %v2549_v0 }
 0x627   : > { %v2551_v55 = vmul.f32 %v3888_v9, %v2550_v49 }
 0x629   : > { %v2555_v27 = vsel %vm2554_vm2, %v3888_v9, %v2551_v55  ;;  %v3600_v55 = vld [vmem:[#allocation2 + $0x50] sm:$0xff] }
 0x62a   : > { %v2586_v57 = vmul.f32 %v2555_v27, %v5425_v38 }
 0x62d   : > { %v2541_v39 = vpop.xlane.xlu0 %2540 }
 0x62e   : > { %v2545_v7 = vmax.f32 %v2541_v39, 1e-24 }
 0x630   : > { %3889 = vrsqrt.f32 %v2545_v7  ;;  %vm2582_vm1 = vweird.f32 %v2545_v7 }
 0x635   : > { %v2535_v42 = vpop.xlane.xlu2 %2534  ;;  %v2212_v47 = vpop.xlane.xlu0 %2211 }
 0x636   : > { %v5470_v11 = vpop.eup %3889  ;;  %v2543_v16 = vmax.f32 %v2535_v42, 1e-24  ;;  %v2222_v60 = vmax.f32 %v2212_v47, 1e-24 }
 0x637   : > { %v2577_v32 = vmul.f32 %v5470_v11, %v2545_v7  ;;  %vm2583_vm14 = vweird.f32 %v5470_v11 }
 0x638   : > { %3891 = vrsqrt.f32 %v2543_v16  ;;  %vm2562_vm12 = vweird.f32 %v2543_v16  ;;  %vm5478_vm0 = vmor %vm2582_vm1, %vm2583_vm14  ;;  %vm2232_vm3 = vweird.f32 %v2222_v60 }
 0x639   : > { %3893 = vrsqrt.f32 %v2222_v60  ;;  %v2578_v35 = vmul.f32 %v5470_v11, %v2577_v32 }
 0x63b   : > { %v2579_v33 = vmul.f32 0.5, %v2578_v35  ;;  %v3605_v35 = vld [vmem:[#allocation2 + $0x78] sm:$0xff] }
 0x63d   : > { %v2538_v24 = vpop.xlane.xlu1 %2537  ;;  %v2215_v44 = vpop.xlane.xlu0 %2214  ;;  %v2580_v62 = vsub.f32 1.5, %v2579_v33  ;;  %v2675_v33 = vsel %vm2209_vm8, %v3600_v55, 0  ;;  %v3593_v55 = vld [vmem:[#allocation3 + $0x18] sm:$0xff] }
 0x63e   : > { %v3892_v41 = vpop.eup %3891  ;;  %v2544_v61 = vmax.f32 %v2538_v24, 1e-24  ;;  %v2223_v18 = vmax.f32 %v2215_v44, 1e-24  ;;  %v2591_v26 = vpop.permute.xlu2 %2590  ;;  %v3604_v24 = vld [vmem:[#allocation2 + $0x70] sm:$0xff]  ;;  %v3602_v44 = vld [vmem:[#allocation2 + $0x60] sm:$0xff] }
 0x63f   : > { %v3894_v59 = vpop.eup %3893  ;;  %v2557_v25 = vmul.f32 %v3892_v41, %v2543_v16  ;;  %vm2563_vm11 = vweird.f32 %v3892_v41  ;;  %v2581_v53 = vmul.f32 %v5470_v11, %v2580_v62  ;;  %v2593_v45 = vmul.f32 %v2591_v26, %v2586_v57 }
 0x640   : > { %v2227_v29 = vmul.f32 %v3894_v59, %v2222_v60  ;;  %3895 = vrsqrt.f32 %v2544_v61  ;;  %vm2564_vm13 = vmor %vm2562_vm12, %vm2563_vm11  ;;  %vm2233_vm15 = vweird.f32 %v3894_v59  ;;  %vm2572_vm7 = vweird.f32 %v2544_v61 }
 0x641   : > { %v2558_v51 = vmul.f32 %v3892_v41, %v2557_v25  ;;  %3897 = vrsqrt.f32 %v2223_v18  ;;  %v2585_v50 = vsel %vm5478_vm0, %v5470_v11, %v2581_v53  ;;  %vm5485_vm4 = vmor %vm2232_vm3, %vm2233_vm15  ;;  %vm2242_vm10 = vweird.f32 %v2223_v18 }
 0x642   : > { %v2228_v14 = vmul.f32 %v3894_v59, %v2227_v29  ;;  %v2589_v7 = vmul.f32 %v2585_v50, %v5440_v5  ;;  %v2681_v25 = vsel %vm2209_vm8, %v3602_v44, 0  ;;  %v3607_v44 = vld [vmem:[#allocation3 + $0x48] sm:$0xff]  ;;  %vm2853_vm3 = vcmask 1043968  }
 0x643   : > { %v2559_v23 = vmul.f32 0.5, %v2558_v51  ;;  %v3599_v51 = vld [vmem:[#allocation2 + $0x48] sm:$0xff] }
 0x644   : > { %v2229_v12 = vmul.f32 0.5, %v2228_v14  ;;  %v2596_v16 = vmul.f32 %v2591_v26, %v2589_v7  ;;  %v2672_v14 = vsel %vm2209_vm8, %v3599_v51, 0 }
 0x645   : > { %v2560_v63 = vsub.f32 1.5, %v2559_v23  ;;  %v3598_v23 = vld [vmem:[#allocation2 + $0x40] sm:$0xff] }
 0x646   : > { %v3896_v58 = vpop.eup %3895  ;;  %v2230_v6 = vsub.f32 1.5, %v2229_v12  ;;  %v2669_v12 = vsel %vm2209_vm8, %v3598_v23, 0 }
 0x647   : > { %v3898_v34 = vpop.eup %3897  ;;  %v2561_v20 = vmul.f32 %v3892_v41, %v2560_v63  ;;  %v2567_v4 = vmul.f32 %v3896_v58, %v2544_v61  ;;  %vm2573_vm5 = vweird.f32 %v3896_v58 }
 0x648   : > { %v2237_v13 = vmul.f32 %v3898_v34, %v2223_v18  ;;  %v2231_v19 = vmul.f32 %v3894_v59, %v2230_v6  ;;  %vm2243_vm6 = vweird.f32 %v3898_v34  ;;  %vm2574_vm9 = vmor %vm2572_vm7, %vm2573_vm5  ;;  %v3601_v18 = vld [vmem:[#allocation2 + $0x58] sm:$0xff] }
 0x649   : > { %v2565_v28 = vsel %vm2564_vm13, %v3892_v41, %v2561_v20  ;;  %v2568_v36 = vmul.f32 %v3896_v58, %v2567_v4  ;;  %vm2244_vm2 = vmor %vm2242_vm10, %vm2243_vm6  ;;  %v2687_v41 = vsel %vm2209_vm8, %v3604_v24, 0  ;;  %v2678_v29 = vsel %vm2209_vm8, %v3601_v18, 0  ;;  %v3610_v24 = vld [vmem:[#allocation3 + $0x60] sm:$0xff]  ;;  %v3595_v18 = vld [vmem:[#allocation3 + $0x28] sm:$0xff] }
 0x64a   : > { %v2587_v17 = vmul.f32 %v2565_v28, %v5430_v2  ;;  %v2238_v37 = vmul.f32 %v3898_v34, %v2237_v13  ;;  %v2235_v21 = vsel %vm5485_vm4, %v3894_v59, %v2231_v19  ;;  %v2219_v59 = vsel %vm2209_vm8, %v5444_v54, 0.0 }
 0x64b   : > { %v2569_v48 = vmul.f32 0.5, %v2568_v36  ;;  %v2266_v22 = vmul.f32 %v2235_v21, %v5425_v38  ;;  %v2690_v38 = vsel %vm2209_vm8, %v3605_v35, 0 }
 0x64c   : > { %v2594_v56 = vmul.f32 %v2591_v26, %v2587_v17  ;;  %v2239_v43 = vmul.f32 0.5, %v2238_v37  ;;  %2692 = vmatpush.bf16.xpose.msra.mxu3 %v2690_v38 }
 0x64d   : > { %v2570_v52 = vsub.f32 1.5, %v2569_v48  ;;  %v2273_v60 = vmul.f32 %v5457_v1, %v2266_v22 }
 0x64e   : > { %v2240_v31 = vsub.f32 1.5, %v2239_v43  ;;  %v2597_v39 = vpack.c.bf16 %v2594_v56, %v2593_v45 }
 0x64f   : > { %v2571_v9 = vmul.f32 %v3896_v58, %v2570_v52  ;;  %v2200_v52 = vlaneseq }
 0x650   : > { %v2241_v10 = vmul.f32 %v3898_v34, %v2240_v31  ;;  %2618 = vrot.lane.b32.xlu1 %v2597_v39, %s4272_s0  ;;  %v4273_v31 = vmov 0.0  }
 0x651   : > { %v2575_v46 = vsel %vm2574_vm9, %v3896_v58, %v2571_v9  ;;  %v2201_v21 = vand.u32 127, %v2200_v52 }
 0x652   : > { %v2588_v40 = vmul.f32 %v2575_v46, %v5435_v8  ;;  %v2245_v42 = vsel %vm2244_vm2, %v3898_v34, %v2241_v10 }
 0x653   : > { %v2267_v47 = vmul.f32 %v2245_v42, %v5430_v2  ;;  %v3603_v2 = vld [vmem:[#allocation2 + $0x68] sm:$0xff]  ;;  %vm2202_vm0 = vcmp.gt.s32.totalorder %v2201_v21, 8 }
 0x654   : > { %v2595_v11 = vmul.f32 %v2591_v26, %v2588_v40  ;;  %2693 = vmatpush.bf16.xpose.msra.mxu3 %v2687_v41  ;;  %v2684_v61 = vsel %vm2209_vm8, %v3603_v2, 0  ;;  %v2203_v39 = vsel %vm2202_vm0, -1e+30, %v4273_v31  ;;  %v3609_v41 = vld [vmem:[#allocation3 + $0x58] sm:$0xff]  ;;  %v3608_v2 = vld [vmem:[#allocation3 + $0x50] sm:$0xff] }
 0x655   : > { %v2274_v0 = vmul.f32 %v5457_v1, %v2267_v47 }
 0x656   : > { %v2598_v32 = vpack.c.bf16 %v2596_v16, %v2595_v11  ;;  %v3613_v16 = vld [vmem:[#allocation3 + $0x78] sm:$0xff] }
 0x657   : > { %v2277_v49 = vpack.c.bf16 %v2274_v0, %v2273_v60  ;;  %2806 = vmatpush.bf16.msrb.mxu0 %v3613_v16  ;;  %v3612_v60 = vld [vmem:[#allocation3 + $0x70] sm:$0xff]  ;;  %v3611_v0 = vld [vmem:[#allocation3 + $0x68] sm:$0xff] }
 0x658   : > { %2620 = vrot.lane.b32.xlu0 %v2598_v32, %s4272_s0 }
 0x659   : > { %3403 = vmatmul.msk.bf16.vlgmr.msra.gmra.mxu1 %vm2209_vm8, %v2277_v49 }
 0x65b   : > { %2807 = vmatpush.bf16.msrb.mxu0 %v3612_v60 }
 0x65c   : > { %2694 = vmatpush.bf16.xpose.msra.mxu3 %v2684_v61  ;;  %v3597_v61 = vld [vmem:[#allocation3 + $0x38] sm:$0xff] }
 0x65d   : > { %2478 = vmatpush.bf16.msra.mxu2 %v3597_v61 }
 0x65f   : > { %2808 = vmatpush.bf16.msrb.mxu0 %v3611_v0 }
 0x663   : > { %2809 = vmatpush.bf16.msrb.mxu0 %v3610_v24 }
 0x664   : > { %2695 = vmatpush.bf16.xpose.msra.mxu3 %v2681_v25  ;;  %v3606_v25 = vld [vmem:[#allocation3 + $0x40] sm:$0xff] }
 0x667   : > { %2810 = vmatpush.bf16.msrb.mxu0 %v3609_v41 }
 0x66b   : > { %2811 = vmatpush.bf16.msrb.mxu0 %v3608_v2 }
 0x66c   : > { %2696 = vmatpush.bf16.xpose.msra.mxu3 %v2678_v29  ;;  %v3594_v29 = vld [vmem:[#allocation3 + $0x20] sm:$0xff] }
 0x66f   : > { %2812 = vmatpush.bf16.msrb.mxu0 %v3607_v44 }
 0x673   : > { %2813 = vmatpush.bf16.msrb.mxu0 %v3606_v25 }
 0x674   : > { %2697 = vmatpush.bf16.xpose.msra.mxu3 %v2675_v33 }
 0x676   : > { %v2218_v62 = vpop.xlane.xlu2 %2217 }
 0x677   : > { %v2224_v63 = vmax.f32 %v2218_v62, 1e-24 }
 0x679   : > { %3899 = vrsqrt.f32 %v2224_v63  ;;  %vm2252_vm12 = vweird.f32 %v2224_v63 }
 0x67a   : > { %2220 = vadd.xlane.f32.xlu1 %v2219_v59  ;;  %v3596_v59 = vld [vmem:[#allocation3 + $0x30] sm:$0xff] }
 0x67b   : > { %2479 = vmatpush.bf16.msra.mxu2 %v3596_v59 }
 0x67c   : > { %2698 = vmatpush.bf16.xpose.msra.mxu3 %v2672_v14  ;;  %v3592_v14 = vld [vmem:[#allocation3 + $0x10] sm:$0xff] }
 0x67f   : > { %v3900_v58 = vpop.eup %3899  ;;  %2480 = vmatpush.bf16.msra.mxu2 %v3595_v18 }
 0x680   : > { %v2247_v6 = vmul.f32 %v3900_v58, %v2224_v63  ;;  %vm2253_vm11 = vweird.f32 %v3900_v58 }
 0x681   : > { %vm2254_vm13 = vmor %vm2252_vm12, %vm2253_vm11 }
 0x682   : > { %v2248_v34 = vmul.f32 %v3900_v58, %v2247_v6 }
 0x683   : > { %2481 = vmatpush.bf16.msra.mxu2 %v3594_v29 }
 0x684   : > { %2699 = vmatpush.bf16.xpose.msra.mxu3 %v2669_v12  ;;  %v2249_v57 = vmul.f32 0.5, %v2248_v34  ;;  %v3591_v12 = vld [vmem:[#allocation3 + $0x8] sm:$0xff] }
 0x686   : > { %v2250_v13 = vsub.f32 1.5, %v2249_v57 }
 0x687   : > { %2482 = vmatpush.bf16.msra.mxu2 %v3593_v55 }
 0x688   : > { %v2251_v36 = vmul.f32 %v3900_v58, %v2250_v13 }
 0x68a   : > { %v2255_v17 = vsel %vm2254_vm13, %v3900_v58, %v2251_v36 }
 0x68b   : > { %v2268_v3 = vmul.f32 %v2255_v17, %v5435_v8  ;;  %2483 = vmatpush.bf16.msra.mxu2 %v3592_v14 }
 0x68d   : > { %v2275_v43 = vmul.f32 %v5457_v1, %v2268_v3 }
 0x68f   : > { %2484 = vmatpush.bf16.msra.mxu2 %v3591_v12 }
 0x6c2   : > { %v2619_v54 = vpop.permute.xlu1 %2618 }
 0x6c3   : > { %3469 = vmatmul.msk.bf16.vlgmr.msra.gmra.mxu3 %vm2209_vm8, %v2619_v54 }
 0x6ca   : > { %v2621_v27 = vpop.permute.xlu0 %2620 }
 0x6d3   : > { %3470 = vmatmul.msk.bf16.gmra.mxu3 %vm2209_vm8, %v2621_v27  ;;  %v3590_v27 = vld [vmem:[#allocation3] sm:$0xff] }
 0x6d4   : > { %2485 = vmatpush.bf16.msra.mxu2 %v3590_v27 }
 0x6ed   : > { %v2221_v20 = vpop.xlane.xlu1 %2220 }
 0x6ee   : > { %v2225_v4 = vmax.f32 %v2221_v20, 1e-24 }
 0x6f0   : > { %3901 = vrsqrt.f32 %v2225_v4  ;;  %vm2262_vm15 = vweird.f32 %v2225_v4 }
 0x6f6   : > { %v3902_v53 = vpop.eup %3901 }
 0x6f7   : > { %v2257_v28 = vmul.f32 %v3902_v53, %v2225_v4  ;;  %vm2263_vm14 = vweird.f32 %v3902_v53 }
 0x6f8   : > { %vm2264_vm1 = vmor %vm2262_vm15, %vm2263_vm14 }
 0x6f9   : > { %v2258_v26 = vmul.f32 %v3902_v53, %v2257_v28 }
 0x6fb   : > { %v2259_v19 = vmul.f32 0.5, %v2258_v26 }
 0x6fd   : > { %v2260_v37 = vsub.f32 1.5, %v2259_v19 }
 0x6ff   : > { %v2261_v48 = vmul.f32 %v3902_v53, %v2260_v37 }
 0x701   : > { %v2265_v45 = vsel %vm2264_vm1, %v3902_v53, %v2261_v48 }
 0x702   : > { %v2269_v56 = vmul.f32 %v2265_v45, %v5440_v5 }
 0x704   : > { %v2276_v50 = vmul.f32 %v5457_v1, %v2269_v56  ;;  %v2374_v1 = vpop.f32.mrf.mxu1 }
 0x705   : > { %v5520_v40 = vadd.f32 %v2374_v1, %v2203_v39 }
 0x706   : > { %v2278_v30 = vpack.c.bf16 %v2276_v50, %v2275_v43 }
 0x708   : > { %3404 = vmatmul.msk.bf16.gmra.mxu1 %vm2209_vm8, %v2278_v30  ;;  %vm2509_vm8 = vcmask 519168  }
 0x70c   : > { %v2376_v47 = vpop.f32.mrf.mxu1 }
 0x70d   : > { %v5526_v11 = vadd.f32 %v2376_v47, %v2203_v39 }
 0x746   : > { %v2701_v9 = vpop.f32.mrf.mxu3 }
 0x747   : > { %v2702_v7 = vadd.f32 %v2701_v9, %v2203_v39 }
 0x749   : > { %2711 = vmax.xlane.f32.xlu0 %v2702_v7 }
 0x74e   : > { %v2703_v10 = vpop.f32.mrf.mxu3 }
 0x74f   : > { %v2704_v8 = vadd.f32 %v2703_v10, %v2203_v39 }
 0x751   : > { %2713 = vmax.xlane.f32.xlu2 %v2704_v8 }
 0x756   : > { %v2706_v46 = vpop.f32.mrf.mxu3 }
 0x757   : > { %v5517_v5 = vadd.f32 %v2706_v46, %v2203_v39 }
 0x759   : > { %2715 = vmax.xlane.f32.xlu1 %v5517_v5 }
 0x75e   : > { %v2708_v22 = vpop.f32.mrf.mxu3 }
 0x75f   : > { %v5522_v42 = vadd.f32 %v2708_v22, %v2203_v39 }
 0x761   : > { %2717 = vmax.xlane.f32.xlu2 %v5522_v42  ;;  %2384 = vmax.xlane.f32.xlu1 %v5520_v40 }
 0x769   : > { %2386 = vmax.xlane.f32.xlu2 %v5526_v11 }
 0x785   : > { %v2379_v32 = vpop.f32.mrf.mxu1 }
 0x786   : > { %v5529_v49 = vadd.f32 %v2379_v32, %v2203_v39 }
 0x788   : > { %2388 = vmax.xlane.f32.xlu0 %v5529_v49 }
 0x78d   : > { %v2381_v35 = vpop.f32.mrf.mxu1 }
 0x78e   : > { %v5532_v38 = vadd.f32 %v2381_v35, %v2203_v39 }
 0x790   : > { %2390 = vmax.xlane.f32.xlu1 %v5532_v38 }
 0x7bc   : > { %v2712_v33 = vpop.xlane.xlu0 %2711 }
 0x7bd   : > { %v2719_v51 = vsub.f32 %v2702_v7, %v2712_v33 }
 0x7bf   : > { %v2723_v23 = vmul.f32 1.442695, %v2719_v51 }
 0x7c1   : > { %3903 = vpow2.f32 %v2723_v23 }
 0x7c4   : > { %v2714_v54 = vpop.xlane.xlu2 %2713 }
 0x7c5   : > { %v2720_v62 = vsub.f32 %v2704_v8, %v2714_v54 }
 0x7c7   : > { %v3904_v63 = vpop.eup %3903  ;;  %v2725_v58 = vmul.f32 1.442695, %v2720_v62  ;;  %v3623_v62 = vld [vmem:[#allocation14 + $0x38] sm:$0xff] }
 0x7c8   : > { %2731 = vadd.xlane.f32.xlu2 %v3904_v63  ;;  %2938 = vmatpush.bf16.msrb.mxu2 %v3623_v62 }
 0x7c9   : > { %3905 = vpow2.f32 %v2725_v58 }
 0x7cc   : > { %v2716_v6 = vpop.xlane.xlu1 %2715 }
 0x7cd   : > { %v2721_v20 = vsub.f32 %v5517_v5, %v2716_v6 }
 0x7cf   : > { %v3906_v34 = vpop.eup %3905  ;;  %v2727_v57 = vmul.f32 1.442695, %v2721_v20 }
 0x7d0   : > { %2733 = vadd.xlane.f32.xlu0 %v3906_v34  ;;  %v2739_v4 = vpack.c.bf16 %v3906_v34, %v3904_v63  ;;  %v3622_v63 = vld [vmem:[#allocation14 + $0x30] sm:$0xff] }
 0x7d1   : > { %3907 = vpow2.f32 %v2727_v57  ;;  %2939 = vmatpush.bf16.msrb.mxu2 %v3622_v63 }
 0x7d2   : > { %2814 = vmatmul.bf16.vlgmr.msrb.gmra.mxu0 %v2739_v4  ;;  %v3621_v4 = vld [vmem:[#allocation14 + $0x28] sm:$0xff] }
 0x7d4   : > { %v2718_v13 = vpop.xlane.xlu2 %2717  ;;  %v2385_v53 = vpop.xlane.xlu1 %2384 }
 0x7d5   : > { %v2722_v28 = vsub.f32 %v5522_v42, %v2718_v13  ;;  %v2392_v36 = vsub.f32 %v5520_v40, %v2385_v53  ;;  %2940 = vmatpush.bf16.msrb.mxu2 %v3621_v4  ;;  %v3620_v13 = vld [vmem:[#allocation14 + $0x20] sm:$0xff] }
 0x7d7   : > { %v2729_v26 = vmul.f32 1.442695, %v2722_v28  ;;  %v2396_v19 = vmul.f32 1.442695, %v2392_v36  ;;  %v3908_v48 = vpop.eup %3907 }
 0x7d9   : > { %3909 = vpow2.f32 %v2729_v26  ;;  %2941 = vmatpush.bf16.msrb.mxu2 %v3620_v13  ;;  %v3619_v26 = vld [vmem:[#allocation14 + $0x18] sm:$0xff] }
 0x7da   : > { %3911 = vpow2.f32 %v2396_v19 }
 0x7dc   : > { %v2387_v17 = vpop.xlane.xlu2 %2386 }
 0x7dd   : > { %v2393_v37 = vsub.f32 %v5526_v11, %v2387_v17  ;;  %2942 = vmatpush.bf16.msrb.mxu2 %v3619_v26  ;;  %v3618_v17 = vld [vmem:[#allocation14 + $0x10] sm:$0xff] }
 0x7df   : > { %v3910_v3 = vpop.eup %3909  ;;  %v2398_v45 = vmul.f32 1.442695, %v2393_v37 }
 0x7e0   : > { %v3912_v56 = vpop.eup %3911  ;;  %2737 = vadd.xlane.f32.xlu2 %v3910_v3  ;;  %v2740_v43 = vpack.c.bf16 %v3910_v3, %v3908_v48  ;;  %v3616_v3 = vld [vmem:[#allocation14] sm:$0xff] }
 0x7e1   : > { %3913 = vpow2.f32 %v2398_v45  ;;  %2404 = vadd.xlane.f32.xlu0 %v3912_v56  ;;  %2943 = vmatpush.bf16.msrb.mxu2 %v3618_v17 }
 0x7e2   : > { %2819 = vmatmul.bf16.gmra.mxu0 %v2740_v43 }
 0x7e7   : > { %v3914_v50 = vpop.eup %3913 }
 0x7e8   : > { %2406 = vadd.xlane.f32.xlu1 %v3914_v50  ;;  %v2412_v30 = vpack.c.bf16 %v3914_v50, %v3912_v56 }
 0x7ea   : > { %2486 = vmatmul.bf16.vlgmr.msra.gmra.mxu2 %v2412_v30 }
 0x7f0   : > { %2735 = vadd.xlane.f32.xlu1 %v3908_v48  ;;  %v3617_v48 = vld [vmem:[#allocation14 + $0x8] sm:$0xff] }
 0x7f1   : > { %2944 = vmatpush.bf16.msrb.mxu2 %v3617_v48 }
 0x7f5   : > { %2945 = vmatpush.bf16.msrb.mxu2 %v3616_v3 }
 0x7fb   : > { %v2389_v52 = vpop.xlane.xlu0 %2388 }
 0x7fc   : > { %v2394_v21 = vsub.f32 %v5529_v49, %v2389_v52 }
 0x7fe   : > { %v2400_v31 = vmul.f32 1.442695, %v2394_v21 }
 0x800   : > { %3915 = vpow2.f32 %v2400_v31 }
 0x803   : > { %v2391_v39 = vpop.xlane.xlu1 %2390 }
 0x804   : > { %v2395_v9 = vsub.f32 %v5532_v38, %v2391_v39 }
 0x806   : > { %v3916_v7 = vpop.eup %3915  ;;  %v2402_v10 = vmul.f32 1.442695, %v2395_v9 }
 0x807   : > { %2408 = vadd.xlane.f32.xlu1 %v3916_v7 }
 0x808   : > { %3917 = vpow2.f32 %v2402_v10 }
 0x80e   : > { %v3918_v8 = vpop.eup %3917 }
 0x80f   : > { %2410 = vadd.xlane.f32.xlu1 %v3918_v8  ;;  %v2413_v46 = vpack.c.bf16 %v3918_v8, %v3916_v7 }
 0x811   : > { %2491 = vmatmul.bf16.gmra.mxu2 %v2413_v46 }
 0x83b   : > { %v2732_v5 = vpop.xlane.xlu2 %2731 }
 0x83c   : > { %3919 = vrcp.f32 %v2732_v5 }
 0x842   : > { %v3920_v22 = vpop.eup %3919 }
 0x843   : > { %v2734_v1 = vpop.xlane.xlu0 %2733 }
 0x844   : > { %3921 = vrcp.f32 %v2734_v1 }
 0x84a   : > { %v3922_v11 = vpop.eup %3921 }
 0x84f   : > { %v2815_v40 = vpop.f32.mrf.mxu0 }
 0x850   : > { %v2829_v42 = vmul.f32 %v3920_v22, %v2815_v40 }
 0x852   : > { %v2833_v47 = vpack.c.bf16 %v2829_v42, %v2829_v42 }
 0x853   : > { %v2738_v49 = vpop.xlane.xlu2 %2737 }
 0x854   : > { %2841 = vrot.lane.b32.xlu2 %v2833_v47, %s4272_s0  ;;  %3923 = vrcp.f32 %v2738_v49  ;;  %v2405_v24 = vpop.xlane.xlu0 %2404 }
 0x857   : > { %v2817_v16 = vpop.f32.mrf.mxu0 }
 0x858   : > { %v2830_v60 = vmul.f32 %v3922_v11, %v2817_v16 }
 0x85a   : > { %v2834_v0 = vpack.c.bf16 %v2830_v60, %v2830_v60  ;;  %v3924_v41 = vpop.eup %3923 }
 0x85b   : > { %v2407_v32 = vpop.xlane.xlu1 %2406 }
 0x85c   : > { %2843 = vrot.lane.b32.xlu0 %v2834_v0, %s4272_s0 }
 0x85f   : > { %v2820_v35 = vpop.f32.mrf.mxu0 }
 0x863   : > { %v2736_v38 = vpop.xlane.xlu1 %2735 }
 0x864   : > { %3925 = vrcp.f32 %v2736_v38 }
 0x865   : > { %3927 = vrcp.f32 %v2405_v24 }
 0x866   : > { %3929 = vrcp.f32 %v2407_v32 }
 0x867   : > { %v2822_v2 = vpop.f32.mrf.mxu0 }
 0x868   : > { %v2832_v61 = vmul.f32 %v3924_v41, %v2822_v2 }
 0x86a   : > { %v3926_v44 = vpop.eup %3925  ;;  %v2836_v59 = vpack.c.bf16 %v2832_v61, %v2832_v61 }
 0x86b   : > { %v2831_v25 = vmul.f32 %v3926_v44, %v2820_v35  ;;  %v3928_v18 = vpop.eup %3927 }
 0x86c   : > { %2847 = vrot.lane.b32.xlu0 %v2836_v59, %s4272_s0  ;;  %v3930_v14 = vpop.eup %3929 }
 0x86d   : > { %v2487_v29 = vpop.f32.mrf.mxu2  ;;  %v2835_v55 = vpack.c.bf16 %v2831_v25, %v2831_v25 }
 0x86e   : > { %v2501_v33 = vmul.f32 %v3928_v18, %v2487_v29 }
 0x86f   : > { %2845 = vrot.lane.b32.xlu1 %v2835_v55, %s4272_s0  ;;  %s4137_s0 = sshra.s32 %s3067_s8, 4  ;;  %s4138_s0 = int_to_ptr.hbm [resolvable:$true] %s4137_s0 }
 0x870   : > { %v2505_v51 = vpack.c.bf16 %v2501_v33, %v2501_v33  ;;  %s4139_s26 = scalar_lea.hbm %s4138_s0, 32  ;;  %p4144_p7 = scmp.lt.s32.totalorder %s4138_s0, %s5738_s17 }
 0x871   : > { %p4140_p1 = scmp.ne.s32.totalorder %s4138_s0, %s4139_s26  ;;  %p4145_p2 = scmp.lt.s32.totalorder %s4143_s10, %s4139_s26 }
 0x872   : > { %2510 = vst.msk [vmem:[#allocation4] sm:$0xf] %vm2509_vm8, %v2505_v51 }
 0x873   : > { %p4141_p6 = pnand %p4140_p1, %p4474_p3  ;;  %p4146_p9 = por %p4145_p2, %p4144_p7 }
 0x875   : > { %v2489_v23 = vpop.f32.mrf.mxu2  ;;  %p4142_p11 = pneg %p4141_p6 }
 0x876   : > { %v2502_v12 = vmul.f32 %v3930_v14, %v2489_v23  ;;  %v3876_v23 = vld [vmem:[%s5736_s28] ss:$0 sm:$0xff] }
 0x877   : > { %p4147_p10 = pnand %p4146_p9, %p4142_p11 }
 0x878   : > { %v2506_v54 = vpack.c.bf16 %v2502_v12, %v2502_v12 }
 0x87a   : > { %2511 = vst.msk [vmem:[#allocation4 + $0x4] sm:$0xf] %vm2509_vm8, %v2506_v54  ;;  %v2409_v27 = vpop.xlane.xlu1 %2408 }
 0x87b   : > { %3931 = vrcp.f32 %v2409_v27 }
 0x881   : > { %v3932_v6 = vpop.eup %3931 }
 0x882   : > { %v2411_v58 = vpop.xlane.xlu1 %2410 }
 0x883   : > { %3933 = vrcp.f32 %v2411_v58 }
 0x889   : > { %v3934_v53 = vpop.eup %3933 }
 0x894   : > { %v2492_v34 = vpop.f32.mrf.mxu2 }
 0x895   : > { %v2503_v20 = vmul.f32 %v3932_v6, %v2492_v34 }
 0x897   : > { %v2507_v57 = vpack.c.bf16 %v2503_v20, %v2503_v20 }
 0x899   : > { %2512 = vst.msk [vmem:[#allocation4 + $0x8] sm:$0xf] %vm2509_vm8, %v2507_v57 }
 0x89c   : > { %v2494_v28 = vpop.f32.mrf.mxu2 }
 0x89d   : > { %v2504_v36 = vmul.f32 %v3934_v53, %v2494_v28 }
 0x89f   : > { %v2508_v19 = vpack.c.bf16 %v2504_v36, %v2504_v36 }
 0x8a1   : > { %2513 = vst.msk [vmem:[#allocation4 + $0xc] sm:$0xf] %vm2509_vm8, %v2508_v19 }
 0x8ae   : > { %v2842_v37 = vpop.permute.xlu2 %2841 }
 0x8af   : > { %2854 = vst.msk [vmem:[#allocation4] sm:$0xf] %vm2853_vm3, %v2842_v37 }
 0x8ce   : > { %v2844_v45 = vpop.permute.xlu0 %2843 }
 0x8cf   : > { %2855 = vst.msk [vmem:[#allocation4 + $0x4] sm:$0xf] %vm2853_vm3, %v2844_v45 }
 0x8d6   : > { %v3614_v56 = vld [vmem:[#allocation4] sm:$0xff] }
 0x8d7   : > { %2946 = vmatmul.bf16.vlgmr.msrb.gmra.mxu2 %v3614_v56 }
 0x8de   : > { %v2848_v43 = vpop.permute.xlu0 %2847 }
 0x8df   : > { %2857 = vst.msk [vmem:[#allocation4 + $0xc] sm:$0xf] %vm2853_vm3, %v2848_v43 }
 0x8e1   : > { %v2846_v50 = vpop.permute.xlu1 %2845 }
 0x8e2   : > { %2856 = vst.msk [vmem:[#allocation4 + $0x8] sm:$0xf] %vm2853_vm3, %v2846_v50 }
 0x8e9   : > { %v3615_v30 = vld [vmem:[#allocation4 + $0x8] sm:$0xff] }
 0x8ea   : > { %2951 = vmatmul.bf16.gmra.mxu2 %v3615_v30 }
 0x95a   : > { %v2947_v52 = vpop.f32.mrf.mxu2 }
 0x95b   : > { %2958 = vadd.xlane.f32.xlu2 %v2947_v52 }
 0x962   : > { %v2949_v21 = vpop.f32.mrf.mxu2 }
 0x963   : > { %2960 = vadd.xlane.f32.xlu0 %v2949_v21 }
 0x96d   : > { %v2952_v31 = vpop.f32.mrf.mxu2 }
 0x96e   : > { %2962 = vadd.xlane.f32.xlu1 %v2952_v31 }
 0x975   : > { %v2954_v39 = vpop.f32.mrf.mxu2 }
 0x976   : > { %2964 = vadd.xlane.f32.xlu2 %v2954_v39 }
 0x9ce   : > { %v2959_v9 = vpop.xlane.xlu2 %2958 }
 0x9cf   : > { %v2966_v7 = vmul.f32 %v2959_v9, %v5392_v15 }
 0x9d1   : > { %v2970_v10 = vsub.f32 %v2947_v52, %v2966_v7 }
 0x9d3   : > { %v2974_v8 = vmul.f32 %v2970_v10, %v2970_v10 }
 0x9d5   : > { %2978 = vadd.xlane.f32.xlu0 %v2974_v8 }
 0x9d6   : > { %v2961_v46 = vpop.xlane.xlu0 %2960 }
 0x9d7   : > { %v2967_v5 = vmul.f32 %v2961_v46, %v5392_v15 }
 0x9d9   : > { %v2971_v1 = vsub.f32 %v2949_v21, %v2967_v5 }
 0x9db   : > { %v2975_v22 = vmul.f32 %v2971_v1, %v2971_v1 }
 0x9dd   : > { %2980 = vadd.xlane.f32.xlu2 %v2975_v22 }
 0x9e1   : > { %v2963_v40 = vpop.xlane.xlu1 %2962 }
 0x9e2   : > { %v2968_v42 = vmul.f32 %v2963_v40, %v5392_v15 }
 0x9e4   : > { %v5552_v47 = vsub.f32 %v2952_v31, %v2968_v42 }
 0x9e6   : > { %v2976_v11 = vmul.f32 %v5552_v47, %v5552_v47 }
 0x9e8   : > { %2982 = vadd.xlane.f32.xlu0 %v2976_v11 }
 0x9e9   : > { %v2965_v16 = vpop.xlane.xlu2 %2964 }
 0x9ea   : > { %v2969_v60 = vmul.f32 %v2965_v16, %v5392_v15 }
 0x9ec   : > { %v5557_v0 = vsub.f32 %v2954_v39, %v2969_v60 }
 0x9ee   : > { %v2977_v32 = vmul.f32 %v5557_v0, %v5557_v0 }
 0x9f0   : > { %2984 = vadd.xlane.f32.xlu2 %v2977_v32 }
 0xa48   : > { %v2979_v49 = vpop.xlane.xlu0 %2978 }
 0xa49   : > { %v2986_v35 = vmul.f32 %v2979_v49, %v5392_v15 }
 0xa4b   : > { %v2990_v38 = vadd.f32 1e-05, %v2986_v35 }
 0xa4d   : > { %3935 = vrsqrt.f32 %v2990_v38  ;;  %vm3000_vm5 = vweird.f32 %v2990_v38 }
 0xa50   : > { %v2981_v24 = vpop.xlane.xlu2 %2980 }
 0xa51   : > { %v2987_v41 = vmul.f32 %v2981_v24, %v5392_v15 }
 0xa53   : > { %v3936_v2 = vpop.eup %3935  ;;  %v2991_v61 = vadd.f32 1e-05, %v2987_v41 }
 0xa54   : > { %v2995_v44 = vmul.f32 %v3936_v2, %v2990_v38  ;;  %vm3001_vm4 = vweird.f32 %v3936_v2 }
 0xa55   : > { %3937 = vrsqrt.f32 %v2991_v61  ;;  %vm3002_vm6 = vmor %vm3000_vm5, %vm3001_vm4  ;;  %vm3010_vm9 = vweird.f32 %v2991_v61 }
 0xa56   : > { %v2996_v59 = vmul.f32 %v3936_v2, %v2995_v44 }
 0xa58   : > { %v2997_v25 = vmul.f32 0.5, %v2996_v59 }
 0xa5a   : > { %v2998_v18 = vsub.f32 1.5, %v2997_v25 }
 0xa5b   : > { %v3938_v29 = vpop.eup %3937  ;;  %v2983_v55 = vpop.xlane.xlu0 %2982 }
 0xa5c   : > { %v2999_v33 = vmul.f32 %v3936_v2, %v2998_v18  ;;  %v3005_v51 = vmul.f32 %v3938_v29, %v2991_v61  ;;  %v2988_v14 = vmul.f32 %v2983_v55, %v5392_v15  ;;  %vm3011_vm7 = vweird.f32 %v3938_v29 }
 0xa5d   : > { %vm3012_vm10 = vmor %vm3010_vm9, %vm3011_vm7 }
 0xa5e   : > { %v3003_v12 = vsel %vm3002_vm6, %v3936_v2, %v2999_v33  ;;  %v3006_v54 = vmul.f32 %v3938_v29, %v3005_v51  ;;  %v2992_v27 = vadd.f32 1e-05, %v2988_v14 }
 0xa5f   : > { %v3034_v62 = vmul.f32 %v3003_v12, %v2970_v10 }
 0xa60   : > { %v3007_v63 = vmul.f32 0.5, %v3006_v54  ;;  %3939 = vrsqrt.f32 %v2992_v27  ;;  %vm3020_vm11 = vweird.f32 %v2992_v27 }
 0xa61   : > { %v3041_v58 = vmul.f32 %v3876_v23, %v3034_v62 }
 0xa62   : > { %v3008_v6 = vsub.f32 1.5, %v3007_v63 }
 0xa63   : > { %3045 = vst [vmem:[%s4563_s20] sm:$0xff] %v3041_v58  ;;  %v2985_v34 = vpop.xlane.xlu2 %2984 }
 0xa64   : > { %v3009_v20 = vmul.f32 %v3938_v29, %v3008_v6  ;;  %v2989_v4 = vmul.f32 %v2985_v34, %v5392_v15 }
 0xa66   : > { %v3940_v57 = vpop.eup %3939  ;;  %v3013_v13 = vsel %vm3012_vm10, %v3938_v29, %v3009_v20  ;;  %v2993_v53 = vadd.f32 1e-05, %v2989_v4 }
 0xa67   : > { %v3035_v28 = vmul.f32 %v3013_v13, %v2971_v1  ;;  %v3015_v36 = vmul.f32 %v3940_v57, %v2992_v27  ;;  %vm3021_vm2 = vweird.f32 %v3940_v57 }
 0xa68   : > { %3941 = vrsqrt.f32 %v2993_v53  ;;  %vm3022_vm12 = vmor %vm3020_vm11, %vm3021_vm2  ;;  %vm3030_vm14 = vweird.f32 %v2993_v53 }
 0xa69   : > { %v3042_v26 = vmul.f32 %v3876_v23, %v3035_v28  ;;  %v3016_v19 = vmul.f32 %v3940_v57, %v3015_v36 }
 0xa6b   : > { %3046 = vst [vmem:[%s4563_s20 + $0x8] sm:$0xff] %v3042_v26  ;;  %v3017_v17 = vmul.f32 0.5, %v3016_v19 }
 0xa6d   : > { %v3018_v37 = vsub.f32 1.5, %v3017_v17 }
 0xa6e   : > { %v3942_v48 = vpop.eup %3941 }
 0xa6f   : > { %v3019_v3 = vmul.f32 %v3940_v57, %v3018_v37  ;;  %v3025_v15 = vmul.f32 %v3942_v48, %v2993_v53  ;;  %vm3031_vm13 = vweird.f32 %v3942_v48 }
 0xa70   : > { %vm3032_vm15 = vmor %vm3030_vm14, %vm3031_vm13 }
 0xa71   : > { %v3023_v45 = vsel %vm3022_vm12, %v3940_v57, %v3019_v3  ;;  %v3026_v56 = vmul.f32 %v3942_v48, %v3025_v15 }
 0xa72   : > { %v3036_v43 = vmul.f32 %v3023_v45, %v5552_v47 }
 0xa73   : > { %v3027_v50 = vmul.f32 0.5, %v3026_v56 }
 0xa74   : > { %v3043_v30 = vmul.f32 %v3876_v23, %v3036_v43 }
 0xa75   : > { %v3028_v52 = vsub.f32 1.5, %v3027_v50 }
 0xa76   : > { %3047 = vst [vmem:[%s4563_s20 + $0x10] sm:$0xff] %v3043_v30 }
 0xa77   : > { %v3029_v21 = vmul.f32 %v3942_v48, %v3028_v52 }
 0xa79   : > { %v3033_v31 = vsel %vm3032_vm15, %v3942_v48, %v3029_v21 }
 0xa7a   : > { %v3037_v39 = vmul.f32 %v3033_v31, %v5557_v0 }
 0xa7c   : > { %v3044_v9 = vmul.f32 %v3876_v23, %v3037_v39 }
 0xa7e   : > { %3048 = vst [vmem:[%s4563_s20 + $0x18] sm:$0xff] %v3044_v9 }
 0xa7f   : > { %4150 = shalt.err (!%p4147_p10)
}
 0xa80   : > { %s4274_s29 = smov 128   ;;  %s4275_s20 = smov 8  }
 0xa81   : > { %3669 = dma.vmem_to_hbm [thread:$0]  (%p4474_p3), %s3065_s7, 512, %s3067_s8, %s3050_s18, %s4274_s29, %s4274_s29, %s4275_s20  }
 0xa82 PF: > { %s5740_s19 = sld [smem:[#allocation23_spill]]  ;;  %p3704_p13 = scmp.ge.s32.totalorder %s4261_s13, 2 }
 0xa84   : > { %p3692_p0 = pnand %p3704_p13, %p4486_p8 }
 0xa86   : > { %p3693_p4 = pneg %p3692_p0 }
 0xa88   : > { %s3081_s14 = sand.u32 1, %s5740_s19  }
 0xa89   : > { %s3082_s12 = scalar_lea.sflag [#allocation7], %s3081_s14 }
 0xa8a   : > { %4216 = dma.done.wait (%p3693_p4), %s3082_s12, 512  }
 0xa8b   : > { %4218 = vsyncadd (%p3693_p4), %s3082_s12, 4294966784  ;;  %s33_s13 = sadd.s32 1, %s4261_s13   ;;  %s5742_s2 = sld [smem:[#allocation24_spill]] }
 0xa8c   : > { %p30_p12 = scmp.ge.s32.totalorder %s33_s13, 6   ;;  %s5743_s26 = sld [smem:[#allocation31_spill]] }
 0xa8d   : > { %s5744_s27 = sld [smem:[#allocation26_spill]]  ;;  %s5747_s21 = smov %s4225_s22 }
 0xa8e   : > { %s5745_s29 = sld [smem:[#allocation27_spill]]  ;;  %s5748_s22 = smov %s4229_s23 }
 0xa8f   : > { %s5746_s11 = sld [smem:[#allocation29_spill]]  ;;  %s5749_s23 = smov %s4514_s5 }
 0xa90   : > { %s5750_s24 = smov %s4237_s25  ;;  %s5752_s28 = smov %s4257_s30 }
 0xa91   : > { %s5751_s25 = smov %s5742_s2  ;;  %32 = sbr.rel (!%p30_p12) target bundleno = 24 (0x18), region = 150 }
 0xa95   : > { %s5753_s30 = smov %s5746_s11 }
 0xa96   :  { %3088 = vsyncpa [#allocation6], 1 }
 0xa97   :  { %3090 = vsyncpa [#allocation6 + $0x1], 1 }
 0xa98   :  { %3091 = vsyncpa [#allocation9], 1 }
 0xa99   :  { %3093 = vsyncpa [#allocation9 + $0x1], 1 }
 0xa9a   :  { %3094 = vsyncpa [#allocation12], 1 }
 0xa9b   :  { %3095 = vsyncpa [#allocation15], 1 }
 0xa9c   :  { %3096 = vsyncpa [#allocation7], 1 }
 0xa9d   :  { %3098 = vsyncpa [#allocation7 + $0x1], 1 }

</bundles_post_ra>
